<compile_context>
chip_gen: v6e
topology: v6e:2x2x1
jax: 0.10.0
libtpu: 0.0.40
codegen_flags: <defaults>
</compile_context>

<pallas_src>
import functools
import math

import jax
import jax.numpy as jnp
from jax import lax
from jax.experimental import pallas as pl
from jax.experimental.pallas import tpu as pltpu

_APPROX_RECIPROCAL = True      # debug switch: False -> exact 1/x in softmax
_NEG_BIG = -1e30               # finite "−inf" for the online-softmax running max


# ----------------------------- kernel helpers -------------------------------

def _layernorm(x, gamma, beta, eps=1e-5):
    mu = jnp.mean(x, axis=-1, keepdims=True)
    var = jnp.mean(jnp.square(x - mu), axis=-1, keepdims=True)
    return (x - mu) * lax.rsqrt(var + eps) * gamma + beta


def _recip(x):
    if _APPROX_RECIPROCAL:
        return pl.reciprocal(x, approx=True)
    return 1.0 / x


def _split_heads(t, heads, dim_head):
    # (n, heads*dim_head) -> (heads, n, dim_head)
    n = t.shape[0]
    return jnp.transpose(t.reshape(n, heads, dim_head), (1, 0, 2))


def _flash_mha(q_h, k_ref, v_ref, wo_h, bo, *, kv_tile):
    """Online-softmax attention of one query tile against VMEM-resident K/V.

    q_h:   (H, TQ, dh) f32, already scaled by dim_head**-0.5
    k_ref: (H, KV, dh) bf16 scratch ref (head-split K cache)
    v_ref: (H, KV, dh) bf16 scratch ref
    wo_h:  (H, dh, dim) bf16 out-projection (head-major)
    bo:    (1, dim) f32 out-projection bias
    """
    heads, tq, dh = q_h.shape
    kv_len = k_ref.shape[1]
    num_kv = kv_len // kv_tile
    q_b = q_h.astype(jnp.bfloat16)

    def body(i, carry):
        m, l, acc = carry
        if num_kv > 1:
            off = pl.multiple_of(i * kv_tile, kv_tile)
        else:
            off = 0
        kb = k_ref[:, pl.ds(off, kv_tile), :]                     # (H,TK,dh) bf16
        vb = v_ref[:, pl.ds(off, kv_tile), :]
        s = jnp.einsum("hqd,hkd->hqk", q_b, kb,
                       preferred_element_type=jnp.float32)        # (H,TQ,TK) f32
        m_new = jnp.maximum(m, jnp.max(s, axis=-1, keepdims=True))
        alpha = jnp.exp(m - m_new)
        p = jnp.exp(s - m_new)                                    # unnormalized
        l_new = l * alpha + jnp.sum(p, axis=-1, keepdims=True)
        acc_new = acc * alpha + jnp.einsum(
            "hqk,hkd->hqd", p.astype(jnp.bfloat16), vb,
            preferred_element_type=jnp.float32)
        return m_new, l_new, acc_new

    m0 = jnp.full((heads, tq, 1), _NEG_BIG, jnp.float32)
    l0 = jnp.zeros((heads, tq, 1), jnp.float32)
    a0 = jnp.zeros((heads, tq, dh), jnp.float32)
    if num_kv == 1:
        m, l, acc = body(0, (m0, l0, a0))
    else:
        m, l, acc = lax.fori_loop(0, num_kv, body, (m0, l0, a0))

    # Deferred normalization: rescale the (H, TQ, dh) accumulator, not scores.
    oh = (acc * _recip(l)).astype(jnp.bfloat16)
    # Head-batched out-projection (no concat transpose): H matmuls + head-sum.
    out = jnp.einsum("hqd,hdo->hqo", oh, wo_h,
                     preferred_element_type=jnp.float32)          # (H, TQ, dim)
    return jnp.sum(out, axis=0) + bo                              # (TQ, dim)


# ------------------------------- fused kernel --------------------------------

def transformer_block_kernel(
        x_q_ref, x_full_ref, ctx_ref,
        g1_ref, b1_ref, wq1_ref, wk1_ref, wv1_ref, wo1_ref, bo1_ref,
        g2_ref, b2_ref, wq2_ref, wk2_ref, wv2_ref, wo2_ref, bo2_ref,
        g3_ref, b3_ref, w_ff1_ref, b_ff1_ref, w_ff2_ref, b_ff2_ref,
        o_ref,
        k1_ref, v1_ref, k2_ref, v2_ref,
        *, heads, dim_head, ff_inner, kv_tile_self, kv_tile_cross):
    f32, bf16 = jnp.float32, jnp.bfloat16
    scale = dim_head ** (-0.5)

    # -- Build per-batch K/V caches once (first query tile of this batch) ----
    @pl.when(pl.program_id(1) == 0)
    def _():
        y_full = _layernorm(x_full_ref[0].astype(f32), g1_ref[...], b1_ref[...])
        y_full = y_full.astype(bf16)
        k1 = jnp.dot(y_full, wk1_ref[...], preferred_element_type=f32)
        v1 = jnp.dot(y_full, wv1_ref[...], preferred_element_type=f32)
        k1_ref[...] = _split_heads(k1, heads, dim_head).astype(bf16)
        v1_ref[...] = _split_heads(v1, heads, dim_head).astype(bf16)

        ctx = ctx_ref[0].astype(bf16)
        k2 = jnp.dot(ctx, wk2_ref[...], preferred_element_type=f32)
        v2 = jnp.dot(ctx, wv2_ref[...], preferred_element_type=f32)
        k2_ref[...] = _split_heads(k2, heads, dim_head).astype(bf16)
        v2_ref[...] = _split_heads(v2, heads, dim_head).astype(bf16)

    x = x_q_ref[0].astype(f32)                                    # (TQ, dim), f32

    # 1) x = attn1(norm1(x)) + x    (self-attention, KV from the full sequence)
    y = _layernorm(x, g1_ref[...], b1_ref[...])
    q = jnp.dot(y.astype(bf16), wq1_ref[...], preferred_element_type=f32) * scale
    x = x + _flash_mha(_split_heads(q, heads, dim_head), k1_ref, v1_ref,
                       wo1_ref[...], bo1_ref[...], kv_tile=kv_tile_self)

    # 2) x = attn2(norm2(x), context) + x    (cross-attention)
    y = _layernorm(x, g2_ref[...], b2_ref[...])
    q = jnp.dot(y.astype(bf16), wq2_ref[...], preferred_element_type=f32) * scale
    x = x + _flash_mha(_split_heads(q, heads, dim_head), k2_ref, v2_ref,
                       wo2_ref[...], bo2_ref[...], kv_tile=kv_tile_cross)

    # 3) x = ff(norm3(x)) + x    (GEGLU: Linear(dim, 2*ff_inner), a * gelu(gate))
    y = _layernorm(x, g3_ref[...], b3_ref[...])
    proj = jnp.dot(y.astype(bf16), w_ff1_ref[...],
                   preferred_element_type=f32) + b_ff1_ref[...]
    a = proj[:, :ff_inner]
    gate = proj[:, ff_inner:]
    gelu_gate = 0.5 * gate * (1.0 + lax.erf(gate * (1.0 / math.sqrt(2.0))))
    h = (a * gelu_gate).astype(bf16)
    x = x + jnp.dot(h, w_ff2_ref[...], preferred_element_type=f32) + b_ff2_ref[...]

    o_ref[0] = x.astype(o_ref.dtype)


# --------------------------------- wrapper ------------------------------------

def _pick_tile(n, target):
    """Largest divisor of n that is <= target and a multiple of 8 (else n)."""
    if n <= target:
        return n
    for t in range(target, 0, -1):
        if n % t == 0 and t % 8 == 0:
            return t
    return n


def basic_transformer_block(x, context, params, *, heads, dim_head,
                            q_tile=256, kv_tile=512):
    """Forward of BasicTransformerBlock (disable_self_attn=False, gated_ff=True).

    q_tile: use 256 on v6e/v7x (2x256^2 MXU), 128 on v5e (4x128^2 MXU).
    """
    B, N, dim = x.shape
    M, cdim = context.shape[1], context.shape[2]
    inner = heads * dim_head
    two_ff = params["w_ff1"].shape[1]
    ff_inner = params["w_ff2"].shape[0]

    tq = _pick_tile(N, q_tile)
    tk_self = _pick_tile(N, kv_tile)
    tk_cross = _pick_tile(M, kv_tile)

    bf16 = jnp.bfloat16
    # bf16 MXU operands (f32 accumulation happens inside the kernel); norm
    # params and biases stay f32 (added after the f32 accumulator).
    wq1 = params["wq1"].astype(bf16)
    wk1 = params["wk1"].astype(bf16)
    wv1 = params["wv1"].astype(bf16)
    wo1 = params["wo1"].astype(bf16).reshape(heads, dim_head, dim)
    wq2 = params["wq2"].astype(bf16)
    wk2 = params["wk2"].astype(bf16)
    wv2 = params["wv2"].astype(bf16)
    wo2 = params["wo2"].astype(bf16).reshape(heads, dim_head, dim)
    w_ff1 = params["w_ff1"].astype(bf16)
    w_ff2 = params["w_ff2"].astype(bf16)

    def rep(shape):
        # Constant index_map: weight blocks are fetched once and reused across
        # the whole grid.
        zeros = (0,) * len(shape)
        return pl.BlockSpec(shape, lambda b, q, _z=zeros: _z)

    kernel = functools.partial(
        transformer_block_kernel, heads=heads, dim_head=dim_head,
        ff_inner=ff_inner, kv_tile_self=tk_self, kv_tile_cross=tk_cross)

    return pl.pallas_call(
        kernel,
        out_shape=jax.ShapeDtypeStruct((B, N, dim), x.dtype),
        grid=(B, N // tq),
        in_specs=[
            pl.BlockSpec((1, tq, dim), lambda b, q: (b, q, 0)),   # x (query tile)
            pl.BlockSpec((1, N, dim), lambda b, q: (b, 0, 0)),    # x (full, self-KV)
            pl.BlockSpec((1, M, cdim), lambda b, q: (b, 0, 0)),   # context
            rep((1, dim)), rep((1, dim)),                         # norm1
            rep((dim, inner)), rep((dim, inner)), rep((dim, inner)),
            rep((heads, dim_head, dim)), rep((1, dim)),           # attn1
            rep((1, dim)), rep((1, dim)),                         # norm2
            rep((dim, inner)), rep((cdim, inner)), rep((cdim, inner)),
            rep((heads, dim_head, dim)), rep((1, dim)),           # attn2
            rep((1, dim)), rep((1, dim)),                         # norm3
            rep((dim, two_ff)), rep((1, two_ff)),                 # GEGLU proj
            rep((ff_inner, dim)), rep((1, dim)),                  # FF out
        ],
        out_specs=pl.BlockSpec((1, tq, dim), lambda b, q: (b, q, 0)),
        scratch_shapes=[
            pltpu.VMEM((heads, N, dim_head), bf16),               # K cache (self)
            pltpu.VMEM((heads, N, dim_head), bf16),               # V cache (self)
            pltpu.VMEM((heads, M, dim_head), bf16),               # K cache (cross)
            pltpu.VMEM((heads, M, dim_head), bf16),               # V cache (cross)
        ],
        compiler_params=pltpu.CompilerParams(
            # Token axis must stay "arbitrary": the K/V caches are written at
            # qi == 0 and reused by later query tiles of the same batch element.
            dimension_semantics=("parallel", "arbitrary"),
            vmem_limit_bytes=48 * 1024 * 1024,
        ),
    )(x, x, context,
      params["g1"], params["b1"], wq1, wk1, wv1, wo1, params["bo1"],
      params["g2"], params["b2"], wq2, wk2, wv2, wo2, params["bo2"],
      params["g3"], params["b3"], w_ff1, params["b_ff1"], w_ff2, params["b_ff2"])


# --------------------------- pure-JAX reference -------------------------------

def _ref_layernorm(x, g, b, eps=1e-5):
    mu = jnp.mean(x, axis=-1, keepdims=True)
    var = jnp.mean(jnp.square(x - mu), axis=-1, keepdims=True)
    return (x - mu) / jnp.sqrt(var + eps) * g + b


def _ref_attn(y, ctx, wq, wk, wv, wo, bo, heads, dim_head):
    B, N, _ = y.shape
    M = ctx.shape[1]
    q = y @ wq
    k = ctx @ wk
    v = ctx @ wv
    q = q.reshape(B, N, heads, dim_head).transpose(0, 2, 1, 3)
    k = k.reshape(B, M, heads, dim_head).transpose(0, 2, 1, 3)
    v = v.reshape(B, M, heads, dim_head).transpose(0, 2, 1, 3)
    sim = jnp.einsum("bhid,bhjd->bhij", q, k) * (dim_head ** -0.5)
    p = jax.nn.softmax(sim, axis=-1)
    out = jnp.einsum("bhij,bhjd->bhid", p, v)
    out = out.transpose(0, 2, 1, 3).reshape(B, N, heads * dim_head)
    return out @ wo + bo


def reference(x, context, p, heads, dim_head):
    y = _ref_layernorm(x, p["g1"], p["b1"])
    x = _ref_attn(y, y, p["wq1"], p["wk1"], p["wv1"], p["wo1"], p["bo1"],
                  heads, dim_head) + x
    y = _ref_layernorm(x, p["g2"], p["b2"])
    x = _ref_attn(y, context, p["wq2"], p["wk2"], p["wv2"], p["wo2"], p["bo2"],
                  heads, dim_head) + x
    y = _ref_layernorm(x, p["g3"], p["b3"])
    proj = y @ p["w_ff1"] + p["b_ff1"]
    ff_inner = p["w_ff2"].shape[0]
    a, gate = proj[..., :ff_inner], proj[..., ff_inner:]
    h = a * jax.nn.gelu(gate, approximate=False)
    return h @ p["w_ff2"] + p["b_ff2"] + x


# ---------------------------------- main --------------------------------------

if __name__ == "__main__":
    # small shapes consistent with BasicTransformerBlock
    B, N, dim = 2, 16, 32          # x: (batch, tokens, dim)
    M, context_dim = 8, 16         # context: (batch, ctx_tokens, context_dim)
    n_heads, d_head = 4, 8         # inner_dim = 32
    inner = n_heads * d_head
    ff_inner = dim * 4             # 128; GEGLU proj -> 2 * ff_inner

    key = jax.random.PRNGKey(0)
    ks = jax.random.split(key, 16)
    f32 = jnp.float32
    s = 0.05

    params = dict(
        # norm1 / attn1 (self-attention)
        g1=jnp.ones((1, dim), f32), b1=jnp.zeros((1, dim), f32),
        wq1=jax.random.normal(ks[0], (dim, inner), f32) * s,
        wk1=jax.random.normal(ks[1], (dim, inner), f32) * s,
        wv1=jax.random.normal(ks[2], (dim, inner), f32) * s,
        wo1=jax.random.normal(ks[3], (inner, dim), f32) * s,
        bo1=jax.random.normal(ks[4], (1, dim), f32) * s,
        # norm2 / attn2 (cross-attention with context_dim)
        g2=jnp.ones((1, dim), f32), b2=jnp.zeros((1, dim), f32),
        wq2=jax.random.normal(ks[5], (dim, inner), f32) * s,
        wk2=jax.random.normal(ks[6], (context_dim, inner), f32) * s,
        wv2=jax.random.normal(ks[7], (context_dim, inner), f32) * s,
        wo2=jax.random.normal(ks[8], (inner, dim), f32) * s,
        bo2=jax.random.normal(ks[9], (1, dim), f32) * s,
        # norm3 / GEGLU feed-forward
        g3=jnp.ones((1, dim), f32), b3=jnp.zeros((1, dim), f32),
        w_ff1=jax.random.normal(ks[10], (dim, 2 * ff_inner), f32) * s,
        b_ff1=jax.random.normal(ks[11], (1, 2 * ff_inner), f32) * s,
        w_ff2=jax.random.normal(ks[12], (ff_inner, dim), f32) * s,
        b_ff2=jax.random.normal(ks[13], (1, dim), f32) * s,
    )
    # Quantize MXU weights to bf16 once so the kernel and the f32 reference
    # consume identical weight values (the kernel feeds the MXU in bf16).
    for name in ("wq1", "wk1", "wv1", "wo1", "wq2", "wk2", "wv2", "wo2",
                 "w_ff1", "w_ff2"):
        params[name] = params[name].astype(jnp.bfloat16).astype(f32)

    x = jax.random.normal(ks[14], (B, N, dim), f32)
    context = jax.random.normal(ks[15], (B, M, context_dim), f32)

    out = basic_transformer_block(x, context, params, heads=n_heads,
                                  dim_head=d_head)
    out = jax.block_until_ready(out)

    ref = reference(x, context, params, n_heads, d_head)
    assert out.shape == (B, N, dim)
    # tolerance covers bf16 MXU operands + approx reciprocal in the softmax
    assert jnp.allclose(out, ref, atol=3e-2, rtol=3e-2), (
        float(jnp.max(jnp.abs(out - ref))))

    print("KERNEL_OK")
</pallas_src>

<mosaic_0001>
module attributes {stable_mosaic.version = 11 : i64} {
  func.func @transformer_block_kernel(%arg0: i32, %arg1: i32, %arg2: memref<1x16x32xf32, #tpu.memory_space<vmem>>, %arg3: memref<1x16x32xf32, #tpu.memory_space<vmem>>, %arg4: memref<1x8x16xf32, #tpu.memory_space<vmem>>, %arg5: memref<1x32xf32, #tpu.memory_space<vmem>>, %arg6: memref<1x32xf32, #tpu.memory_space<vmem>>, %arg7: memref<32x32xbf16, #tpu.memory_space<vmem>>, %arg8: memref<32x32xbf16, #tpu.memory_space<vmem>>, %arg9: memref<32x32xbf16, #tpu.memory_space<vmem>>, %arg10: memref<4x8x32xbf16, #tpu.memory_space<vmem>>, %arg11: memref<1x32xf32, #tpu.memory_space<vmem>>, %arg12: memref<1x32xf32, #tpu.memory_space<vmem>>, %arg13: memref<1x32xf32, #tpu.memory_space<vmem>>, %arg14: memref<32x32xbf16, #tpu.memory_space<vmem>>, %arg15: memref<16x32xbf16, #tpu.memory_space<vmem>>, %arg16: memref<16x32xbf16, #tpu.memory_space<vmem>>, %arg17: memref<4x8x32xbf16, #tpu.memory_space<vmem>>, %arg18: memref<1x32xf32, #tpu.memory_space<vmem>>, %arg19: memref<1x32xf32, #tpu.memory_space<vmem>>, %arg20: memref<1x32xf32, #tpu.memory_space<vmem>>, %arg21: memref<32x256xbf16, #tpu.memory_space<vmem>>, %arg22: memref<1x256xf32, #tpu.memory_space<vmem>>, %arg23: memref<128x32xbf16, #tpu.memory_space<vmem>>, %arg24: memref<1x32xf32, #tpu.memory_space<vmem>>, %arg25: memref<1x16x32xf32, #tpu.memory_space<vmem>>, %arg26: memref<4x16x8xbf16, #tpu.memory_space<vmem>>, %arg27: memref<4x16x8xbf16, #tpu.memory_space<vmem>>, %arg28: memref<4x8x8xbf16, #tpu.memory_space<vmem>>, %arg29: memref<4x8x8xbf16, #tpu.memory_space<vmem>>) attributes {dimension_semantics = [#tpu.dimension_semantics<parallel>, #tpu.dimension_semantics<arbitrary>], iteration_bounds = array<i64: 2, 1>, scalar_prefetch = 0 : i64, scratch_operands = 4 : i64, tpu.core_type = #tpu.core_type<tc>, window_params = [{transform_indices = @transform_0, window_bounds = array<i64: 1, 16, 32>}, {transform_indices = @transform_1, window_bounds = array<i64: 1, 16, 32>}, {transform_indices = @transform_2, window_bounds = array<i64: 1, 8, 16>}, {pipeline_mode = #tpu.pipeline_mode<synchronous>, transform_indices = @transform_3, window_bounds = array<i64: 1, 32>}, {pipeline_mode = #tpu.pipeline_mode<synchronous>, transform_indices = @transform_4, window_bounds = array<i64: 1, 32>}, {pipeline_mode = #tpu.pipeline_mode<synchronous>, transform_indices = @transform_5, window_bounds = array<i64: 32, 32>}, {pipeline_mode = #tpu.pipeline_mode<synchronous>, transform_indices = @transform_6, window_bounds = array<i64: 32, 32>}, {pipeline_mode = #tpu.pipeline_mode<synchronous>, transform_indices = @transform_7, window_bounds = array<i64: 32, 32>}, {pipeline_mode = #tpu.pipeline_mode<synchronous>, transform_indices = @transform_8, window_bounds = array<i64: 4, 8, 32>}, {pipeline_mode = #tpu.pipeline_mode<synchronous>, transform_indices = @transform_9, window_bounds = array<i64: 1, 32>}, {pipeline_mode = #tpu.pipeline_mode<synchronous>, transform_indices = @transform_10, window_bounds = array<i64: 1, 32>}, {pipeline_mode = #tpu.pipeline_mode<synchronous>, transform_indices = @transform_11, window_bounds = array<i64: 1, 32>}, {pipeline_mode = #tpu.pipeline_mode<synchronous>, transform_indices = @transform_12, window_bounds = array<i64: 32, 32>}, {pipeline_mode = #tpu.pipeline_mode<synchronous>, transform_indices = @transform_13, window_bounds = array<i64: 16, 32>}, {pipeline_mode = #tpu.pipeline_mode<synchronous>, transform_indices = @transform_14, window_bounds = array<i64: 16, 32>}, {pipeline_mode = #tpu.pipeline_mode<synchronous>, transform_indices = @transform_15, window_bounds = array<i64: 4, 8, 32>}, {pipeline_mode = #tpu.pipeline_mode<synchronous>, transform_indices = @transform_16, window_bounds = array<i64: 1, 32>}, {pipeline_mode = #tpu.pipeline_mode<synchronous>, transform_indices = @transform_17, window_bounds = array<i64: 1, 32>}, {pipeline_mode = #tpu.pipeline_mode<synchronous>, transform_indices = @transform_18, window_bounds = array<i64: 1, 32>}, {pipeline_mode = #tpu.pipeline_mode<synchronous>, transform_indices = @transform_19, window_bounds = array<i64: 32, 256>}, {pipeline_mode = #tpu.pipeline_mode<synchronous>, transform_indices = @transform_20, window_bounds = array<i64: 1, 256>}, {pipeline_mode = #tpu.pipeline_mode<synchronous>, transform_indices = @transform_21, window_bounds = array<i64: 128, 32>}, {pipeline_mode = #tpu.pipeline_mode<synchronous>, transform_indices = @transform_22, window_bounds = array<i64: 1, 32>}, {transform_indices = @transform_23, window_bounds = array<i64: 1, 16, 32>}]} {
    %c0_i32 = arith.constant 0 : i32
    %0 = arith.cmpi eq, %arg1, %c0_i32 : i32
    %1 = arith.extui %0 : i1 to i32
    %c0_i32_0 = arith.constant 0 : i32
    %2 = arith.cmpi ne, %1, %c0_i32_0 : i32
    scf.if %2 {
      %c0_93 = arith.constant 0 : index
      %c0_94 = arith.constant 0 : index
      %c0_95 = arith.constant 0 : index
      %188 = vector.load %arg3[%c0_93, %c0_94, %c0_95] : memref<1x16x32xf32, #tpu.memory_space<vmem>>, vector<1x16x32xf32>
      %189 = vector.shape_cast %188 : vector<1x16x32xf32> to vector<16x32xf32>
      %c0_96 = arith.constant 0 : index
      %c0_97 = arith.constant 0 : index
      %190 = vector.load %arg5[%c0_96, %c0_97] : memref<1x32xf32, #tpu.memory_space<vmem>>, vector<1x32xf32>
      %c0_98 = arith.constant 0 : index
      %c0_99 = arith.constant 0 : index
      %191 = vector.load %arg6[%c0_98, %c0_99] : memref<1x32xf32, #tpu.memory_space<vmem>>, vector<1x32xf32>
      %cst_100 = arith.constant dense<0.000000e+00> : vector<16xf32>
      %192 = vector.multi_reduction <add>, %189, %cst_100 [1] : vector<16x32xf32> to vector<16xf32>
      %193 = vector.shape_cast %192 : vector<16xf32> to vector<16x1xf32>
      %cst_101 = arith.constant 3.200000e+01 : f32
      %194 = vector.broadcast %cst_101 : f32 to vector<16x1xf32>
      %195 = arith.divf %193, %194 : vector<16x1xf32>
      %196 = vector.broadcast %195 : vector<16x1xf32> to vector<16x32xf32>
      %197 = arith.subf %189, %196 : vector<16x32xf32>
      %198 = arith.mulf %197, %197 : vector<16x32xf32>
      %cst_102 = arith.constant dense<0.000000e+00> : vector<16xf32>
      %199 = vector.multi_reduction <add>, %198, %cst_102 [1] : vector<16x32xf32> to vector<16xf32>
      %200 = vector.shape_cast %199 : vector<16xf32> to vector<16x1xf32>
      %cst_103 = arith.constant 3.200000e+01 : f32
      %201 = vector.broadcast %cst_103 : f32 to vector<16x1xf32>
      %202 = arith.divf %200, %201 : vector<16x1xf32>
      %203 = vector.broadcast %195 : vector<16x1xf32> to vector<16x32xf32>
      %204 = arith.subf %189, %203 : vector<16x32xf32>
      %cst_104 = arith.constant 9.99999974E-6 : f32
      %205 = vector.broadcast %cst_104 : f32 to vector<16x1xf32>
      %206 = arith.addf %202, %205 : vector<16x1xf32>
      %207 = math.rsqrt %206 : vector<16x1xf32>
      %208 = vector.broadcast %207 : vector<16x1xf32> to vector<16x32xf32>
      %209 = arith.mulf %204, %208 : vector<16x32xf32>
      %210 = vector.broadcast %190 : vector<1x32xf32> to vector<16x32xf32>
      %211 = arith.mulf %209, %210 : vector<16x32xf32>
      %212 = vector.broadcast %191 : vector<1x32xf32> to vector<16x32xf32>
      %213 = arith.addf %211, %212 : vector<16x32xf32>
      %214 = arith.truncf %213 : vector<16x32xf32> to vector<16x32xbf16>
      %c0_105 = arith.constant 0 : index
      %c0_106 = arith.constant 0 : index
      %215 = vector.load %arg8[%c0_105, %c0_106] : memref<32x32xbf16, #tpu.memory_space<vmem>>, vector<32x32xbf16>
      %cst_107 = arith.constant dense<0.000000e+00> : vector<16x32xf32>
      %216 = tpu.matmul %214, %215, %cst_107 {dimension_numbers = #tpu.dot_dimension_numbers<[1], [0], [0], [1], [0, 0, 1, 1], [], []>} : vector<16x32xbf16>, vector<32x32xbf16>, vector<16x32xf32> -> vector<16x32xf32>
      %c0_108 = arith.constant 0 : index
      %c0_109 = arith.constant 0 : index
      %217 = vector.load %arg9[%c0_108, %c0_109] : memref<32x32xbf16, #tpu.memory_space<vmem>>, vector<32x32xbf16>
      %cst_110 = arith.constant dense<0.000000e+00> : vector<16x32xf32>
      %218 = tpu.matmul %214, %217, %cst_110 {dimension_numbers = #tpu.dot_dimension_numbers<[1], [0], [0], [1], [0, 0, 1, 1], [], []>} : vector<16x32xbf16>, vector<32x32xbf16>, vector<16x32xf32> -> vector<16x32xf32>
      %219 = vector.shape_cast %216 : vector<16x32xf32> to vector<16x4x8xf32>
      %220 = tpu.transpose %219, [1, 0, 2] : vector<16x4x8xf32> -> vector<4x16x8xf32>
      %221 = arith.truncf %220 : vector<4x16x8xf32> to vector<4x16x8xbf16>
      %c0_111 = arith.constant 0 : index
      %c0_112 = arith.constant 0 : index
      %c0_113 = arith.constant 0 : index
      %222 = vector.load %arg26[%c0_111, %c0_112, %c0_113] : memref<4x16x8xbf16, #tpu.memory_space<vmem>>, vector<4x16x8xbf16>
      tpu.vector_store %arg26[%c0_111, %c0_112, %c0_113], %221 {strides = array<i32>} : memref<4x16x8xbf16, #tpu.memory_space<vmem>>, vector<4x16x8xbf16>,
      %223 = vector.shape_cast %218 : vector<16x32xf32> to vector<16x4x8xf32>
      %224 = tpu.transpose %223, [1, 0, 2] : vector<16x4x8xf32> -> vector<4x16x8xf32>
      %225 = arith.truncf %224 : vector<4x16x8xf32> to vector<4x16x8xbf16>
      %c0_114 = arith.constant 0 : index
      %c0_115 = arith.constant 0 : index
      %c0_116 = arith.constant 0 : index
      %226 = vector.load %arg27[%c0_114, %c0_115, %c0_116] : memref<4x16x8xbf16, #tpu.memory_space<vmem>>, vector<4x16x8xbf16>
      tpu.vector_store %arg27[%c0_114, %c0_115, %c0_116], %225 {strides = array<i32>} : memref<4x16x8xbf16, #tpu.memory_space<vmem>>, vector<4x16x8xbf16>,
      %c0_117 = arith.constant 0 : index
      %c0_118 = arith.constant 0 : index
      %c0_119 = arith.constant 0 : index
      %227 = vector.load %arg4[%c0_117, %c0_118, %c0_119] : memref<1x8x16xf32, #tpu.memory_space<vmem>>, vector<1x8x16xf32>
      %228 = vector.shape_cast %227 : vector<1x8x16xf32> to vector<8x16xf32>
      %229 = arith.truncf %228 : vector<8x16xf32> to vector<8x16xbf16>
      %c0_120 = arith.constant 0 : index
      %c0_121 = arith.constant 0 : index
      %230 = vector.load %arg15[%c0_120, %c0_121] : memref<16x32xbf16, #tpu.memory_space<vmem>>, vector<16x32xbf16>
      %cst_122 = arith.constant dense<0.000000e+00> : vector<8x32xf32>
      %231 = tpu.matmul %229, %230, %cst_122 {dimension_numbers = #tpu.dot_dimension_numbers<[1], [0], [0], [1], [0, 0, 1, 1], [], []>} : vector<8x16xbf16>, vector<16x32xbf16>, vector<8x32xf32> -> vector<8x32xf32>
      %c0_123 = arith.constant 0 : index
      %c0_124 = arith.constant 0 : index
      %232 = vector.load %arg16[%c0_123, %c0_124] : memref<16x32xbf16, #tpu.memory_space<vmem>>, vector<16x32xbf16>
      %cst_125 = arith.constant dense<0.000000e+00> : vector<8x32xf32>
      %233 = tpu.matmul %229, %232, %cst_125 {dimension_numbers = #tpu.dot_dimension_numbers<[1], [0], [0], [1], [0, 0, 1, 1], [], []>} : vector<8x16xbf16>, vector<16x32xbf16>, vector<8x32xf32> -> vector<8x32xf32>
      %234 = vector.shape_cast %231 : vector<8x32xf32> to vector<8x4x8xf32>
      %235 = tpu.transpose %234, [1, 0, 2] : vector<8x4x8xf32> -> vector<4x8x8xf32>
      %236 = arith.truncf %235 : vector<4x8x8xf32> to vector<4x8x8xbf16>
      %c0_126 = arith.constant 0 : index
      %c0_127 = arith.constant 0 : index
      %c0_128 = arith.constant 0 : index
      %237 = vector.load %arg28[%c0_126, %c0_127, %c0_128] : memref<4x8x8xbf16, #tpu.memory_space<vmem>>, vector<4x8x8xbf16>
      tpu.vector_store %arg28[%c0_126, %c0_127, %c0_128], %236 {strides = array<i32>} : memref<4x8x8xbf16, #tpu.memory_space<vmem>>, vector<4x8x8xbf16>,
      %238 = vector.shape_cast %233 : vector<8x32xf32> to vector<8x4x8xf32>
      %239 = tpu.transpose %238, [1, 0, 2] : vector<8x4x8xf32> -> vector<4x8x8xf32>
      %240 = arith.truncf %239 : vector<4x8x8xf32> to vector<4x8x8xbf16>
      %c0_129 = arith.constant 0 : index
      %c0_130 = arith.constant 0 : index
      %c0_131 = arith.constant 0 : index
      %241 = vector.load %arg29[%c0_129, %c0_130, %c0_131] : memref<4x8x8xbf16, #tpu.memory_space<vmem>>, vector<4x8x8xbf16>
      tpu.vector_store %arg29[%c0_129, %c0_130, %c0_131], %240 {strides = array<i32>} : memref<4x8x8xbf16, #tpu.memory_space<vmem>>, vector<4x8x8xbf16>,
    } else {
    }
    %c0 = arith.constant 0 : index
    %c0_1 = arith.constant 0 : index
    %c0_2 = arith.constant 0 : index
    %3 = vector.load %arg2[%c0, %c0_1, %c0_2] : memref<1x16x32xf32, #tpu.memory_space<vmem>>, vector<1x16x32xf32>
    %4 = vector.shape_cast %3 : vector<1x16x32xf32> to vector<16x32xf32>
    %c0_3 = arith.constant 0 : index
    %c0_4 = arith.constant 0 : index
    %5 = vector.load %arg5[%c0_3, %c0_4] : memref<1x32xf32, #tpu.memory_space<vmem>>, vector<1x32xf32>
    %c0_5 = arith.constant 0 : index
    %c0_6 = arith.constant 0 : index
    %6 = vector.load %arg6[%c0_5, %c0_6] : memref<1x32xf32, #tpu.memory_space<vmem>>, vector<1x32xf32>
    %cst = arith.constant dense<0.000000e+00> : vector<16xf32>
    %7 = vector.multi_reduction <add>, %4, %cst [1] : vector<16x32xf32> to vector<16xf32>
    %8 = vector.shape_cast %7 : vector<16xf32> to vector<16x1xf32>
    %cst_7 = arith.constant 3.200000e+01 : f32
    %9 = vector.broadcast %cst_7 : f32 to vector<16x1xf32>
    %10 = arith.divf %8, %9 : vector<16x1xf32>
    %11 = vector.broadcast %10 : vector<16x1xf32> to vector<16x32xf32>
    %12 = arith.subf %4, %11 : vector<16x32xf32>
    %13 = arith.mulf %12, %12 : vector<16x32xf32>
    %cst_8 = arith.constant dense<0.000000e+00> : vector<16xf32>
    %14 = vector.multi_reduction <add>, %13, %cst_8 [1] : vector<16x32xf32> to vector<16xf32>
    %15 = vector.shape_cast %14 : vector<16xf32> to vector<16x1xf32>
    %cst_9 = arith.constant 3.200000e+01 : f32
    %16 = vector.broadcast %cst_9 : f32 to vector<16x1xf32>
    %17 = arith.divf %15, %16 : vector<16x1xf32>
    %18 = vector.broadcast %10 : vector<16x1xf32> to vector<16x32xf32>
    %19 = arith.subf %4, %18 : vector<16x32xf32>
    %cst_10 = arith.constant 9.99999974E-6 : f32
    %20 = vector.broadcast %cst_10 : f32 to vector<16x1xf32>
    %21 = arith.addf %17, %20 : vector<16x1xf32>
    %22 = math.rsqrt %21 : vector<16x1xf32>
    %23 = vector.broadcast %22 : vector<16x1xf32> to vector<16x32xf32>
    %24 = arith.mulf %19, %23 : vector<16x32xf32>
    %25 = vector.broadcast %5 : vector<1x32xf32> to vector<16x32xf32>
    %26 = arith.mulf %24, %25 : vector<16x32xf32>
    %27 = vector.broadcast %6 : vector<1x32xf32> to vector<16x32xf32>
    %28 = arith.addf %26, %27 : vector<16x32xf32>
    %29 = arith.truncf %28 : vector<16x32xf32> to vector<16x32xbf16>
    %c0_11 = arith.constant 0 : index
    %c0_12 = arith.constant 0 : index
    %30 = vector.load %arg7[%c0_11, %c0_12] : memref<32x32xbf16, #tpu.memory_space<vmem>>, vector<32x32xbf16>
    %cst_13 = arith.constant dense<0.000000e+00> : vector<16x32xf32>
    %31 = tpu.matmul %29, %30, %cst_13 {dimension_numbers = #tpu.dot_dimension_numbers<[1], [0], [0], [1], [0, 0, 1, 1], [], []>} : vector<16x32xbf16>, vector<32x32xbf16>, vector<16x32xf32> -> vector<16x32xf32>
    %cst_14 = arith.constant 0.353553385 : f32
    %32 = vector.broadcast %cst_14 : f32 to vector<16x32xf32>
    %33 = arith.mulf %31, %32 : vector<16x32xf32>
    %34 = vector.shape_cast %33 : vector<16x32xf32> to vector<16x4x8xf32>
    %35 = tpu.transpose %34, [1, 0, 2] : vector<16x4x8xf32> -> vector<4x16x8xf32>
    %c0_15 = arith.constant 0 : index
    %c0_16 = arith.constant 0 : index
    %c0_17 = arith.constant 0 : index
    %36 = vector.load %arg10[%c0_15, %c0_16, %c0_17] : memref<4x8x32xbf16, #tpu.memory_space<vmem>>, vector<4x8x32xbf16>
    %c0_18 = arith.constant 0 : index
    %c0_19 = arith.constant 0 : index
    %37 = vector.load %arg11[%c0_18, %c0_19] : memref<1x32xf32, #tpu.memory_space<vmem>>, vector<1x32xf32>
    %38 = arith.truncf %35 : vector<4x16x8xf32> to vector<4x16x8xbf16>
    %cst_20 = arith.constant -1.000000e+30 : f32
    %39 = vector.broadcast %cst_20 : f32 to vector<4x16x1xf32>
    %cst_21 = arith.constant 0.000000e+00 : f32
    %40 = vector.broadcast %cst_21 : f32 to vector<4x16x1xf32>
    %cst_22 = arith.constant 0.000000e+00 : f32
    %41 = vector.broadcast %cst_22 : f32 to vector<4x16x8xf32>
    %c0_23 = arith.constant 0 : index
    %c0_24 = arith.constant 0 : index
    %c0_25 = arith.constant 0 : index
    %42 = vector.load %arg26[%c0_23, %c0_24, %c0_25] : memref<4x16x8xbf16, #tpu.memory_space<vmem>>, vector<4x16x8xbf16>
    %c0_26 = arith.constant 0 : index
    %c0_27 = arith.constant 0 : index
    %c0_28 = arith.constant 0 : index
    %43 = vector.load %arg27[%c0_26, %c0_27, %c0_28] : memref<4x16x8xbf16, #tpu.memory_space<vmem>>, vector<4x16x8xbf16>
    "tpu.trace_start"() <{level = 10 : i32, message = "hqd,hkd->hqk"}> : () -> ()
    %cst_29 = arith.constant dense<0.000000e+00> : vector<4x16x16xf32>
    %44 = tpu.matmul %38, %42, %cst_29 {dimension_numbers = #tpu.dot_dimension_numbers<[2], [2], [1], [1], [0, 0, 0, 1, 1, 1], [0], [0]>} : vector<4x16x8xbf16>, vector<4x16x8xbf16>, vector<4x16x16xf32> -> vector<4x16x16xf32>
    "tpu.trace_stop"() : () -> ()
    %cst_30 = arith.constant dense<0xFF800000> : vector<4x16xf32>
    %45 = vector.multi_reduction <maximumf>, %44, %cst_30 [2] : vector<4x16x16xf32> to vector<4x16xf32>
    %46 = vector.shape_cast %45 : vector<4x16xf32> to vector<4x16x1xf32>
    %47 = arith.maximumf %39, %46 : vector<4x16x1xf32>
    %48 = arith.subf %39, %47 : vector<4x16x1xf32>
    %49 = math.exp %48 : vector<4x16x1xf32>
    %50 = vector.broadcast %47 : vector<4x16x1xf32> to vector<4x16x16xf32>
    %51 = arith.subf %44, %50 : vector<4x16x16xf32>
    %52 = math.exp %51 : vector<4x16x16xf32>
    %53 = arith.mulf %40, %49 : vector<4x16x1xf32>
    %cst_31 = arith.constant dense<0.000000e+00> : vector<4x16xf32>
    %54 = vector.multi_reduction <add>, %52, %cst_31 [2] : vector<4x16x16xf32> to vector<4x16xf32>
    %55 = vector.shape_cast %54 : vector<4x16xf32> to vector<4x16x1xf32>
    %56 = arith.addf %53, %55 : vector<4x16x1xf32>
    %57 = vector.broadcast %49 : vector<4x16x1xf32> to vector<4x16x8xf32>
    %58 = arith.mulf %41, %57 : vector<4x16x8xf32>
    %59 = arith.truncf %52 : vector<4x16x16xf32> to vector<4x16x16xbf16>
    "tpu.trace_start"() <{level = 10 : i32, message = "hqk,hkd->hqd"}> : () -> ()
    %cst_32 = arith.constant dense<0.000000e+00> : vector<4x16x8xf32>
    %60 = tpu.matmul %59, %43, %cst_32 {dimension_numbers = #tpu.dot_dimension_numbers<[2], [1], [1], [2], [0, 0, 0, 1, 1, 2], [0], [0]>} : vector<4x16x16xbf16>, vector<4x16x8xbf16>, vector<4x16x8xf32> -> vector<4x16x8xf32>
    "tpu.trace_stop"() : () -> ()
    %61 = arith.addf %58, %60 : vector<4x16x8xf32>
    %62 = tpu.reciprocal %56 {approx = true} : vector<4x16x1xf32> -> vector<4x16x1xf32>
    %63 = vector.broadcast %62 : vector<4x16x1xf32> to vector<4x16x8xf32>
    %64 = arith.mulf %61, %63 : vector<4x16x8xf32>
    %65 = arith.truncf %64 : vector<4x16x8xf32> to vector<4x16x8xbf16>
    "tpu.trace_start"() <{level = 10 : i32, message = "hqd,hdo->hqo"}> : () -> ()
    %cst_33 = arith.constant dense<0.000000e+00> : vector<4x16x32xf32>
    %66 = tpu.matmul %65, %36, %cst_33 {dimension_numbers = #tpu.dot_dimension_numbers<[2], [1], [1], [2], [0, 0, 0, 1, 1, 2], [0], [0]>} : vector<4x16x8xbf16>, vector<4x8x32xbf16>, vector<4x16x32xf32> -> vector<4x16x32xf32>
    "tpu.trace_stop"() : () -> ()
    %cst_34 = arith.constant dense<0.000000e+00> : vector<16x32xf32>
    %67 = vector.multi_reduction <add>, %66, %cst_34 [0] : vector<4x16x32xf32> to vector<16x32xf32>
    %68 = vector.broadcast %37 : vector<1x32xf32> to vector<16x32xf32>
    %69 = arith.addf %67, %68 : vector<16x32xf32>
    %70 = arith.addf %4, %69 : vector<16x32xf32>
    %c0_35 = arith.constant 0 : index
    %c0_36 = arith.constant 0 : index
    %71 = vector.load %arg12[%c0_35, %c0_36] : memref<1x32xf32, #tpu.memory_space<vmem>>, vector<1x32xf32>
    %c0_37 = arith.constant 0 : index
    %c0_38 = arith.constant 0 : index
    %72 = vector.load %arg13[%c0_37, %c0_38] : memref<1x32xf32, #tpu.memory_space<vmem>>, vector<1x32xf32>
    %cst_39 = arith.constant dense<0.000000e+00> : vector<16xf32>
    %73 = vector.multi_reduction <add>, %70, %cst_39 [1] : vector<16x32xf32> to vector<16xf32>
    %74 = vector.shape_cast %73 : vector<16xf32> to vector<16x1xf32>
    %cst_40 = arith.constant 3.200000e+01 : f32
    %75 = vector.broadcast %cst_40 : f32 to vector<16x1xf32>
    %76 = arith.divf %74, %75 : vector<16x1xf32>
    %77 = vector.broadcast %76 : vector<16x1xf32> to vector<16x32xf32>
    %78 = arith.subf %70, %77 : vector<16x32xf32>
    %79 = arith.mulf %78, %78 : vector<16x32xf32>
    %cst_41 = arith.constant dense<0.000000e+00> : vector<16xf32>
    %80 = vector.multi_reduction <add>, %79, %cst_41 [1] : vector<16x32xf32> to vector<16xf32>
    %81 = vector.shape_cast %80 : vector<16xf32> to vector<16x1xf32>
    %cst_42 = arith.constant 3.200000e+01 : f32
    %82 = vector.broadcast %cst_42 : f32 to vector<16x1xf32>
    %83 = arith.divf %81, %82 : vector<16x1xf32>
    %84 = vector.broadcast %76 : vector<16x1xf32> to vector<16x32xf32>
    %85 = arith.subf %70, %84 : vector<16x32xf32>
    %cst_43 = arith.constant 9.99999974E-6 : f32
    %86 = vector.broadcast %cst_43 : f32 to vector<16x1xf32>
    %87 = arith.addf %83, %86 : vector<16x1xf32>
    %88 = math.rsqrt %87 : vector<16x1xf32>
    %89 = vector.broadcast %88 : vector<16x1xf32> to vector<16x32xf32>
    %90 = arith.mulf %85, %89 : vector<16x32xf32>
    %91 = vector.broadcast %71 : vector<1x32xf32> to vector<16x32xf32>
    %92 = arith.mulf %90, %91 : vector<16x32xf32>
    %93 = vector.broadcast %72 : vector<1x32xf32> to vector<16x32xf32>
    %94 = arith.addf %92, %93 : vector<16x32xf32>
    %95 = arith.truncf %94 : vector<16x32xf32> to vector<16x32xbf16>
    %c0_44 = arith.constant 0 : index
    %c0_45 = arith.constant 0 : index
    %96 = vector.load %arg14[%c0_44, %c0_45] : memref<32x32xbf16, #tpu.memory_space<vmem>>, vector<32x32xbf16>
    %cst_46 = arith.constant dense<0.000000e+00> : vector<16x32xf32>
    %97 = tpu.matmul %95, %96, %cst_46 {dimension_numbers = #tpu.dot_dimension_numbers<[1], [0], [0], [1], [0, 0, 1, 1], [], []>} : vector<16x32xbf16>, vector<32x32xbf16>, vector<16x32xf32> -> vector<16x32xf32>
    %cst_47 = arith.constant 0.353553385 : f32
    %98 = vector.broadcast %cst_47 : f32 to vector<16x32xf32>
    %99 = arith.mulf %97, %98 : vector<16x32xf32>
    %100 = vector.shape_cast %99 : vector<16x32xf32> to vector<16x4x8xf32>
    %101 = tpu.transpose %100, [1, 0, 2] : vector<16x4x8xf32> -> vector<4x16x8xf32>
    %c0_48 = arith.constant 0 : index
    %c0_49 = arith.constant 0 : index
    %c0_50 = arith.constant 0 : index
    %102 = vector.load %arg17[%c0_48, %c0_49, %c0_50] : memref<4x8x32xbf16, #tpu.memory_space<vmem>>, vector<4x8x32xbf16>
    %c0_51 = arith.constant 0 : index
    %c0_52 = arith.constant 0 : index
    %103 = vector.load %arg18[%c0_51, %c0_52] : memref<1x32xf32, #tpu.memory_space<vmem>>, vector<1x32xf32>
    %104 = arith.truncf %101 : vector<4x16x8xf32> to vector<4x16x8xbf16>
    %cst_53 = arith.constant -1.000000e+30 : f32
    %105 = vector.broadcast %cst_53 : f32 to vector<4x16x1xf32>
    %cst_54 = arith.constant 0.000000e+00 : f32
    %106 = vector.broadcast %cst_54 : f32 to vector<4x16x1xf32>
    %cst_55 = arith.constant 0.000000e+00 : f32
    %107 = vector.broadcast %cst_55 : f32 to vector<4x16x8xf32>
    %c0_56 = arith.constant 0 : index
    %c0_57 = arith.constant 0 : index
    %c0_58 = arith.constant 0 : index
    %108 = vector.load %arg28[%c0_56, %c0_57, %c0_58] : memref<4x8x8xbf16, #tpu.memory_space<vmem>>, vector<4x8x8xbf16>
    %c0_59 = arith.constant 0 : index
    %c0_60 = arith.constant 0 : index
    %c0_61 = arith.constant 0 : index
    %109 = vector.load %arg29[%c0_59, %c0_60, %c0_61] : memref<4x8x8xbf16, #tpu.memory_space<vmem>>, vector<4x8x8xbf16>
    "tpu.trace_start"() <{level = 10 : i32, message = "hqd,hkd->hqk"}> : () -> ()
    %cst_62 = arith.constant dense<0.000000e+00> : vector<4x16x8xf32>
    %110 = tpu.matmul %104, %108, %cst_62 {dimension_numbers = #tpu.dot_dimension_numbers<[2], [2], [1], [1], [0, 0, 0, 1, 1, 1], [0], [0]>} : vector<4x16x8xbf16>, vector<4x8x8xbf16>, vector<4x16x8xf32> -> vector<4x16x8xf32>
    "tpu.trace_stop"() : () -> ()
    %cst_63 = arith.constant dense<0xFF800000> : vector<4x16xf32>
    %111 = vector.multi_reduction <maximumf>, %110, %cst_63 [2] : vector<4x16x8xf32> to vector<4x16xf32>
    %112 = vector.shape_cast %111 : vector<4x16xf32> to vector<4x16x1xf32>
    %113 = arith.maximumf %105, %112 : vector<4x16x1xf32>
    %114 = arith.subf %105, %113 : vector<4x16x1xf32>
    %115 = math.exp %114 : vector<4x16x1xf32>
    %116 = vector.broadcast %113 : vector<4x16x1xf32> to vector<4x16x8xf32>
    %117 = arith.subf %110, %116 : vector<4x16x8xf32>
    %118 = math.exp %117 : vector<4x16x8xf32>
    %119 = arith.mulf %106, %115 : vector<4x16x1xf32>
    %cst_64 = arith.constant dense<0.000000e+00> : vector<4x16xf32>
    %120 = vector.multi_reduction <add>, %118, %cst_64 [2] : vector<4x16x8xf32> to vector<4x16xf32>
    %121 = vector.shape_cast %120 : vector<4x16xf32> to vector<4x16x1xf32>
    %122 = arith.addf %119, %121 : vector<4x16x1xf32>
    %123 = vector.broadcast %115 : vector<4x16x1xf32> to vector<4x16x8xf32>
    %124 = arith.mulf %107, %123 : vector<4x16x8xf32>
    %125 = arith.truncf %118 : vector<4x16x8xf32> to vector<4x16x8xbf16>
    "tpu.trace_start"() <{level = 10 : i32, message = "hqk,hkd->hqd"}> : () -> ()
    %cst_65 = arith.constant dense<0.000000e+00> : vector<4x16x8xf32>
    %126 = tpu.matmul %125, %109, %cst_65 {dimension_numbers = #tpu.dot_dimension_numbers<[2], [1], [1], [2], [0, 0, 0, 1, 1, 2], [0], [0]>} : vector<4x16x8xbf16>, vector<4x8x8xbf16>, vector<4x16x8xf32> -> vector<4x16x8xf32>
    "tpu.trace_stop"() : () -> ()
    %127 = arith.addf %124, %126 : vector<4x16x8xf32>
    %128 = tpu.reciprocal %122 {approx = true} : vector<4x16x1xf32> -> vector<4x16x1xf32>
    %129 = vector.broadcast %128 : vector<4x16x1xf32> to vector<4x16x8xf32>
    %130 = arith.mulf %127, %129 : vector<4x16x8xf32>
    %131 = arith.truncf %130 : vector<4x16x8xf32> to vector<4x16x8xbf16>
    "tpu.trace_start"() <{level = 10 : i32, message = "hqd,hdo->hqo"}> : () -> ()
    %cst_66 = arith.constant dense<0.000000e+00> : vector<4x16x32xf32>
    %132 = tpu.matmul %131, %102, %cst_66 {dimension_numbers = #tpu.dot_dimension_numbers<[2], [1], [1], [2], [0, 0, 0, 1, 1, 2], [0], [0]>} : vector<4x16x8xbf16>, vector<4x8x32xbf16>, vector<4x16x32xf32> -> vector<4x16x32xf32>
    "tpu.trace_stop"() : () -> ()
    %cst_67 = arith.constant dense<0.000000e+00> : vector<16x32xf32>
    %133 = vector.multi_reduction <add>, %132, %cst_67 [0] : vector<4x16x32xf32> to vector<16x32xf32>
    %134 = vector.broadcast %103 : vector<1x32xf32> to vector<16x32xf32>
    %135 = arith.addf %133, %134 : vector<16x32xf32>
    %136 = arith.addf %70, %135 : vector<16x32xf32>
    %c0_68 = arith.constant 0 : index
    %c0_69 = arith.constant 0 : index
    %137 = vector.load %arg19[%c0_68, %c0_69] : memref<1x32xf32, #tpu.memory_space<vmem>>, vector<1x32xf32>
    %c0_70 = arith.constant 0 : index
    %c0_71 = arith.constant 0 : index
    %138 = vector.load %arg20[%c0_70, %c0_71] : memref<1x32xf32, #tpu.memory_space<vmem>>, vector<1x32xf32>
    %cst_72 = arith.constant dense<0.000000e+00> : vector<16xf32>
    %139 = vector.multi_reduction <add>, %136, %cst_72 [1] : vector<16x32xf32> to vector<16xf32>
    %140 = vector.shape_cast %139 : vector<16xf32> to vector<16x1xf32>
    %cst_73 = arith.constant 3.200000e+01 : f32
    %141 = vector.broadcast %cst_73 : f32 to vector<16x1xf32>
    %142 = arith.divf %140, %141 : vector<16x1xf32>
    %143 = vector.broadcast %142 : vector<16x1xf32> to vector<16x32xf32>
    %144 = arith.subf %136, %143 : vector<16x32xf32>
    %145 = arith.mulf %144, %144 : vector<16x32xf32>
    %cst_74 = arith.constant dense<0.000000e+00> : vector<16xf32>
    %146 = vector.multi_reduction <add>, %145, %cst_74 [1] : vector<16x32xf32> to vector<16xf32>
    %147 = vector.shape_cast %146 : vector<16xf32> to vector<16x1xf32>
    %cst_75 = arith.constant 3.200000e+01 : f32
    %148 = vector.broadcast %cst_75 : f32 to vector<16x1xf32>
    %149 = arith.divf %147, %148 : vector<16x1xf32>
    %150 = vector.broadcast %142 : vector<16x1xf32> to vector<16x32xf32>
    %151 = arith.subf %136, %150 : vector<16x32xf32>
    %cst_76 = arith.constant 9.99999974E-6 : f32
    %152 = vector.broadcast %cst_76 : f32 to vector<16x1xf32>
    %153 = arith.addf %149, %152 : vector<16x1xf32>
    %154 = math.rsqrt %153 : vector<16x1xf32>
    %155 = vector.broadcast %154 : vector<16x1xf32> to vector<16x32xf32>
    %156 = arith.mulf %151, %155 : vector<16x32xf32>
    %157 = vector.broadcast %137 : vector<1x32xf32> to vector<16x32xf32>
    %158 = arith.mulf %156, %157 : vector<16x32xf32>
    %159 = vector.broadcast %138 : vector<1x32xf32> to vector<16x32xf32>
    %160 = arith.addf %158, %159 : vector<16x32xf32>
    %161 = arith.truncf %160 : vector<16x32xf32> to vector<16x32xbf16>
    %c0_77 = arith.constant 0 : index
    %c0_78 = arith.constant 0 : index
    %162 = vector.load %arg21[%c0_77, %c0_78] : memref<32x256xbf16, #tpu.memory_space<vmem>>, vector<32x256xbf16>
    %cst_79 = arith.constant dense<0.000000e+00> : vector<16x256xf32>
    %163 = tpu.matmul %161, %162, %cst_79 {dimension_numbers = #tpu.dot_dimension_numbers<[1], [0], [0], [1], [0, 0, 1, 1], [], []>} : vector<16x32xbf16>, vector<32x256xbf16>, vector<16x256xf32> -> vector<16x256xf32>
    %c0_80 = arith.constant 0 : index
    %c0_81 = arith.constant 0 : index
    %164 = vector.load %arg22[%c0_80, %c0_81] : memref<1x256xf32, #tpu.memory_space<vmem>>, vector<1x256xf32>
    %165 = vector.broadcast %164 : vector<1x256xf32> to vector<16x256xf32>
    %166 = arith.addf %163, %165 : vector<16x256xf32>
    %167 = vector.extract_strided_slice %166 {offsets = [0, 0], sizes = [16, 128], strides = [1, 1]} : vector<16x256xf32> to vector<16x128xf32>
    %168 = vector.extract_strided_slice %166 {offsets = [0, 128], sizes = [16, 128], strides = [1, 1]} : vector<16x256xf32> to vector<16x128xf32>
    %cst_82 = arith.constant 5.000000e-01 : f32
    %169 = vector.broadcast %cst_82 : f32 to vector<16x128xf32>
    %170 = arith.mulf %169, %168 : vector<16x128xf32>
    %cst_83 = arith.constant 0.707106769 : f32
    %171 = vector.broadcast %cst_83 : f32 to vector<16x128xf32>
    %172 = arith.mulf %168, %171 : vector<16x128xf32>
    %173 = math.erf %172 : vector<16x128xf32>
    %cst_84 = arith.constant 1.000000e+00 : f32
    %174 = vector.broadcast %cst_84 : f32 to vector<16x128xf32>
    %175 = arith.addf %174, %173 : vector<16x128xf32>
    %176 = arith.mulf %170, %175 : vector<16x128xf32>
    %177 = arith.mulf %167, %176 : vector<16x128xf32>
    %178 = arith.truncf %177 : vector<16x128xf32> to vector<16x128xbf16>
    %c0_85 = arith.constant 0 : index
    %c0_86 = arith.constant 0 : index
    %179 = vector.load %arg23[%c0_85, %c0_86] : memref<128x32xbf16, #tpu.memory_space<vmem>>, vector<128x32xbf16>
    %cst_87 = arith.constant dense<0.000000e+00> : vector<16x32xf32>
    %180 = tpu.matmul %178, %179, %cst_87 {dimension_numbers = #tpu.dot_dimension_numbers<[1], [0], [0], [1], [0, 0, 1, 1], [], []>} : vector<16x128xbf16>, vector<128x32xbf16>, vector<16x32xf32> -> vector<16x32xf32>
    %181 = arith.addf %136, %180 : vector<16x32xf32>
    %c0_88 = arith.constant 0 : index
    %c0_89 = arith.constant 0 : index
    %182 = vector.load %arg24[%c0_88, %c0_89] : memref<1x32xf32, #tpu.memory_space<vmem>>, vector<1x32xf32>
    %183 = vector.broadcast %182 : vector<1x32xf32> to vector<16x32xf32>
    %184 = arith.addf %181, %183 : vector<16x32xf32>
    %c0_90 = arith.constant 0 : index
    %c0_91 = arith.constant 0 : index
    %c0_92 = arith.constant 0 : index
    %185 = vector.load %arg25[%c0_90, %c0_91, %c0_92] : memref<1x16x32xf32, #tpu.memory_space<vmem>>, vector<1x16x32xf32>
    %186 = vector.shape_cast %185 : vector<1x16x32xf32> to vector<16x32xf32>
    %187 = vector.shape_cast %184 : vector<16x32xf32> to vector<1x16x32xf32>
    tpu.vector_store %arg25[%c0_90, %c0_91, %c0_92], %187 {strides = array<i32>} : memref<1x16x32xf32, #tpu.memory_space<vmem>>, vector<1x16x32xf32>,
    return
  }
  func.func @transform_0(%arg0: i32, %arg1: i32) -> (i32, i32, i32) {
    %c0_i32 = arith.constant 0 : i32
    %c0_i32_0 = arith.constant 0 : i32
    return %arg0, %arg1, %c0_i32 : i32, i32, i32
  }
  func.func @transform_1(%arg0: i32, %arg1: i32) -> (i32, i32, i32) {
    %c0_i32 = arith.constant 0 : i32
    %c0_i32_0 = arith.constant 0 : i32
    %c0_i32_1 = arith.constant 0 : i32
    return %arg0, %c0_i32, %c0_i32_0 : i32, i32, i32
  }
  func.func @transform_2(%arg0: i32, %arg1: i32) -> (i32, i32, i32) {
    %c0_i32 = arith.constant 0 : i32
    %c0_i32_0 = arith.constant 0 : i32
    %c0_i32_1 = arith.constant 0 : i32
    return %arg0, %c0_i32, %c0_i32_0 : i32, i32, i32
  }
  func.func @transform_3(%arg0: i32, %arg1: i32) -> (i32, i32) {
    %c0_i32 = arith.constant 0 : i32
    %c0_i32_0 = arith.constant 0 : i32
    %c0_i32_1 = arith.constant 0 : i32
    return %c0_i32, %c0_i32_0 : i32, i32
  }
  func.func @transform_4(%arg0: i32, %arg1: i32) -> (i32, i32) {
    %c0_i32 = arith.constant 0 : i32
    %c0_i32_0 = arith.constant 0 : i32
    %c0_i32_1 = arith.constant 0 : i32
    return %c0_i32, %c0_i32_0 : i32, i32
  }
  func.func @transform_5(%arg0: i32, %arg1: i32) -> (i32, i32) {
    %c0_i32 = arith.constant 0 : i32
    %c0_i32_0 = arith.constant 0 : i32
    %c0_i32_1 = arith.constant 0 : i32
    return %c0_i32, %c0_i32_0 : i32, i32
  }
  func.func @transform_6(%arg0: i32, %arg1: i32) -> (i32, i32) {
    %c0_i32 = arith.constant 0 : i32
    %c0_i32_0 = arith.constant 0 : i32
    %c0_i32_1 = arith.constant 0 : i32
    return %c0_i32, %c0_i32_0 : i32, i32
  }
  func.func @transform_7(%arg0: i32, %arg1: i32) -> (i32, i32) {
    %c0_i32 = arith.constant 0 : i32
    %c0_i32_0 = arith.constant 0 : i32
    %c0_i32_1 = arith.constant 0 : i32
    return %c0_i32, %c0_i32_0 : i32, i32
  }
  func.func @transform_8(%arg0: i32, %arg1: i32) -> (i32, i32, i32) {
    %c0_i32 = arith.constant 0 : i32
    %c0_i32_0 = arith.constant 0 : i32
    %c0_i32_1 = arith.constant 0 : i32
    %c0_i32_2 = arith.constant 0 : i32
    return %c0_i32, %c0_i32_0, %c0_i32_1 : i32, i32, i32
  }
  func.func @transform_9(%arg0: i32, %arg1: i32) -> (i32, i32) {
    %c0_i32 = arith.constant 0 : i32
    %c0_i32_0 = arith.constant 0 : i32
    %c0_i32_1 = arith.constant 0 : i32
    return %c0_i32, %c0_i32_0 : i32, i32
  }
  func.func @transform_10(%arg0: i32, %arg1: i32) -> (i32, i32) {
    %c0_i32 = arith.constant 0 : i32
    %c0_i32_0 = arith.constant 0 : i32
    %c0_i32_1 = arith.constant 0 : i32
    return %c0_i32, %c0_i32_0 : i32, i32
  }
  func.func @transform_11(%arg0: i32, %arg1: i32) -> (i32, i32) {
    %c0_i32 = arith.constant 0 : i32
    %c0_i32_0 = arith.constant 0 : i32
    %c0_i32_1 = arith.constant 0 : i32
    return %c0_i32, %c0_i32_0 : i32, i32
  }
  func.func @transform_12(%arg0: i32, %arg1: i32) -> (i32, i32) {
    %c0_i32 = arith.constant 0 : i32
    %c0_i32_0 = arith.constant 0 : i32
    %c0_i32_1 = arith.constant 0 : i32
    return %c0_i32, %c0_i32_0 : i32, i32
  }
  func.func @transform_13(%arg0: i32, %arg1: i32) -> (i32, i32) {
    %c0_i32 = arith.constant 0 : i32
    %c0_i32_0 = arith.constant 0 : i32
    %c0_i32_1 = arith.constant 0 : i32
    return %c0_i32, %c0_i32_0 : i32, i32
  }
  func.func @transform_14(%arg0: i32, %arg1: i32) -> (i32, i32) {
    %c0_i32 = arith.constant 0 : i32
    %c0_i32_0 = arith.constant 0 : i32
    %c0_i32_1 = arith.constant 0 : i32
    return %c0_i32, %c0_i32_0 : i32, i32
  }
  func.func @transform_15(%arg0: i32, %arg1: i32) -> (i32, i32, i32) {
    %c0_i32 = arith.constant 0 : i32
    %c0_i32_0 = arith.constant 0 : i32
    %c0_i32_1 = arith.constant 0 : i32
    %c0_i32_2 = arith.constant 0 : i32
    return %c0_i32, %c0_i32_0, %c0_i32_1 : i32, i32, i32
  }
  func.func @transform_16(%arg0: i32, %arg1: i32) -> (i32, i32) {
    %c0_i32 = arith.constant 0 : i32
    %c0_i32_0 = arith.constant 0 : i32
    %c0_i32_1 = arith.constant 0 : i32
    return %c0_i32, %c0_i32_0 : i32, i32
  }
  func.func @transform_17(%arg0: i32, %arg1: i32) -> (i32, i32) {
    %c0_i32 = arith.constant 0 : i32
    %c0_i32_0 = arith.constant 0 : i32
    %c0_i32_1 = arith.constant 0 : i32
    return %c0_i32, %c0_i32_0 : i32, i32
  }
  func.func @transform_18(%arg0: i32, %arg1: i32) -> (i32, i32) {
    %c0_i32 = arith.constant 0 : i32
    %c0_i32_0 = arith.constant 0 : i32
    %c0_i32_1 = arith.constant 0 : i32
    return %c0_i32, %c0_i32_0 : i32, i32
  }
  func.func @transform_19(%arg0: i32, %arg1: i32) -> (i32, i32) {
    %c0_i32 = arith.constant 0 : i32
    %c0_i32_0 = arith.constant 0 : i32
    %c0_i32_1 = arith.constant 0 : i32
    return %c0_i32, %c0_i32_0 : i32, i32
  }
  func.func @transform_20(%arg0: i32, %arg1: i32) -> (i32, i32) {
    %c0_i32 = arith.constant 0 : i32
    %c0_i32_0 = arith.constant 0 : i32
    %c0_i32_1 = arith.constant 0 : i32
    return %c0_i32, %c0_i32_0 : i32, i32
  }
  func.func @transform_21(%arg0: i32, %arg1: i32) -> (i32, i32) {
    %c0_i32 = arith.constant 0 : i32
    %c0_i32_0 = arith.constant 0 : i32
    %c0_i32_1 = arith.constant 0 : i32
    return %c0_i32, %c0_i32_0 : i32, i32
  }
  func.func @transform_22(%arg0: i32, %arg1: i32) -> (i32, i32) {
    %c0_i32 = arith.constant 0 : i32
    %c0_i32_0 = arith.constant 0 : i32
    %c0_i32_1 = arith.constant 0 : i32
    return %c0_i32, %c0_i32_0 : i32, i32
  }
  func.func @transform_23(%arg0: i32, %arg1: i32) -> (i32, i32, i32) {
    %c0_i32 = arith.constant 0 : i32
    %c0_i32_0 = arith.constant 0 : i32
    return %arg0, %arg1, %c0_i32 : i32, i32, i32
  }
}

</mosaic_0001>

<bundles_post_ra>
// kernel: tpu_custom_call.1
= control target key start
LH: loop header
LB: loop body
LE: loop exit
PB: predicated region body
PF: predicated region fallthrough
CT: control target
= control target key end

     0   :  { %s7807_s0 = inlined_call_operand.vmem [shape: f32[2,16,32], index: 0, kind: input, shape index: {}]   ;;  %s7808_s1 = inlined_call_operand.vmem [shape: f32[2,16,32], index: 1, kind: input, shape index: {}]   ;;  %s7809_s2 = inlined_call_operand.hbm [shape: f32[2,8,16], index: 2, kind: input, shape index: {}]   ;;  %s7810_s3 = inlined_call_operand.hbm [shape: f32[1,32], index: 3, kind: input, shape index: {}]   ;;  %s7811_s4 = inlined_call_operand.hbm [shape: f32[1,32], index: 4, kind: input, shape index: {}]   ;;  %s7812_s5 = inlined_call_operand.hbm [shape: bf16[32,32], index: 5, kind: input, shape index: {}]   ;;  %s7813_s6 = inlined_call_operand.hbm [shape: bf16[32,32], index: 6, kind: input, shape index: {}]   ;;  %s7814_s7 = inlined_call_operand.hbm [shape: bf16[32,32], index: 7, kind: input, shape index: {}]   ;;  %s7815_s8 = inlined_call_operand.hbm [shape: bf16[4,8,32], index: 8, kind: input, shape index: {}]   ;;  %s7816_s9 = inlined_call_operand.hbm [shape: f32[1,32], index: 9, kind: input, shape index: {}]   ;;  %s7817_s10 = inlined_call_operand.hbm [shape: f32[1,32], index: 10, kind: input, shape index: {}]   ;;  %s7818_s11 = inlined_call_operand.hbm [shape: f32[1,32], index: 11, kind: input, shape index: {}]   ;;  %s7819_s12 = inlined_call_operand.hbm [shape: bf16[32,32], index: 12, kind: input, shape index: {}]   ;;  %s7820_s13 = inlined_call_operand.hbm [shape: bf16[16,32], index: 13, kind: input, shape index: {}]   ;;  %s7821_s14 = inlined_call_operand.hbm [shape: bf16[16,32], index: 14, kind: input, shape index: {}]   ;;  %s7822_s15 = inlined_call_operand.hbm [shape: bf16[4,8,32], index: 15, kind: input, shape index: {}]   ;;  %s7823_s16 = inlined_call_operand.hbm [shape: f32[1,32], index: 16, kind: input, shape index: {}]   ;;  %s7824_s17 = inlined_call_operand.hbm [shape: f32[1,32], index: 17, kind: input, shape index: {}]   ;;  %s7825_s18 = inlined_call_operand.hbm [shape: f32[1,32], index: 18, kind: input, shape index: {}]   ;;  %s7826_s19 = inlined_call_operand.vmem [shape: bf16[32,256], index: 19, kind: input, shape index: {}]   ;;  %s7827_s20 = inlined_call_operand.vmem [shape: f32[1,256], index: 20, kind: input, shape index: {}]   ;;  %s7828_s21 = inlined_call_operand.vmem [shape: bf16[128,32], index: 21, kind: input, shape index: {}]   ;;  %s7829_s22 = inlined_call_operand.vmem [shape: f32[1,32], index: 22, kind: input, shape index: {}]   ;;  %s7830_s23 = inlined_call_operand.hbm [shape: f32[2,16,32], index: 23, kind: output, shape index: {}]  }
   0x1   :  { %7842 = sst [smem:[#allocation46_spill]] %s7807_s0 }
   0x2   :  { %7843 = sst [smem:[#allocation47_spill]] %s7808_s1 }
   0x3   :  { %7844 = sst [smem:[#allocation48_spill]] %s7809_s2 }
   0x4   :  { %7845 = sst [smem:[#allocation49_spill]] %s7810_s3 }
   0x5   :  { %7846 = sst [smem:[#allocation50_spill]] %s7811_s4 }
   0x6   :  { %7847 = sst [smem:[#allocation51_spill]] %s7812_s5 }
   0x7   :  { %7848 = sst [smem:[#allocation52_spill]] %s7813_s6 }
   0x8   :  { %7849 = sst [smem:[#allocation53_spill]] %s7814_s7 }
   0x9   :  { %7850 = sst [smem:[#allocation54_spill]] %s7815_s8 }
   0xa   :  { %7851 = sst [smem:[#allocation55_spill]] %s7816_s9 }
   0xb   :  { %7852 = sst [smem:[#allocation56_spill]] %s7817_s10 }
   0xc   :  { %7853 = sst [smem:[#allocation57_spill]] %s7818_s11 }
   0xd   :  { %7854 = sst [smem:[#allocation58_spill]] %s7819_s12 }
   0xe   :  { %7855 = sst [smem:[#allocation59_spill]] %s7820_s13 }
   0xf   :  { %7856 = sst [smem:[#allocation60_spill]] %s7826_s19 }
  0x10   :  { %7857 = sst [smem:[#allocation61_spill]] %s7827_s20 }
  0x11   :  { %7858 = sst [smem:[#allocation62_spill]] %s7828_s21 }
  0x12   :  { %7859 = sst [smem:[#allocation63_spill]] %s7829_s22 }
  0x13   :  { %7860 = sst [smem:[#allocation64_spill]] %s7830_s23 }
  0x14   :  { %28 = vsyncpa [#allocation7], 0 }
  0x15   :  { %30 = vsyncpa [#allocation7 + $0x1], 0 }
  0x16   :  { %31 = vsyncpa [#allocation10], 0 }
  0x17   :  { %32 = vsyncpa [#allocation13], 0 }
  0x18   :  { %33 = vsyncpa [#allocation16], 0 }
  0x19   :  { %34 = vsyncpa [#allocation19], 0 }
  0x1a   :  { %35 = vsyncpa [#allocation22], 0 }
  0x1b   :  { %36 = vsyncpa [#allocation25], 0 }
  0x1c   :  { %37 = vsyncpa [#allocation28], 0 }
  0x1d   :  { %38 = vsyncpa [#allocation31], 0 }
  0x1e   :  { %39 = vsyncpa [#allocation8], 0 }
  0x1f   :  { %41 = vsyncpa [#allocation8 + $0x1], 0  ;;  %s6709_s4 = smov 0   ;;  %s6711_s30 = smov 0  }
  0x20   :  { %s6713_s24 = smov 0   ;;  %s6715_s25 = smov 0  }
  0x21   :  { %s6717_s5 = smov 0   ;;  %s6719_s1 = smov 0  }
  0x22 LB: > { %7861 = sst [smem:[#allocation44_spill]] %s6549_s25  ;;  %s7831_s26 = sadd.s32 4294967295, %s6557_s1   ;;  %s6557_s1 = sphi %s6719_s1, %s47_s1   ;;  %s6553_s5 = sphi %s6717_s5, %s7903_s5   ;;  %s6549_s25 = sphi %s6715_s25, %s7902_s25   ;;  %s6545_s24 = sphi %s6713_s24, %s7901_s24   ;;  %s6541_s30 = sphi %s6711_s30, %s7900_s30   ;;  %s6537_s4 = sphi %s6709_s4, %s7899_s4  }
  0x23   : > { %p5160_p0 = scmp.ge.s32.totalorder %s6557_s1, 1  ;;  %p6743_p1 = scmp.eq.s32.totalorder %s7831_s26, 0 }
  0x24   : > { %p592_p2 = scmp.lt.s32.totalorder %s6557_s1, 3  ;;  %s6559_s27 = smov [#allocation9]  }
  0x25   : > { %s7862_s2 = scalar_select %p6743_p1, 1, 0 }
  0x26   : > { %p6748_p3 = pnand %p5160_p0, %p592_p2  ;;  %s605_s7 = sshll.u32 %s6559_s27, 4  ;;  %s606_s7 = int_to_ptr.vmem [resolvable:$true] %s605_s7 }
  0x27   : > { %s6560_s28 = smov [#allocation12]   ;;  %s6561_s0 = smov [#allocation15]  }
  0x28   : > { %s7863_s6 = scalar_select %p6748_p3, 1, 0 }
  0x29   : > { %p5684_p5 = pneg %p6748_p3  ;;  %s626_s29 = sshll.u32 %s6560_s28, 4  ;;  %s6761_s29 = int_to_ptr.vmem [resolvable:$true] %s626_s29 }
  0x2a   : > { %7864 = sst [smem:[#allocation45_spill]] %s7863_s6  ;;  %s652_s26 = sshll.u32 %s6561_s0, 4  ;;  %s653_s26 = int_to_ptr.vmem [resolvable:$true] %s652_s26 }
  0x2b   : > { %p6757_p6 = pnand %p5684_p5, %p6743_p1  ;;  %s6012_s27 = scalar_lea.vmem %s606_s7, 16 }
  0x2c   : > { %p6013_p8 = scmp.ne.s32.totalorder %s606_s7, %s6012_s27  ;;  %s6019_s28 = scalar_lea.vmem %s606_s7, 32 }
  0x2d   : > { %p6765_p7 = pneg %p6757_p6  ;;  %p6020_p11 = scmp.lt.s32.totalorder %s606_s7, %s606_s7 }
  0x2e   : > { %p6021_p12 = scmp.lt.s32.totalorder %s6019_s28, %s6012_s27 }
  0x2f   : > { %p6015_p9 = pnand %p6013_p8, %p6765_p7 }
  0x30   : > { %p6022_p13 = por %p6021_p12, %p6020_p11 }
  0x31   : > { %p6016_p10 = pneg %p6015_p9 }
  0x33   : > { %p6023_p0 = pnand %p6022_p13, %p6016_p10 }
  0x35   : > { %6026 = shalt.err (!%p6023_p0)
}
  0x36   : > { %s7867_s20 = sld [smem:[#allocation49_spill]]  ;;  %s6038_s21 = scalar_lea.vmem %s6761_s29, 256 }
  0x37   : > { %p6039_p2 = scmp.ne.s32.totalorder %s6761_s29, %s6038_s21  ;;  %p6046_p9 = scmp.lt.s32.totalorder %s6761_s29, %s6761_s29 }
  0x38   : > { %p6047_p11 = scmp.lt.s32.totalorder %s6038_s21, %s6038_s21 }
  0x39   : > { %p6041_p5 = pnand %p6039_p2, %p6765_p7 }
  0x3a   : > { %p6048_p10 = por %p6047_p11, %p6046_p9 }
  0x3b   : > { %p6042_p8 = pneg %p6041_p5 }
  0x3c   : > { %5687 = dma.hbm_to_vmem [thread:$0]  (!%p6757_p6), %s7867_s20, 16, %s606_s7, [#allocation10]  }
  0x3d   : > { %p6049_p12 = pnand %p6048_p10, %p6042_p8 }
  0x3f   : > { %6052 = shalt.err (!%p6049_p12)
}
  0x40   : > { %s7838_s27 = smov 64   ;;  %s6563_s22 = smov 4  }
  0x41   : > { %s7868_s28 = sld [smem:[#allocation51_spill]]  ;;  %s6064_s0 = scalar_lea.vmem %s653_s26, 256 }
  0x42   : > { %p6065_p13 = scmp.ne.s32.totalorder %s653_s26, %s6064_s0  ;;  %p6072_p5 = scmp.lt.s32.totalorder %s653_s26, %s653_s26 }
  0x43   : > { %p6073_p8 = scmp.lt.s32.totalorder %s6064_s0, %s6064_s0 }
  0x44   : > { %p6067_p0 = pnand %p6065_p13, %p6765_p7 }
  0x45   : > { %p6074_p9 = por %p6073_p8, %p6072_p5 }
  0x46   : > { %p6068_p2 = pneg %p6067_p0 }
  0x47   : > { %5693 = dma.hbm_to_vmem [thread:$0]  (!%p6757_p6), %s7868_s28, 256, %s6761_s29, [#allocation13], %s7838_s27, %s7838_s27, %s6563_s22  }
  0x48   : > { %p6075_p11 = pnand %p6074_p9, %p6068_p2 }
  0x4a   : > { %6078 = shalt.err (!%p6075_p11)
}
  0x4b   : > { %s7869_s20 = sld [smem:[#allocation53_spill]]  ;;  %s6564_s29 = smov [#allocation18]  }
  0x4c   : > { %s679_s7 = sshll.u32 %s6564_s29, 4  ;;  %s6565_s28 = smov [#allocation21]   ;;  %s680_s7 = int_to_ptr.vmem [resolvable:$true] %s679_s7 }
  0x4d   : > { %s701_s25 = sshll.u32 %s6565_s28, 4  ;;  %s6090_s6 = scalar_lea.vmem %s680_s7, 16  ;;  %s702_s25 = int_to_ptr.vmem [resolvable:$true] %s701_s25 }
  0x4e   : > { %p6091_p10 = scmp.ne.s32.totalorder %s680_s7, %s6090_s6  ;;  %s6097_s0 = scalar_lea.vmem %s680_s7, 32 }
  0x4f   : > { %p6098_p0 = scmp.lt.s32.totalorder %s680_s7, %s680_s7  ;;  %p6099_p2 = scmp.lt.s32.totalorder %s6097_s0, %s6090_s6 }
  0x50   : > { %p6093_p12 = pnand %p6091_p10, %p6765_p7 }
  0x51   : > { %5699 = dma.hbm_to_vmem [thread:$0]  (!%p6757_p6), %s7869_s20, 256, %s653_s26, [#allocation16], %s7838_s27, %s7838_s27, %s6563_s22  }
  0x52   : > { %p6094_p13 = pneg %p6093_p12  ;;  %p6100_p5 = por %p6099_p2, %p6098_p0 }
  0x54   : > { %p6101_p8 = pnand %p6100_p5, %p6094_p13 }
  0x56   : > { %6104 = shalt.err (!%p6101_p8)
}
  0x57   : > { %s7870_s9 = sld [smem:[#allocation55_spill]]  ;;  %s6116_s21 = scalar_lea.vmem %s702_s25, 16 }
  0x58   : > { %p6117_p9 = scmp.ne.s32.totalorder %s702_s25, %s6116_s21  ;;  %s6123_s20 = scalar_lea.vmem %s702_s25, 32 }
  0x59   : > { %p6124_p12 = scmp.lt.s32.totalorder %s702_s25, %s702_s25  ;;  %p6125_p4 = scmp.lt.s32.totalorder %s6123_s20, %s6116_s21 }
  0x5a   : > { %p6119_p11 = pnand %p6117_p9, %p6765_p7 }
  0x5b   : > { %p6126_p3 = por %p6125_p4, %p6124_p12 }
  0x5c   : > { %p6120_p10 = pneg %p6119_p11 }
  0x5d   : > { %5705 = dma.hbm_to_vmem [thread:$0]  (!%p6757_p6), %s7870_s9, 16, %s680_s7, [#allocation19]  }
  0x5e   : > { %p6127_p0 = pnand %p6126_p3, %p6120_p10 }
  0x60   : > { %6130 = shalt.err (!%p6127_p0)
}
  0x61   : > { %s7871_s11 = sld [smem:[#allocation57_spill]]  ;;  %s6566_s7 = smov [#allocation24]  }
  0x62   : > { %s724_s28 = sshll.u32 %s6566_s7, 4  ;;  %s6567_s0 = smov [#allocation27]   ;;  %s725_s28 = int_to_ptr.vmem [resolvable:$true] %s724_s28 }
  0x63   : > { %s750_s19 = sshll.u32 %s6567_s0, 4  ;;  %s6142_s26 = scalar_lea.vmem %s725_s28, 128  ;;  %s751_s19 = int_to_ptr.vmem [resolvable:$true] %s750_s19 }
  0x64   : > { %p6143_p13 = scmp.ne.s32.totalorder %s725_s28, %s6142_s26  ;;  %p6150_p4 = scmp.lt.s32.totalorder %s725_s28, %s725_s28 }
  0x65   : > { %p6151_p3 = scmp.lt.s32.totalorder %s6142_s26, %s6142_s26 }
  0x66   : > { %p6145_p2 = pnand %p6143_p13, %p6765_p7 }
  0x67   : > { %5711 = dma.hbm_to_vmem [thread:$0]  (!%p6757_p6), %s7871_s11, 16, %s702_s25, [#allocation22]  }
  0x68   : > { %p6146_p5 = pneg %p6145_p2  ;;  %p6152_p8 = por %p6151_p3, %p6150_p4 }
  0x6a   : > { %p6153_p9 = pnand %p6152_p8, %p6146_p5 }
  0x6c   : > { %6156 = shalt.err (!%p6153_p9)
}
  0x6d   : > { %s7872_s13 = sld [smem:[#allocation59_spill]]  ;;  %s6168_s20 = scalar_lea.vmem %s751_s19, 256 }
  0x6e   : > { %p6169_p11 = scmp.ne.s32.totalorder %s751_s19, %s6168_s20  ;;  %p6176_p0 = scmp.lt.s32.totalorder %s751_s19, %s751_s19 }
  0x6f   : > { %p6177_p13 = scmp.lt.s32.totalorder %s6168_s20, %s6168_s20 }
  0x70   : > { %p6171_p10 = pnand %p6169_p11, %p6765_p7 }
  0x71   : > { %p6178_p2 = por %p6177_p13, %p6176_p0 }
  0x72   : > { %p6172_p12 = pneg %p6171_p10 }
  0x73   : > { %5717 = dma.hbm_to_vmem [thread:$0]  (!%p6757_p6), %s7872_s13, 128, %s725_s28, [#allocation25], %s7838_s27, %s7838_s27, %s6563_s22  }
  0x74   : > { %p6179_p5 = pnand %p6178_p2, %p6172_p12 }
  0x76   : > { %6182 = shalt.err (!%p6179_p5)
}
  0x77   : > { %5723 = dma.hbm_to_vmem [thread:$0]  (!%p6757_p6), %s7822_s15, 256, %s751_s19, [#allocation28], %s7838_s27, %s7838_s27, %s6563_s22  }
  0x78   : > { %s6568_s7 = smov [#allocation30]   ;;  %s6569_s0 = smov [#allocation11]  }
  0x79   : > { %s775_s28 = sshll.u32 %s6568_s7, 4  ;;  %s616_s26 = sshll.u32 %s6569_s0, 4  ;;  %s776_s28 = int_to_ptr.vmem [resolvable:$true] %s775_s28  ;;  %s617_s26 = int_to_ptr.vmem [resolvable:$true] %s616_s26 }
  0x7a   : > { %s6194_s25 = scalar_lea.vmem %s776_s28, 16  ;;  %s6201_s21 = scalar_lea.vmem %s776_s28, 32 }
  0x7b   : > { %p6195_p4 = scmp.ne.s32.totalorder %s776_s28, %s6194_s25  ;;  %p6202_p9 = scmp.lt.s32.totalorder %s776_s28, %s776_s28 }
  0x7c   : > { %p6203_p11 = scmp.lt.s32.totalorder %s6201_s21, %s6194_s25 }
  0x7d   : > { %p6197_p3 = pnand %p6195_p4, %p6765_p7 }
  0x7e   : > { %p6204_p10 = por %p6203_p11, %p6202_p9 }
  0x7f   : > { %p6198_p8 = pneg %p6197_p3 }
  0x81   : > { %p6205_p12 = pnand %p6204_p10, %p6198_p8 }
  0x83   : > { %6208 = shalt.err (!%p6205_p12)
}
  0x84   : > { %5729 = dma.hbm_to_vmem [thread:$0]  (!%p6757_p6), %s7824_s17, 16, %s776_s28, [#allocation31]  }
  0x85   : > { %s6220_s6 = scalar_lea.vmem %s617_s26, 16  ;;  %s6227_s29 = scalar_lea.vmem %s617_s26, 32 }
  0x86   : > { %p6221_p0 = scmp.ne.s32.totalorder %s617_s26, %s6220_s6  ;;  %p6228_p5 = scmp.lt.s32.totalorder %s617_s26, %s617_s26 }
  0x87   : > { %p6229_p4 = scmp.lt.s32.totalorder %s6227_s29, %s6220_s6 }
  0x88   : > { %p6223_p13 = pnand %p6221_p0, %p6765_p7 }
  0x89   : > { %p6230_p3 = por %p6229_p4, %p6228_p5 }
  0x8a   : > { %p6224_p2 = pneg %p6223_p13 }
  0x8c   : > { %p6231_p9 = pnand %p6230_p3, %p6224_p2 }
  0x8e   : > { %6234 = shalt.err (!%p6231_p9)
}
  0x8f   : > { %s7873_s25 = sld [smem:[#allocation50_spill]]  ;;  %s6570_s28 = smov [#allocation14]  }
  0x90   : > { %s639_s21 = sshll.u32 %s6570_s28, 4  ;;  %s6571_s20 = smov [#allocation17]   ;;  %s640_s21 = int_to_ptr.vmem [resolvable:$true] %s639_s21 }
  0x91   : > { %s665_s19 = sshll.u32 %s6571_s20, 4  ;;  %s6246_s27 = scalar_lea.vmem %s640_s21, 256  ;;  %s666_s19 = int_to_ptr.vmem [resolvable:$true] %s665_s19 }
  0x92   : > { %p6247_p8 = scmp.ne.s32.totalorder %s640_s21, %s6246_s27  ;;  %p6254_p12 = scmp.lt.s32.totalorder %s640_s21, %s640_s21 }
  0x93   : > { %p6255_p0 = scmp.lt.s32.totalorder %s6246_s27, %s6246_s27 }
  0x94   : > { %p6249_p11 = pnand %p6247_p8, %p6765_p7 }
  0x95   : > { %5690 = dma.hbm_to_vmem [thread:$0]  (!%p6757_p6), %s7873_s25, 16, %s617_s26, [#allocation10]  }
  0x96   : > { %p6250_p10 = pneg %p6249_p11  ;;  %p6256_p13 = por %p6255_p0, %p6254_p12 }
  0x98   : > { %p6257_p2 = pnand %p6256_p13, %p6250_p10 }
  0x9a   : > { %6260 = shalt.err (!%p6257_p2)
}
  0x9b   : > { %s7874_s6 = smov 64   ;;  %s7875_s7 = sld [smem:[#allocation52_spill]] }
  0x9c   : > { %s6272_s0 = scalar_lea.vmem %s666_s19, 256  ;;  %p6280_p9 = scmp.lt.s32.totalorder %s666_s19, %s666_s19 }
  0x9d   : > { %p6273_p5 = scmp.ne.s32.totalorder %s666_s19, %s6272_s0  ;;  %p6281_p8 = scmp.lt.s32.totalorder %s6272_s0, %s6272_s0 }
  0x9f   : > { %p6275_p4 = pnand %p6273_p5, %p6765_p7  ;;  %p6282_p11 = por %p6281_p8, %p6280_p9 }
  0xa1   : > { %5696 = dma.hbm_to_vmem [thread:$0]  (!%p6757_p6), %s7875_s7, 256, %s640_s21, [#allocation13], %s7874_s6, %s7874_s6, %s6563_s22  }
  0xa2   : > { %p6276_p3 = pneg %p6275_p4 }
  0xa4   : > { %p6283_p10 = pnand %p6282_p11, %p6276_p3 }
  0xa6   : > { %6286 = shalt.err (!%p6283_p10)
}
  0xa7   : > { %s7876_s8 = sld [smem:[#allocation54_spill]]  ;;  %s6572_s28 = smov [#allocation20]  }
  0xa8   : > { %s690_s21 = sshll.u32 %s6572_s28, 4  ;;  %s6573_s20 = smov [#allocation23]   ;;  %s691_s21 = int_to_ptr.vmem [resolvable:$true] %s690_s21 }
  0xa9   : > { %s711_s26 = sshll.u32 %s6573_s20, 4  ;;  %s6298_s29 = scalar_lea.vmem %s691_s21, 16  ;;  %s712_s26 = int_to_ptr.vmem [resolvable:$true] %s711_s26 }
  0xaa   : > { %p6299_p12 = scmp.ne.s32.totalorder %s691_s21, %s6298_s29  ;;  %s6305_s7 = scalar_lea.vmem %s691_s21, 32 }
  0xab   : > { %p6306_p2 = scmp.lt.s32.totalorder %s691_s21, %s691_s21  ;;  %p6307_p5 = scmp.lt.s32.totalorder %s6305_s7, %s6298_s29 }
  0xac   : > { %p6301_p0 = pnand %p6299_p12, %p6765_p7 }
  0xad   : > { %5702 = dma.hbm_to_vmem [thread:$0]  (!%p6757_p6), %s7876_s8, 256, %s666_s19, [#allocation16], %s7874_s6, %s7874_s6, %s6563_s22  }
  0xae   : > { %p6302_p13 = pneg %p6301_p0  ;;  %p6308_p4 = por %p6307_p5, %p6306_p2 }
  0xb0   : > { %p6309_p3 = pnand %p6308_p4, %p6302_p13 }
  0xb2   : > { %6312 = shalt.err (!%p6309_p3)
}
  0xb3   : > { %s7877_s10 = sld [smem:[#allocation56_spill]]  ;;  %s6324_s27 = scalar_lea.vmem %s712_s26, 256 }
  0xb4   : > { %p6325_p9 = scmp.ne.s32.totalorder %s712_s26, %s6324_s27  ;;  %p6332_p10 = scmp.lt.s32.totalorder %s712_s26, %s712_s26 }
  0xb5   : > { %p6333_p12 = scmp.lt.s32.totalorder %s6324_s27, %s6324_s27 }
  0xb6   : > { %p6327_p8 = pnand %p6325_p9, %p6765_p7 }
  0xb7   : > { %p6334_p0 = por %p6333_p12, %p6332_p10 }
  0xb8   : > { %p6328_p11 = pneg %p6327_p8 }
  0xb9   : > { %5708 = dma.hbm_to_vmem [thread:$0]  (!%p6757_p6), %s7877_s10, 16, %s691_s21, [#allocation19]  }
  0xba   : > { %p6335_p1 = pnand %p6334_p0, %p6328_p11 }
  0xbc   : > { %6338 = shalt.err (!%p6335_p1)
}
  0xbd   : > { %s7878_s12 = sld [smem:[#allocation58_spill]]  ;;  %s6574_s21 = smov [#allocation26]  }
  0xbe   : > { %s737_s20 = sshll.u32 %s6574_s21, 4  ;;  %s6575_s29 = smov [#allocation29]   ;;  %s738_s20 = int_to_ptr.vmem [resolvable:$true] %s737_s20 }
  0xbf   : > { %s764_s7 = sshll.u32 %s6575_s29, 4  ;;  %s6350_s0 = scalar_lea.vmem %s738_s20, 128  ;;  %s765_s7 = int_to_ptr.vmem [resolvable:$true] %s764_s7 }
  0xc0   : > { %p6351_p13 = scmp.ne.s32.totalorder %s738_s20, %s6350_s0  ;;  %p6358_p5 = scmp.lt.s32.totalorder %s738_s20, %s738_s20 }
  0xc1   : > { %p6359_p4 = scmp.lt.s32.totalorder %s6350_s0, %s6350_s0 }
  0xc2   : > { %p6353_p2 = pnand %p6351_p13, %p6765_p7 }
  0xc3   : > { %5714 = dma.hbm_to_vmem [thread:$0]  (!%p6757_p6), %s7878_s12, 256, %s712_s26, [#allocation22], %s7874_s6, %s7874_s6, %s6563_s22  }
  0xc4   : > { %p6354_p1 = pneg %p6353_p2  ;;  %p6360_p3 = por %p6359_p4, %p6358_p5 }
  0xc6   : > { %p6361_p9 = pnand %p6360_p3, %p6354_p1 }
  0xc8   : > { %6364 = shalt.err (!%p6361_p9)
}
  0xc9   : > { %5720 = dma.hbm_to_vmem [thread:$0]  (!%p6757_p6), %s7821_s14, 128, %s738_s20, [#allocation25], %s7874_s6, %s7874_s6, %s6563_s22  }
  0xca   : > { %s6376_s27 = scalar_lea.vmem %s765_s7, 16  ;;  %s6383_s25 = scalar_lea.vmem %s765_s7, 32 }
  0xcb   : > { %p6377_p8 = scmp.ne.s32.totalorder %s765_s7, %s6376_s27  ;;  %p6384_p12 = scmp.lt.s32.totalorder %s765_s7, %s765_s7 }
  0xcc   : > { %p6385_p0 = scmp.lt.s32.totalorder %s6383_s25, %s6376_s27 }
  0xcd   : > { %p6379_p11 = pnand %p6377_p8, %p6765_p7 }
  0xce   : > { %p6386_p13 = por %p6385_p0, %p6384_p12 }
  0xcf   : > { %p6380_p10 = pneg %p6379_p11 }
  0xd1   : > { %p6387_p2 = pnand %p6386_p13, %p6380_p10 }
  0xd3   : > { %6390 = shalt.err (!%p6387_p2)
}
  0xd4   : > { %5726 = dma.hbm_to_vmem [thread:$0]  (!%p6757_p6), %s7823_s16, 16, %s765_s7, [#allocation28]  }
  0xd5   : > { %s6576_s22 = smov [#allocation32]  }
  0xd6   : > { %s786_s6 = sshll.u32 %s6576_s22, 4  ;;  %s787_s6 = int_to_ptr.vmem [resolvable:$true] %s786_s6 }
  0xd7   : > { %s6402_s20 = scalar_lea.vmem %s787_s6, 16  ;;  %s6409_s29 = scalar_lea.vmem %s787_s6, 32 }
  0xd8   : > { %p6403_p1 = scmp.ne.s32.totalorder %s787_s6, %s6402_s20  ;;  %p6410_p3 = scmp.lt.s32.totalorder %s787_s6, %s787_s6 }
  0xd9   : > { %p6411_p9 = scmp.lt.s32.totalorder %s6409_s29, %s6402_s20 }
  0xda   : > { %p6405_p5 = pnand %p6403_p1, %p6765_p7 }
  0xdb   : > { %p6412_p8 = por %p6411_p9, %p6410_p3 }
  0xdc   : > { %p6406_p4 = pneg %p6405_p5 }
  0xde   : > { %p6413_p11 = pnand %p6412_p8, %p6406_p4 }
  0xe0   : > { %6416 = shalt.err (!%p6413_p11)
}
  0xe1   : > { %5732 = dma.hbm_to_vmem [thread:$0]  (!%p6757_p6), %s7825_s18, 16, %s787_s6, [#allocation31]  }
  0xe2   : > { %s5159_s23 = sadd.s32 4294967294, %s6557_s1   ;;  %s59_s7 = sadd.s32 1, %s6553_s5 }
  0xe3   : > { %p61_p7 = scmp.ge.s32.totalorder %s59_s7, 2  ;;  %s120_s3 = sadd.s32 1, %s6545_s24 }
  0xe4   : > { %p127_p10 = scmp.ne.s32.totalorder %s6545_s24, %s6541_s30  ;;  %p128_p12 = scmp.eq.s32.totalorder %s6557_s1, 0 }
  0xe5   : > { %s7905_s7 = smov (%p61_p7, %s59_s7), 0  ;;  %p133_p13 = scmp.ne.s32.totalorder %s6541_s30, %s6537_s4 }
  0xe6   : > { %p6918_p0 = por %p128_p12, %p127_p10  ;;  %s117_s27 = ssub.s32 %s6553_s5, %s7905_s7 }
  0xe7   : > { %s7880_s25 = sadd.s32 4294967295, %s6557_s1   ;;  %p118_p2 = scmp.eq.s32.totalorder %s117_s27, 0 }
  0xe8   : > { %p579_p6 = scmp.eq.s32.totalorder %s7880_s25, 1  ;;  %p7881_p1 = scmp.ne.s32.totalorder %s7862_s2, 0 }
  0xe9   : > { %p585_p3 = scmp.eq.s32.totalorder %s5159_s23, 1  ;;  %p5757_p8 = scmp.lt.s32.totalorder %s6557_s1, 2 }
  0xea   : > { %p6930_p5 = por %p7881_p1, %p133_p13  ;;  %p6934_p4 = por %p579_p6, %p127_p10 }
  0xeb   : > { %s6939_s22 = scalar_select %p118_p2, %s6545_s24, %s120_s3  }
  0xec   : > { %p6941_p9 = por %p585_p3, %p133_p13  ;;  %s830_s20 = sand.u32 1, %s6545_s24  }
  0xed   : > { %s5179_s29 = sshll.u32 %s6553_s5, 7  ;;  %s5178_s0 = sshll.u32 %s830_s20, 3 }
  0xee   : > { %s7885_s25 = sld [smem:[#allocation48_spill]]  ;;  %s834_s9 = scalar_lea.vmem [#allocation6], %s5178_s0 }
  0xef   : > { %s841_s10 = sshll.u32 %s834_s9, 4  ;;  %p6953_p11 = pnand %p5757_p8, %p6918_p0  ;;  %s842_s10 = int_to_ptr.vmem [resolvable:$true] %s841_s10 }
  0xf0   : > { %s831_s23 = scalar_lea.sflag [#allocation7], %s830_s20  ;;  %s6430_s3 = scalar_lea.vmem %s842_s10, 128 }
  0xf1   : > { %p6419_p7 = pneg %p6953_p11  ;;  %p6431_p10 = scmp.ne.s32.totalorder %s842_s10, %s6430_s3 }
  0xf2   : > { %s6577_s12 = smov [#allocation6]  }
  0xf3   : > { %p6433_p12 = pnand %p6431_p10, %p6419_p7  ;;  %s6435_s13 = sshll.u32 %s6577_s12, 4  ;;  %s6436_s13 = int_to_ptr.vmem [resolvable:$false] %s6435_s13 }
  0xf4   : > { %s839_s8 = scalar_lea.hbm %s7885_s25, %s5179_s29  ;;  %s6437_s29 = scalar_lea.vmem %s6436_s13, 256 }
  0xf5   : > { %p6434_p13 = pneg %p6433_p12  ;;  %p6438_p6 = scmp.lt.s32.totalorder %s842_s10, %s6436_s13 }
  0xf6   : > { %p6439_p2 = scmp.lt.s32.totalorder %s6437_s29, %s6430_s3 }
  0xf8   : > { %p6440_p1 = por %p6439_p2, %p6438_p6 }
  0xfa   : > { %p6441_p0 = pnand %p6440_p1, %p6434_p13 }
  0xfc   : > { %6444 = shalt.err (!%p6441_p0)
}
  0xfd   : > { %5736 = dma.hbm_to_vmem [thread:$0]  (!%p6953_p11), %s839_s8, 128, %s842_s10, %s831_s23  }
  0xfe   : > { %s7887_s9 = sld [smem:[#allocation45_spill]] }
 0x104   : > { %p7888_p3 = scmp.ne.s32.totalorder %s7887_s9, 0 }
 0x105   : > { %s6964_s19 = sand.u32 (!%p7888_p3), 1, %s6541_s30  }
 0x106   : > { %850 = sbr.rel (%p7888_p3) target bundleno = 3950 (0xf6e), region = 112  ;;  %s5181_s12 = sshll.u32 (!%p7888_p3), %s6964_s19, 3 }
 0x107   : > { %s853_s20 = scalar_lea.sflag (!%p7888_p3), [#allocation7], %s6964_s19  ;;  %s6968_s0 = scalar_lea.vmem (!%p7888_p3), [#allocation6], %s5181_s12 }
 0x10b   : > { %6496 = dma.done.wait (%p6930_p5), %s853_s20, 128  }
 0x10c   : > { %6498 = vsyncadd (%p6930_p5), %s853_s20, 4294967168  ;;  %p7889_p8 = scmp.ne.s32.totalorder %s7862_s2, 0 }
 0x10e   : > { %6500 = dma.done.wait (%p7889_p8), [#allocation10], 32  }
 0x10f   : > { %6502 = vsyncadd (%p7889_p8), [#allocation10], 4294967264 }
 0x110   : > { %6504 = dma.done.wait (%p7889_p8), [#allocation13], 512  }
 0x111   : > { %6506 = vsyncadd (%p7889_p8), [#allocation13], 4294966784 }
 0x112   : > { %6508 = dma.done.wait (%p7889_p8), [#allocation16], 512  }
 0x113   : > { %6510 = vsyncadd (%p7889_p8), [#allocation16], 4294966784 }
 0x114   : > { %6512 = dma.done.wait (%p7889_p8), [#allocation19], 32  }
 0x115   : > { %6514 = vsyncadd (%p7889_p8), [#allocation19], 4294967264 }
 0x116   : > { %6516 = dma.done.wait (%p7889_p8), [#allocation22], 272  }
 0x117   : > { %6518 = vsyncadd (%p7889_p8), [#allocation22], 4294967024 }
 0x118   : > { %6520 = dma.done.wait (%p7889_p8), [#allocation25], 256  }
 0x119   : > { %6522 = vsyncadd (%p7889_p8), [#allocation25], 4294967040 }
 0x11a   : > { %6524 = dma.done.wait (%p7889_p8), [#allocation28], 272  }
 0x11b   : > { %6526 = vsyncadd (%p7889_p8), [#allocation28], 4294967024 }
 0x11c   : > { %6528 = dma.done.wait (%p7889_p8), [#allocation31], 32  }
 0x11d   : > { %6530 = vsyncadd (%p7889_p8), [#allocation31], 4294967264  ;;  %s7890_s8 = sld [smem:[#allocation44_spill]]  ;;  %vm1022_vm0 = vcmask 261120   ;;  %v5851_v28 = vld [vmem:[#allocation14 + $0x8] sm:$0xff]   ;;  %v6578_v29 = vmov 0.0  }
 0x11e   : > { %s7891_s26 = sld [smem:[#allocation47_spill]]  ;;  %5408 = vmatprep.subr.bf16.mxu0 %v6578_v29  ;;  %5430 = vmatprep.subr.bf16.mxu1 %v6578_v29  ;;  %v5852_v30 = vld [vmem:[#allocation14] sm:$0xff]   ;;  %vm6579_vm1 = vmmov 0   ;;  %v5203_v43 = vld [vmem:[#allocation9] ss:$0 sm:$0xff]  ;;  %v5853_v53 = vld [vmem:[#allocation15 + $0x8] sm:$0xff]  }
 0x11f   : > { %s7892_s3 = sld [smem:[#allocation46_spill]]  ;;  %5409 = vmatpush3.bf16.msra.mxu0 %v5851_v28  ;;  %5412 = vmatprep.mubr.msk.bf16.mxu0 %vm6579_vm1, %v6578_v29  ;;  %v5204_v49 = vld [vmem:[#allocation11] ss:$0 sm:$0xff]  ;;  %v5854_v55 = vld [vmem:[#allocation15] sm:$0xff]   ;;  %v5855_v56 = vld [vmem:[#allocation24] sm:$0xff]   ;;  %vm1859_vm2 = vcmask 130048  }
 0x120   : > { %5410 = vmatprep.subr.bf16.mxu0 %v6578_v29  ;;  %5432 = vmatprep.mubr.msk.bf16.mxu1 %vm6579_vm1, %v6578_v29  ;;  %v1849_v59 = vld [vmem:[%s6968_s0] sm:$0xff]  ;;  %s6580_s2 = smov 112   ;;  %s6581_s9 = smov 120   ;;  %v6584_v28 = vmov 1934713408   ;;  %vm1508_vm3 = vcmask 60416  }
 0x121   : > { %v1850_v62 = vpack.c.bf16 %v1849_v59, %v1849_v59  ;;  %v5856_v63 = vld [vmem:[#allocation12 + $0x8] sm:$0xff]   ;;  %s6582_s12 = smov 104   ;;  %vm2692_vm4 = vcmask 64512   ;;  %vm3252_vm5 = vcmask 1043456   ;;  %s7895_s20 = sld [smem:[#allocation61_spill]] }
 0x122   : > { %s5198_s0 = sshll.u32 %s6964_s19, 4  ;;  %s7896_s28 = sld [smem:[#allocation63_spill]] }
 0x123   : > { %p998_p5 = scmp.lt.s32.totalorder %s7890_s8, 1  ;;  %5411 = vmatpush3.bf16.msra.mxu0 %v5852_v30  ;;  %v1239_v30 = vunpack.c.l.s4 %v6584_v28 }
 0x124   : > { %5416 = vmatprep.subr.bf16.mxu0 %v6578_v29 }
 0x125   : > { %s999_s10 = scalar_select %p998_p5, %s7890_s8, 1 }
 0x127   : > { %s5316_s11 = sshll.u32 %s999_s10, 4  ;;  %s7893_s10 = sld [smem:[#allocation60_spill]] }
 0x128   : > { %s1011_s27 = scalar_lea.vmem %s7891_s26, %s5316_s11  ;;  %s7014_s29 = scalar_lea.vmem %s7892_s3, %s5316_s11 }
 0x129   : > { %v1018_v0 = vld [vmem:[%s1011_s27] sm:$0xff]  ;;  %v1019_v2 = vld [vmem:[%s1011_s27 + $0x8] sm:$0xff]  ;;  %s5334_s26 = sshll.u32 %s7890_s8, 8  ;;  %s996_s27 = scalar_lea.vmem [#allocation33], %s5198_s0 }
 0x12a   : > { %v2259_v1 = vld [vmem:[%s7014_s29] sm:$0xff]  ;;  %v1023_v3 = vsel %vm1022_vm0, %v1018_v0, 0.0  ;;  %v1026_v5 = vsel %vm1022_vm0, %v1019_v2, 0.0  ;;  %v2260_v6 = vld [vmem:[%s7014_s29 + $0x8] sm:$0xff]  ;;  %s4892_s25 = sshll.u32 %s996_s27, 4  ;;  %s4877_s8 = scalar_lea.sflag [#allocation8], %s6964_s19  ;;  %s7758_s25 = int_to_ptr.vmem [resolvable:$true] %s4892_s25 }
 0x12b   : > { %v2264_v4 = vsel %vm1022_vm0, %v2259_v1, 0.0  ;;  %1024 = vadd.xlane.f32.xlu0 %v1023_v3  ;;  %v2267_v7 = vsel %vm1022_vm0, %v2260_v6, 0.0 }
 0x12c   : > { %2265 = vadd.xlane.f32.xlu1 %v2264_v4 }
 0x12f   : > { %1027 = vadd.xlane.f32.xlu0 %v1026_v5 }
 0x130   : > { %2268 = vadd.xlane.f32.xlu1 %v2267_v7 }
 0x1b4   : > { %v1025_v8 = vpop.xlane.xlu0 %1024 }
 0x1b5   : > { %v2266_v9 = vpop.xlane.xlu1 %2265  ;;  %v1030_v10 = vmul.f32 0.03125, %v1025_v8 }
 0x1b6   : > { %v2271_v11 = vmul.f32 0.03125, %v2266_v9 }
 0x1b7   : > { %v1032_v12 = vsub.f32 %v1018_v0, %v1030_v10 }
 0x1b8   : > { %v7022_v13 = vsub.f32 %v2259_v1, %v2271_v11  ;;  %v1028_v14 = vpop.xlane.xlu0 %1027 }
 0x1b9   : > { %v2269_v15 = vpop.xlane.xlu1 %2268  ;;  %v1031_v16 = vmul.f32 0.03125, %v1028_v14  ;;  %v1034_v18 = vmul.f32 %v1032_v12, %v1032_v12 }
 0x1ba   : > { %v2272_v17 = vmul.f32 0.03125, %v2269_v15  ;;  %v2275_v19 = vmul.f32 %v7022_v13, %v7022_v13 }
 0x1bb   : > { %v1033_v20 = vsub.f32 %v1019_v2, %v1031_v16  ;;  %v1036_v22 = vsel %vm1022_vm0, %v1034_v18, 0.0  ;;  %v5857_v2 = vld [vmem:[#allocation12] sm:$0xff]  }
 0x1bc   : > { %v7026_v21 = vsub.f32 %v2260_v6, %v2272_v17  ;;  %1037 = vadd.xlane.f32.xlu0 %v1036_v22  ;;  %v2277_v23 = vsel %vm1022_vm0, %v2275_v19, 0.0 }
 0x1bd   : > { %v1035_v24 = vmul.f32 %v1033_v20, %v1033_v20 }
 0x1be   : > { %v2276_v25 = vmul.f32 %v7026_v21, %v7026_v21 }
 0x1bf   : > { %v1039_v26 = vsel %vm1022_vm0, %v1035_v24, 0.0 }
 0x1c0   : > { %2278 = vadd.xlane.f32.xlu0 %v2277_v23  ;;  %1040 = vadd.xlane.f32.xlu1 %v1039_v26  ;;  %v2280_v27 = vsel %vm1022_vm0, %v2276_v25, 0.0  ;;  %v6583_v25 = vmov 1983009808  }
 0x1c1   : > { %v1207_v26 = vunpack.c.l.s4 %v6583_v25 }
 0x1c4   : > { %2281 = vadd.xlane.f32.xlu1 %v2280_v27  ;;  %v1209_v27 = vlaneseq }
 0x245   : > { %v1038_v31 = vpop.xlane.xlu0 %1037 }
 0x246   : > { %v1042_v32 = vmul.f32 0.03125, %v1038_v31  ;;  %v1208_v31 = vunpack.c.0.s8 %v1207_v26 }
 0x248   : > { %v1044_v33 = vadd.f32 1e-05, %v1042_v32  ;;  %v7116_v32 = vshrl.u32 %v1209_v27, 7 }
 0x249   : > { %v1041_v34 = vpop.xlane.xlu1 %1040  ;;  %v2279_v38 = vpop.xlane.xlu0 %2278 }
 0x24a   : > { %5883 = vrsqrt.f32 %v1044_v33  ;;  %v1043_v35 = vmul.f32 0.03125, %v1041_v34  ;;  %v2283_v41 = vmul.f32 0.03125, %v2279_v38 }
 0x24c   : > { %v1045_v36 = vadd.f32 1e-05, %v1043_v35  ;;  %v2285_v46 = vadd.f32 1e-05, %v2283_v41  ;;  %v1240_v35 = vunpack.c.0.s8 %v1239_v30 }
 0x24d   : > { %v2282_v37 = vpop.xlane.xlu1 %2281 }
 0x24e   : > { %5885 = vrsqrt.f32 %v1045_v36  ;;  %v2284_v39 = vmul.f32 0.03125, %v2282_v37  ;;  %v7119_v36 = vsub.s32 %v1208_v31, %v7116_v32 }
 0x250   : > { %v2286_v44 = vadd.f32 1e-05, %v2284_v39 }
 0x252   : > { %5887 = vrsqrt.f32 %v2286_v44 }
 0x253   : > { %5889 = vrsqrt.f32 %v2285_v46 }
 0x257   : > { %v5884_v40 = vpop.eup %5883 }
 0x258   : > { %v1048_v42 = vmul.f32 %v5884_v40, %v1032_v12 }
 0x25a   : > { %v1056_v48 = vmul.f32 %v5203_v43, %v1048_v42 }
 0x25b   : > { %v5886_v45 = vpop.eup %5885 }
 0x25c   : > { %v1049_v47 = vmul.f32 %v5886_v45, %v1033_v20  ;;  %v1064_v51 = vadd.f32 %v5204_v49, %v1056_v48  ;;  %v5858_v20 = vld [vmem:[#allocation26] sm:$0xff]  }
 0x25d   : > { %5431 = vmatpush3.bf16.msra.mxu1 %v5858_v20 }
 0x25e   : > { %v1057_v50 = vmul.f32 %v5203_v43, %v1049_v47  ;;  %5444 = vmatprep.subr.bf16.mxu1 %v6578_v29 }
 0x25f   : > { %v5888_v57 = vpop.eup %5887 }
 0x260   : > { %v1065_v52 = vadd.f32 %v5204_v49, %v1057_v50  ;;  %v5890_v58 = vpop.eup %5889  ;;  %v2290_v60 = vmul.f32 %v5888_v57, %v7026_v21  ;;  %5433 = vmatmul.mubr.msk.bf16.vlgmr.msra.gmra.mxu1 %vm1859_vm2, %v1850_v62 }
 0x261   : > { %v2289_v61 = vmul.f32 %v5890_v58, %v7022_v13  ;;  %5446 = vmatprep.mubr.msk.bf16.mxu1 %vm6579_vm1, %v6578_v29 }
 0x262   : > { %v1066_v54 = vpack.c.bf16 %v1065_v52, %v1064_v51  ;;  %v2298_v0 = vmul.f32 %v5203_v43, %v2290_v60 }
 0x263   : > { %v2297_v1 = vmul.f32 %v5203_v43, %v2289_v61  ;;  %v7124_v43 = vsub.s32 %v1240_v35, %v7116_v32 }
 0x264   : > { %5413 = vmatmul.mubr.msk.bf16.vlgmr.msra.gmra.mxu0 %vm1022_vm0, %v1066_v54  ;;  %v2306_v3 = vadd.f32 %v5204_v49, %v2298_v0 }
 0x265   : > { %5417 = vmatpush3.bf16.msra.mxu0 %v5853_v53  ;;  %5420 = vmatprep.mubr.msk.bf16.mxu0 %vm6579_vm1, %v6578_v29  ;;  %v2305_v4 = vadd.f32 %v5204_v49, %v2297_v1 }
 0x266   : > { %5418 = vmatprep.subr.bf16.mxu0 %v6578_v29 }
 0x267   : > { %v2307_v5 = vpack.c.bf16 %v2306_v3, %v2305_v4 }
 0x269   : > { %5419 = vmatpush3.bf16.msra.mxu0 %v5854_v55 }
 0x26a   : > { %5424 = vmatprep.subr.bf16.mxu0 %v6578_v29 }
 0x26c   : > { %5421 = vmatmul.mubr.msk.bf16.vlgmr.msra.gmra.mxu0 %vm1022_vm0, %v1066_v54 }
 0x26d   : > { %5425 = vmatpush3.bf16.msra.mxu0 %v5855_v56  ;;  %5426 = vmatprep.mubr.msk.bf16.mxu0 %vm6579_vm1, %v6578_v29 }
 0x26e   : > { %5436 = vmatprep.subr.bf16.mxu0 %v6578_v29 }
 0x274   : > { %5427 = vmatmul.mubr.msk.bf16.vlgmr.msra.gmra.mxu0 %vm1859_vm2, %v1850_v62 }
 0x275   : > { %5437 = vmatpush3.bf16.msra.mxu0 %v5856_v63  ;;  %5440 = vmatprep.mubr.msk.bf16.mxu0 %vm6579_vm1, %v6578_v29 }
 0x276   : > { %5438 = vmatprep.subr.bf16.mxu0 %v6578_v29 }
 0x279   : > { %5439 = vmatpush3.bf16.msra.mxu0 %v5857_v2 }
 0x27a   : > { %5450 = vmatprep.subr.bf16.mxu0 %v6578_v29 }
 0x27c   : > { %5441 = vmatmul.mubr.msk.bf16.vlgmr.msra.gmra.mxu0 %vm1022_vm0, %v2307_v5 }
 0x27d   : > { %5452 = vmatprep.mubr.msk.bf16.mxu0 %vm6579_vm1, %v6578_v29 }
 0x324   : > { %v7062_v6 = vpop.f32.mrf.mxu0 }
 0x325   : > { %1192 = vrot.lane.b32.xlu1 %v7062_v6, %s6580_s2  ;;  %1186 = vrot.lane.b32.xlu0 %v7062_v6, %s6581_s9 }
 0x326   : > { %v5414_v7 = vpop.f32.mrf.mxu0 }
 0x328   : > { %v7068_v8 = vpop.f32.mrf.mxu0 }
 0x329   : > { %1198 = vrot.lane.b32.xlu0 %v7062_v6, %s6582_s12  ;;  %1188 = vrot.lane.b32.xlu1 %v7068_v8, %s6581_s9 }
 0x32a   : > { %v5415_v9 = vpop.f32.mrf.mxu0 }
 0x32c   : > { %v7074_v10 = vpop.f32.mrf.mxu0 }
 0x32d   : > { %1194 = vrot.lane.b32.xlu1 %v7068_v8, %s6580_s2 }
 0x32e   : > { %v5422_v11 = vpop.f32.mrf.mxu0 }
 0x330   : > { %v7078_v12 = vpop.f32.mrf.mxu0 }
 0x331   : > { %1200 = vrot.lane.b32.xlu1 %v7068_v8, %s6582_s12 }
 0x332   : > { %v5423_v13 = vpop.f32.mrf.mxu0 }
 0x334   : > { %v7082_v14 = vpop.f32.mrf.mxu0 }
 0x336   : > { %v5428_v15 = vpop.f32.mrf.mxu0 }
 0x338   : > { %v1900_v16 = vpop.f32.mrf.mxu0 }
 0x33a   : > { %v5429_v17 = vpop.f32.mrf.mxu0 }
 0x33c   : > { %v2361_v18 = vpop.f32.mrf.mxu0 }
 0x33d   : > { %v7084_v19 = vmul.f32 0.35355338, %v2361_v18 }
 0x33e   : > { %v5442_v21 = vpop.f32.mrf.mxu0 }
 0x33f   : > { %2372 = vrot.lane.b32.xlu0 %v7084_v19, %s6581_s9 }
 0x340   : > { %v2364_v22 = vpop.f32.mrf.mxu0 }
 0x341   : > { %v7089_v23 = vmul.f32 0.35355338, %v2364_v22 }
 0x342   : > { %v5443_v24 = vpop.f32.mrf.mxu0 }
 0x343   : > { %2378 = vrot.lane.b32.xlu0 %v7084_v19, %s6580_s2  ;;  %2374 = vrot.lane.b32.xlu1 %v7089_v23, %s6581_s9 }
 0x347   : > { %2384 = vrot.lane.b32.xlu0 %v7084_v19, %s6582_s12  ;;  %2380 = vrot.lane.b32.xlu1 %v7089_v23, %s6580_s2 }
 0x34b   : > { %1519 = vrot.lane.b32.xlu0 %v7074_v10, %s6581_s9  ;;  %2386 = vrot.lane.b32.xlu1 %v7089_v23, %s6582_s12 }
 0x34f   : > { %1525 = vrot.lane.b32.xlu0 %v7074_v10, %s6580_s2  ;;  %1521 = vrot.lane.b32.xlu1 %v7078_v12, %s6581_s9 }
 0x353   : > { %1531 = vrot.lane.b32.xlu0 %v7074_v10, %s6582_s12  ;;  %1527 = vrot.lane.b32.xlu1 %v7078_v12, %s6580_s2 }
 0x357   : > { %1533 = vrot.lane.b32.xlu1 %v7078_v12, %s6582_s12 }
 0x397   : > { %v1193_v33 = vpop.permute.xlu1 %1192  ;;  %v1187_v34 = vpop.permute.xlu0 %1186 }
 0x398   : > { %v1204_v37 = vcombine.low %v7062_v6, %v1193_v33  ;;  %v1205_v38 = vcombine.high %v7062_v6, %v1193_v33 }
 0x39a   : > { %v1212_v44 = vrot.slane %v1204_v37, %v7119_v36  ;;  %v1219_v45 = vrot.slane %v1205_v38, %v7119_v36 }
 0x39b   : > { %v1189_v39 = vpop.permute.xlu1 %1188  ;;  %v1199_v40 = vpop.permute.xlu0 %1198 }
 0x39c   : > { %v1220_v41 = vcombine.low %v1187_v34, %v1199_v40  ;;  %v1221_v42 = vcombine.high %v1187_v34, %v1199_v40 }
 0x39e   : > { %v1228_v46 = vrot.slane %v1220_v41, %v7119_v36  ;;  %v1235_v47 = vrot.slane %v1221_v42, %v7119_v36 }
 0x39f   : > { %v1195_v48 = vpop.permute.xlu1 %1194 }
 0x3a0   : > { %v1236_v49 = vcombine.low %v1212_v44, %v1228_v46  ;;  %v1237_v50 = vcombine.high %v1212_v44, %v1228_v46  ;;  %v1252_v51 = vcombine.low %v1219_v45, %v1235_v47  ;;  %v1253_v52 = vcombine.high %v1219_v45, %v1235_v47 }
 0x3a1   : > { %v1272_v57 = vcombine.low %v7068_v8, %v1195_v48  ;;  %v1273_v58 = vcombine.high %v7068_v8, %v1195_v48 }
 0x3a2   : > { %v1244_v53 = vrot.slane %v1236_v49, %v7124_v43  ;;  %v1251_v54 = vrot.slane %v1237_v50, %v7124_v43  ;;  %v1260_v55 = vrot.slane %v1252_v51, %v7124_v43  ;;  %v1267_v56 = vrot.slane %v1253_v52, %v7124_v43 }
 0x3a3   : > { %v1201_v59 = vpop.permute.xlu1 %1200  ;;  %v1280_v6 = vrot.slane %v1272_v57, %v7119_v36  ;;  %v1287_v7 = vrot.slane %v1273_v58, %v7119_v36 }
 0x3a4   : > { %v1340_v60 = vcombine.low %v1244_v53, %v1251_v54  ;;  %v5211_v61 = vcombine.high %v1244_v53, %v1251_v54  ;;  %v1356_v62 = vcombine.low %v1260_v55, %v1267_v56  ;;  %v5212_v63 = vcombine.high %v1260_v55, %v1267_v56 }
 0x3a5   : > { %v1288_v0 = vcombine.low %v1189_v39, %v1201_v59  ;;  %v1289_v1 = vcombine.high %v1189_v39, %v1201_v59 }
 0x3a6   : > { %v1347_v2 = vrot.slane %v1340_v60, %v7119_v36  ;;  %v1355_v3 = vrot.slane %v5211_v61, %v7119_v36  ;;  %v1363_v4 = vrot.slane %v1356_v62, %v7119_v36  ;;  %v1371_v5 = vrot.slane %v5212_v63, %v7119_v36 }
 0x3a7   : > { %v1296_v8 = vrot.slane %v1288_v0, %v7119_v36  ;;  %v1303_v9 = vrot.slane %v1289_v1, %v7119_v36 }
 0x3a8   : > { %v1372_v11 = vcombine.low %v1347_v2, %v1355_v3  ;;  %v1373_v13 = vcombine.high %v1347_v2, %v1355_v3  ;;  %v1388_v15 = vcombine.low %v1363_v4, %v1371_v5  ;;  %v1389_v16 = vcombine.high %v1363_v4, %v1371_v5 }
 0x3a9   : > { %v1304_v17 = vcombine.low %v1280_v6, %v1296_v8  ;;  %v1305_v18 = vcombine.high %v1280_v6, %v1296_v8  ;;  %v1320_v20 = vcombine.low %v1287_v7, %v1303_v9  ;;  %v1321_v21 = vcombine.high %v1287_v7, %v1303_v9 }
 0x3aa   : > { %v1380_v22 = vrot.slane %v1372_v11, %v7124_v43  ;;  %v1387_v24 = vrot.slane %v1373_v13, %v7124_v43  ;;  %v1396_v25 = vrot.slane %v1388_v15, %v7124_v43  ;;  %v1403_v26 = vrot.slane %v1389_v16, %v7124_v43 }
 0x3ab   : > { %v1312_v27 = vrot.slane %v1304_v17, %v7124_v43  ;;  %v1319_v28 = vrot.slane %v1305_v18, %v7124_v43  ;;  %v1328_v30 = vrot.slane %v1320_v20, %v7124_v43  ;;  %v1335_v31 = vrot.slane %v1321_v21, %v7124_v43 }
 0x3ac   : > { %v1404_v33 = vcombine.low %v1380_v22, %v1396_v25  ;;  %v1405_v34 = vcombine.high %v1380_v22, %v1396_v25  ;;  %v1406_v35 = vcombine.low %v1387_v24, %v1403_v26  ;;  %v1407_v37 = vcombine.high %v1387_v24, %v1403_v26 }
 0x3ad   : > { %v1408_v38 = vcombine.low %v1312_v27, %v1319_v28  ;;  %v5213_v39 = vcombine.high %v1312_v27, %v1319_v28  ;;  %v1424_v40 = vcombine.low %v1328_v30, %v1335_v31  ;;  %v5214_v41 = vcombine.high %v1328_v30, %v1335_v31 }
 0x3ae   : > { %v5318_v42 = vpack.c.bf16 %v1404_v33, %v1404_v33  ;;  %v5320_v44 = vpack.c.bf16 %v1405_v34, %v1405_v34  ;;  %v5322_v45 = vpack.c.bf16 %v1406_v35, %v1406_v35  ;;  %v5324_v46 = vpack.c.bf16 %v1407_v37, %v1407_v37 }
 0x3af   : > { %v1415_v47 = vrot.slane %v1408_v38, %v7119_v36  ;;  %v1423_v48 = vrot.slane %v5213_v39, %v7119_v36  ;;  %v1431_v49 = vrot.slane %v1424_v40, %v7119_v36  ;;  %v1439_v50 = vrot.slane %v5214_v41, %v7119_v36 }
 0x3b0   : > { %1509 = vst.msk [vmem:[#allocation2] sm:$0xf] %vm1508_vm3, %v5318_v42  ;;  %1511 = vst.msk [vmem:[#allocation2 + $0x8] sm:$0xf] %vm1508_vm3, %v5320_v44 }
 0x3b1   : > { %1513 = vst.msk [vmem:[#allocation2 + $0x10] sm:$0xf] %vm1508_vm3, %v5322_v45  ;;  %1515 = vst.msk [vmem:[#allocation2 + $0x18] sm:$0xf] %vm1508_vm3, %v5324_v46  ;;  %v1440_v51 = vcombine.low %v1415_v47, %v1423_v48  ;;  %v1441_v52 = vcombine.high %v1415_v47, %v1423_v48  ;;  %v1456_v53 = vcombine.low %v1431_v49, %v1439_v50  ;;  %v2373_v55 = vpop.permute.xlu0 %2372 }
 0x3b2   : > { %v1457_v54 = vcombine.high %v1431_v49, %v1439_v50 }
 0x3b3   : > { %v1448_v56 = vrot.slane %v1440_v51, %v7124_v43  ;;  %v1455_v57 = vrot.slane %v1441_v52, %v7124_v43  ;;  %v1464_v58 = vrot.slane %v1456_v53, %v7124_v43 }
 0x3b4   : > { %v1471_v59 = vrot.slane %v1457_v54, %v7124_v43 }
 0x3b5   : > { %v1472_v60 = vcombine.low %v1448_v56, %v1464_v58  ;;  %v1473_v61 = vcombine.high %v1448_v56, %v1464_v58  ;;  %v2375_v0 = vpop.permute.xlu1 %2374  ;;  %v2379_v1 = vpop.permute.xlu0 %2378 }
 0x3b6   : > { %v1474_v62 = vcombine.low %v1455_v57, %v1471_v59  ;;  %v1475_v63 = vcombine.high %v1455_v57, %v1471_v59  ;;  %v2390_v6 = vcombine.low %v7084_v19, %v2379_v1  ;;  %v2391_v7 = vcombine.high %v7084_v19, %v2379_v1 }
 0x3b7   : > { %v5319_v2 = vpack.c.bf16 %v1472_v60, %v1472_v60  ;;  %v5321_v3 = vpack.c.bf16 %v1473_v61, %v1473_v61 }
 0x3b8   : > { %v5323_v4 = vpack.c.bf16 %v1474_v62, %v1474_v62  ;;  %v5325_v5 = vpack.c.bf16 %v1475_v63, %v1475_v63  ;;  %v2398_v15 = vrot.slane %v2390_v6, %v7119_v36  ;;  %v2405_v16 = vrot.slane %v2391_v7, %v7119_v36 }
 0x3b9   : > { %1510 = vst.msk [vmem:[#allocation2 + $0x4] sm:$0xf] %vm1508_vm3, %v5319_v2  ;;  %1512 = vst.msk [vmem:[#allocation2 + $0xc] sm:$0xf] %vm1508_vm3, %v5321_v3  ;;  %v2381_v8 = vpop.permute.xlu1 %2380  ;;  %v2385_v9 = vpop.permute.xlu0 %2384 }
 0x3ba   : > { %1514 = vst.msk [vmem:[#allocation2 + $0x14] sm:$0xf] %vm1508_vm3, %v5323_v4  ;;  %1516 = vst.msk [vmem:[#allocation2 + $0x1c] sm:$0xf] %vm1508_vm3, %v5325_v5  ;;  %v2406_v11 = vcombine.low %v2373_v55, %v2385_v9  ;;  %v2407_v13 = vcombine.high %v2373_v55, %v2385_v9  ;;  %v2458_v18 = vcombine.low %v7089_v23, %v2381_v8 }
 0x3bb   : > { %v2459_v20 = vcombine.high %v7089_v23, %v2381_v8 }
 0x3bc   : > { %v2414_v17 = vrot.slane %v2406_v11, %v7119_v36  ;;  %v2421_v19 = vrot.slane %v2407_v13, %v7119_v36  ;;  %v2466_v23 = vrot.slane %v2458_v18, %v7119_v36 }
 0x3bd   : > { %v2387_v21 = vpop.permute.xlu1 %2386  ;;  %v7176_v30 = vpop.permute.xlu0 %1519  ;;  %v2473_v37 = vrot.slane %v2459_v20, %v7119_v36 }
 0x3be   : > { %v2422_v22 = vcombine.low %v2398_v15, %v2414_v17  ;;  %v2423_v24 = vcombine.high %v2398_v15, %v2414_v17  ;;  %v2438_v25 = vcombine.low %v2405_v16, %v2421_v19  ;;  %v2439_v26 = vcombine.high %v2405_v16, %v2421_v19 }
 0x3bf   : > { %v2474_v27 = vcombine.low %v2375_v0, %v2387_v21  ;;  %v2475_v28 = vcombine.high %v2375_v0, %v2387_v21 }
 0x3c0   : > { %v2430_v31 = vrot.slane %v2422_v22, %v7124_v43  ;;  %v2437_v33 = vrot.slane %v2423_v24, %v7124_v43  ;;  %v2446_v34 = vrot.slane %v2438_v25, %v7124_v43  ;;  %v2453_v35 = vrot.slane %v2439_v26, %v7124_v43  ;;  %v5859_v63 = vld [vmem:[#allocation2] sm:$0xff]   ;;  %v5860_v0 = vld [vmem:[#allocation2 + $0x8] sm:$0xff]  }
 0x3c1   : > { %v2482_v38 = vrot.slane %v2474_v27, %v7119_v36  ;;  %v2489_v39 = vrot.slane %v2475_v28, %v7119_v36  ;;  %v7186_v40 = vpop.permute.xlu1 %1521  ;;  %v1526_v58 = vpop.permute.xlu0 %1525  ;;  %v2697_v18 = vsel %vm2692_vm4, %v5859_v63, 0  ;;  %v2749_v20 = vsel %vm2692_vm4, %v5860_v0, 0 }
 0x3c2   : > { %v2526_v41 = vcombine.low %v2430_v31, %v2437_v33  ;;  %v5248_v42 = vcombine.high %v2430_v31, %v2437_v33  ;;  %v2542_v44 = vcombine.low %v2446_v34, %v2453_v35  ;;  %v5249_v45 = vcombine.high %v2446_v34, %v2453_v35  ;;  %5445 = vmatpush3.bf16.xpose.msra.mxu1 %v2697_v18 }
 0x3c3   : > { %v2490_v46 = vcombine.low %v2466_v23, %v2482_v38  ;;  %v2491_v47 = vcombine.high %v2466_v23, %v2482_v38  ;;  %v2506_v48 = vcombine.low %v2473_v37, %v2489_v39  ;;  %v2507_v49 = vcombine.high %v2473_v37, %v2489_v39  ;;  %5451 = vmatpush3.bf16.xpose.msra.mxu0 %v2749_v20  ;;  %v5861_v38 = vld [vmem:[#allocation2 + $0x10] sm:$0xff]  }
 0x3c4   : > { %v2533_v50 = vrot.slane %v2526_v41, %v7119_v36  ;;  %v2541_v51 = vrot.slane %v5248_v42, %v7119_v36  ;;  %v2549_v52 = vrot.slane %v2542_v44, %v7119_v36  ;;  %v2557_v53 = vrot.slane %v5249_v45, %v7119_v36  ;;  %5456 = vmatprep.subr.bf16.mxu1 %v6578_v29 }
 0x3c5   : > { %v2498_v54 = vrot.slane %v2490_v46, %v7124_v43  ;;  %v2505_v55 = vrot.slane %v2491_v47, %v7124_v43  ;;  %v2514_v56 = vrot.slane %v2506_v48, %v7124_v43  ;;  %v2521_v57 = vrot.slane %v2507_v49, %v7124_v43  ;;  %v1528_v1 = vpop.permute.xlu1 %1527  ;;  %v1532_v26 = vpop.permute.xlu0 %1531  ;;  %5462 = vmatprep.subr.bf16.mxu0 %v6578_v29 }
 0x3c6   : > { %v2558_v59 = vcombine.low %v2533_v50, %v2541_v51  ;;  %v2559_v60 = vcombine.high %v2533_v50, %v2541_v51  ;;  %v2574_v61 = vcombine.low %v2549_v52, %v2557_v53  ;;  %v2575_v62 = vcombine.high %v2549_v52, %v2557_v53 }
 0x3c7   : > { %v2594_v2 = vcombine.low %v2498_v54, %v2505_v55  ;;  %v5250_v3 = vcombine.high %v2498_v54, %v2505_v55  ;;  %v2610_v4 = vcombine.low %v2514_v56, %v2521_v57  ;;  %v5251_v5 = vcombine.high %v2514_v56, %v2521_v57 }
 0x3c8   : > { %v7197_v6 = vrot.slane %v2558_v59, %v7124_v43  ;;  %v7200_v7 = vrot.slane %v2559_v60, %v7124_v43  ;;  %v7203_v8 = vrot.slane %v2574_v61, %v7124_v43  ;;  %v7206_v9 = vrot.slane %v2575_v62, %v7124_v43 }
 0x3c9   : > { %v2601_v11 = vrot.slane %v2594_v2, %v7119_v36  ;;  %v2609_v13 = vrot.slane %v5250_v3, %v7119_v36  ;;  %v2617_v15 = vrot.slane %v2610_v4, %v7119_v36  ;;  %v2625_v16 = vrot.slane %v5251_v5, %v7119_v36 }
 0x3ca   : > { %v1537_v17 = vcombine.low %v7074_v10, %v1526_v58  ;;  %v1538_v19 = vcombine.high %v7074_v10, %v1526_v58  ;;  %v1605_v31 = vcombine.low %v7078_v12, %v1528_v1  ;;  %v1606_v33 = vcombine.high %v7078_v12, %v1528_v1  ;;  %v1534_v10 = vpop.permute.xlu1 %1533 }
 0x3cb   : > { %v2626_v21 = vcombine.low %v2601_v11, %v2609_v13  ;;  %v2627_v22 = vcombine.high %v2601_v11, %v2609_v13  ;;  %v2642_v24 = vcombine.low %v2617_v15, %v2625_v16  ;;  %v2643_v25 = vcombine.high %v2617_v15, %v2625_v16 }
 0x3cc   : > { %v1545_v27 = vrot.slane %v1537_v17, %v7119_v36  ;;  %v1552_v28 = vrot.slane %v1538_v19, %v7119_v36  ;;  %v1613_v39 = vrot.slane %v1605_v31, %v7119_v36  ;;  %v1620_v12 = vrot.slane %v1606_v33, %v7119_v36 }
 0x3cd   : > { %v7221_v34 = vrot.slane %v2626_v21, %v7124_v43  ;;  %v7224_v35 = vrot.slane %v2627_v22, %v7124_v43  ;;  %v7227_v23 = vrot.slane %v2642_v24, %v7124_v43  ;;  %v7230_v37 = vrot.slane %v2643_v25, %v7124_v43 }
 0x3ce   : > { %v1553_v41 = vcombine.low %v7176_v30, %v1532_v26  ;;  %v1554_v42 = vcombine.high %v7176_v30, %v1532_v26  ;;  %v1621_v44 = vcombine.low %v7186_v40, %v1534_v10  ;;  %v1622_v45 = vcombine.high %v7186_v40, %v1534_v10 }
 0x3cf   : > { %v2590_v46 = vcombine.low %v7197_v6, %v7203_v8  ;;  %v2658_v47 = vcombine.low %v7221_v34, %v7227_v23  ;;  %v2591_v50 = vcombine.high %v7197_v6, %v7203_v8  ;;  %v2659_v30 = vcombine.high %v7221_v34, %v7227_v23 }
 0x3d0   : > { %v1561_v48 = vrot.slane %v1553_v41, %v7119_v36  ;;  %v1568_v49 = vrot.slane %v1554_v42, %v7119_v36  ;;  %v1629_v51 = vrot.slane %v1621_v44, %v7119_v36  ;;  %v1636_v40 = vrot.slane %v1622_v45, %v7119_v36 }
 0x3d1   : > { %v2667_v52 = vpack.c.bf16 %v2658_v47, %v2590_v46  ;;  %v2801_v53 = vsel %vm2692_vm4, %v5861_v38, 0  ;;  %v2661_v34 = vcombine.high %v7224_v35, %v7230_v37  ;;  %v2593_v23 = vcombine.high %v7200_v7, %v7206_v9 }
 0x3d2   : > { %v1569_v54 = vcombine.low %v1545_v27, %v1561_v48  ;;  %v1570_v55 = vcombine.high %v1545_v27, %v1561_v48  ;;  %v1585_v56 = vcombine.low %v1552_v28, %v1568_v49  ;;  %v1586_v57 = vcombine.high %v1552_v28, %v1568_v49 }
 0x3d3   : > { %v1637_v58 = vcombine.low %v1613_v39, %v1629_v51  ;;  %v1638_v59 = vcombine.high %v1613_v39, %v1629_v51  ;;  %v1653_v60 = vcombine.low %v1620_v12, %v1636_v40  ;;  %v1654_v61 = vcombine.high %v1620_v12, %v1636_v40  ;;  %5447 = vmatmul.mubr.msk.bf16.vlgmr.msra.gmra.mxu1 %vm2692_vm4, %v2667_v52 }
 0x3d4   : > { %v1577_v62 = vrot.slane %v1569_v54, %v7124_v43  ;;  %v1584_v63 = vrot.slane %v1570_v55, %v7124_v43  ;;  %v1593_v0 = vrot.slane %v1585_v56, %v7124_v43  ;;  %v1600_v1 = vrot.slane %v1586_v57, %v7124_v43  ;;  %5457 = vmatpush3.bf16.xpose.msra.mxu1 %v2801_v53 }
 0x3d5   : > { %v1645_v2 = vrot.slane %v1637_v58, %v7124_v43  ;;  %v1652_v3 = vrot.slane %v1638_v59, %v7124_v43  ;;  %v1661_v4 = vrot.slane %v1653_v60, %v7124_v43  ;;  %v1668_v5 = vrot.slane %v1654_v61, %v7124_v43  ;;  %5458 = vmatprep.mubr.msk.bf16.mxu1 %vm6579_vm1, %v6578_v29 }
 0x3d6   : > { %v1673_v11 = vcombine.low %v1577_v62, %v1584_v63  ;;  %v5223_v13 = vcombine.high %v1577_v62, %v1584_v63  ;;  %v1689_v15 = vcombine.low %v1593_v0, %v1600_v1  ;;  %v5224_v16 = vcombine.high %v1593_v0, %v1600_v1  ;;  %5468 = vmatprep.subr.bf16.mxu1 %v6578_v29  ;;  %v5862_v1 = vld [vmem:[#allocation2 + $0x18] sm:$0xff]  }
 0x3d7   : > { %v1741_v17 = vcombine.low %v1645_v2, %v1652_v3  ;;  %v5225_v19 = vcombine.high %v1645_v2, %v1652_v3  ;;  %v1757_v18 = vcombine.low %v1661_v4, %v1668_v5  ;;  %v5226_v20 = vcombine.high %v1661_v4, %v1668_v5 }
 0x3d8   : > { %v1680_v21 = vrot.slane %v1673_v11, %v7119_v36  ;;  %v1688_v22 = vrot.slane %v5223_v13, %v7119_v36  ;;  %v1696_v24 = vrot.slane %v1689_v15, %v7119_v36  ;;  %v1704_v25 = vrot.slane %v5224_v16, %v7119_v36 }
 0x3d9   : > { %v1748_v26 = vrot.slane %v1741_v17, %v7119_v36  ;;  %v1756_v27 = vrot.slane %v5225_v19, %v7119_v36  ;;  %v1764_v28 = vrot.slane %v1757_v18, %v7119_v36  ;;  %v1772_v31 = vrot.slane %v5226_v20, %v7119_v36 }
 0x3da   : > { %v1705_v33 = vcombine.low %v1680_v21, %v1688_v22  ;;  %v1706_v10 = vcombine.high %v1680_v21, %v1688_v22  ;;  %v1721_v38 = vcombine.low %v1696_v24, %v1704_v25  ;;  %v1722_v39 = vcombine.high %v1696_v24, %v1704_v25 }
 0x3db   : > { %v1773_v12 = vcombine.low %v1748_v26, %v1756_v27  ;;  %v1774_v41 = vcombine.high %v1748_v26, %v1756_v27  ;;  %v1789_v42 = vcombine.low %v1764_v28, %v1772_v31  ;;  %v1790_v44 = vcombine.high %v1764_v28, %v1772_v31 }
 0x3dc   : > { %v1713_v45 = vrot.slane %v1705_v33, %v7124_v43  ;;  %v1720_v46 = vrot.slane %v1706_v10, %v7124_v43  ;;  %v1729_v47 = vrot.slane %v1721_v38, %v7124_v43  ;;  %v1736_v48 = vrot.slane %v1722_v39, %v7124_v43 }
 0x3dd   : > { %v1781_v49 = vrot.slane %v1773_v12, %v7124_v43  ;;  %v1788_v51 = vrot.slane %v1774_v41, %v7124_v43  ;;  %v1797_v40 = vrot.slane %v1789_v42, %v7124_v43  ;;  %v1804_v52 = vrot.slane %v1790_v44, %v7124_v43 }
 0x3de   : > { %v1737_v53 = vcombine.low %v1713_v45, %v1729_v47  ;;  %v1738_v54 = vcombine.high %v1713_v45, %v1729_v47  ;;  %v1739_v55 = vcombine.low %v1720_v46, %v1736_v48  ;;  %v1740_v56 = vcombine.high %v1720_v46, %v1736_v48 }
 0x3df   : > { %v1805_v57 = vcombine.low %v1781_v49, %v1797_v40  ;;  %v1806_v58 = vcombine.high %v1781_v49, %v1797_v40  ;;  %v1807_v59 = vcombine.low %v1788_v51, %v1804_v52  ;;  %v1808_v60 = vcombine.high %v1788_v51, %v1804_v52 }
 0x3e0   : > { %v5326_v61 = vpack.c.bf16 %v1737_v53, %v1737_v53  ;;  %v5328_v62 = vpack.c.bf16 %v1738_v54, %v1738_v54  ;;  %v5330_v63 = vpack.c.bf16 %v1739_v55, %v1739_v55  ;;  %v5332_v0 = vpack.c.bf16 %v1740_v56, %v1740_v56 }
 0x3e1   : > { %v5327_v2 = vpack.c.bf16 %v1805_v57, %v1805_v57  ;;  %v5329_v3 = vpack.c.bf16 %v1806_v58, %v1806_v58  ;;  %v5331_v4 = vpack.c.bf16 %v1807_v59, %v1807_v59  ;;  %v5333_v5 = vpack.c.bf16 %v1808_v60, %v1808_v60 }
 0x3e2   : > { %1841 = vst.msk [vmem:[#allocation3] sm:$0xf] %vm1508_vm3, %v5326_v61  ;;  %1843 = vst.msk [vmem:[#allocation3 + $0x8] sm:$0xf] %vm1508_vm3, %v5328_v62  ;;  %v2668_v11 = vpack.c.bf16 %v2659_v30, %v2591_v50  ;;  %v2592_v13 = vcombine.low %v7200_v7, %v7206_v9  ;;  %v2660_v15 = vcombine.low %v7224_v35, %v7230_v37  ;;  %v2853_v6 = vsel %vm2692_vm4, %v5862_v1, 0  ;;  %v7316_v35 = vpop.f32.mrf.mxu1 }
 0x3e3   : > { %1845 = vst.msk [vmem:[#allocation3 + $0x10] sm:$0xf] %vm1508_vm3, %v5330_v63  ;;  %1847 = vst.msk [vmem:[#allocation3 + $0x18] sm:$0xf] %vm1508_vm3, %v5332_v0  ;;  %v2670_v50 = vpack.c.bf16 %v2661_v34, %v2593_v23 }
 0x3e4   : > { %1842 = vst.msk [vmem:[#allocation3 + $0x4] sm:$0xf] %vm1508_vm3, %v5327_v2  ;;  %1844 = vst.msk [vmem:[#allocation3 + $0xc] sm:$0xf] %vm1508_vm3, %v5329_v3  ;;  %5453 = vmatmul.mubr.msk.bf16.vlgmr.msra.gmra.mxu0 %vm2692_vm4, %v2668_v11  ;;  %v2669_v8 = vpack.c.bf16 %v2660_v15, %v2592_v13  ;;  %v5434_v37 = vpop.f32.mrf.mxu1 }
 0x3e5   : > { %1846 = vst.msk [vmem:[#allocation3 + $0x14] sm:$0xf] %vm1508_vm3, %v5331_v4  ;;  %1848 = vst.msk [vmem:[#allocation3 + $0x1c] sm:$0xf] %vm1508_vm3, %v5333_v5  ;;  %5463 = vmatpush3.bf16.xpose.msra.mxu0 %v2853_v6  ;;  %5464 = vmatprep.mubr.msk.bf16.mxu0 %vm6579_vm1, %v6578_v29 }
 0x3e6   : > { %5459 = vmatmul.mubr.msk.bf16.vlgmr.msra.gmra.mxu1 %vm2692_vm4, %v2669_v8  ;;  %5474 = vmatprep.subr.bf16.mxu0 %v6578_v29  ;;  %v1948_v17 = vpop.f32.mrf.mxu1 }
 0x3e7   : > { %5470 = vmatprep.mubr.msk.bf16.mxu1 %vm6579_vm1, %v6578_v29 }
 0x3e8   : > { %v5435_v19 = vpop.f32.mrf.mxu1 }
 0x3eb   : > { %v5863_v30 = vld [vmem:[#allocation3] sm:$0xff]   ;;  %v5864_v16 = vld [vmem:[#allocation3 + $0x8] sm:$0xff]  }
 0x3ec   : > { %5465 = vmatmul.mubr.msk.bf16.vlgmr.msra.gmra.mxu0 %vm2692_vm4, %v2670_v50  ;;  %5469 = vmatpush3.bf16.msra.mxu1 %v5863_v30  ;;  %v5865_v23 = vld [vmem:[#allocation3 + $0x10] sm:$0xff]  }
 0x3ed   : > { %5475 = vmatpush3.bf16.msra.mxu0 %v5864_v16  ;;  %5480 = vmatprep.subr.bf16.mxu1 %v6578_v29 }
 0x3ee   : > { %5476 = vmatprep.mubr.msk.bf16.mxu0 %vm6579_vm1, %v6578_v29  ;;  %5486 = vmatprep.subr.bf16.mxu0 %v6578_v29 }
 0x493   : > { %v2733_v7 = vpop.f32.mrf.mxu1 }
 0x494   : > { %v2897_v9 = vsel %vm1859_vm2, %v2733_v7, -inf }
 0x495   : > { %2898 = vmax.xlane.f32.xlu0 %v2897_v9  ;;  %v5448_v18 = vpop.f32.mrf.mxu1 }
 0x497   : > { %v2736_v20 = vpop.f32.mrf.mxu1 }
 0x498   : > { %v2900_v21 = vsel %vm1859_vm2, %v2736_v20, -inf }
 0x499   : > { %2901 = vmax.xlane.f32.xlu1 %v2900_v21  ;;  %v5449_v22 = vpop.f32.mrf.mxu1 }
 0x4a4   : > { %v2785_v24 = vpop.f32.mrf.mxu0 }
 0x4a5   : > { %v2903_v25 = vsel %vm1859_vm2, %v2785_v24, -inf }
 0x4a6   : > { %v5454_v26 = vpop.f32.mrf.mxu0  ;;  %2904 = vmax.xlane.f32.xlu0 %v2903_v25  ;;  %v2837_v27 = vpop.f32.mrf.mxu1 }
 0x4a7   : > { %v2909_v28 = vsel %vm1859_vm2, %v2837_v27, -inf }
 0x4a8   : > { %v2788_v31 = vpop.f32.mrf.mxu0  ;;  %v5460_v33 = vpop.f32.mrf.mxu1 }
 0x4a9   : > { %v2906_v10 = vsel %vm1859_vm2, %v2788_v31, -inf }
 0x4aa   : > { %v5455_v38 = vpop.f32.mrf.mxu0  ;;  %2907 = vmax.xlane.f32.xlu1 %v2906_v10  ;;  %2910 = vmax.xlane.f32.xlu0 %v2909_v28  ;;  %v2840_v39 = vpop.f32.mrf.mxu1  ;;  %v5866_v28 = vld [vmem:[#allocation3 + $0x18] sm:$0xff]  }
 0x4ab   : > { %v2912_v12 = vsel %vm1859_vm2, %v2840_v39, -inf }
 0x4ac   : > { %v2889_v41 = vpop.f32.mrf.mxu0  ;;  %v5461_v42 = vpop.f32.mrf.mxu1 }
 0x4ad   : > { %v2915_v47 = vsel %vm1859_vm2, %v2889_v41, -inf }
 0x4ae   : > { %v5466_v44 = vpop.f32.mrf.mxu0  ;;  %2913 = vmax.xlane.f32.xlu0 %v2912_v12 }
 0x4b0   : > { %v2892_v45 = vpop.f32.mrf.mxu0 }
 0x4b1   : > { %v2918_v46 = vsel %vm1859_vm2, %v2892_v45, -inf }
 0x4b2   : > { %v5467_v48 = vpop.f32.mrf.mxu0  ;;  %2919 = vmax.xlane.f32.xlu1 %v2918_v46  ;;  %2916 = vmax.xlane.f32.xlu0 %v2915_v47  ;;  %v2663_v46 = vld [vmem:[#allocation17 + $0x4] sm:$0xf] }
 0x4b3   : > { %v3301_v48 = vsel %vm3252_vm5, %v2663_v46, 0 }
 0x51e   : > { %v7326_v49 = vpop.xlane.xlu0 %2898 }
 0x51f   : > { %v2921_v51 = vmax.f32 %v7326_v49, -1e+30 }
 0x521   : > { %v2953_v40 = vsub.f32 %v2733_v7, %v2921_v51 }
 0x522   : > { %v7331_v52 = vpop.xlane.xlu1 %2901 }
 0x523   : > { %v2961_v53 = vmul.f32 1.442695, %v2953_v40  ;;  %v2922_v54 = vmax.f32 %v7331_v52, -1e+30  ;;  %v2929_v40 = vsub.f32 -1e+30, %v2921_v51 }
 0x525   : > { %v2954_v55 = vsub.f32 %v2736_v20, %v2922_v54  ;;  %5891 = vpow2.f32 %v2961_v53  ;;  %v2930_v53 = vsub.f32 -1e+30, %v2922_v54 }
 0x527   : > { %v2963_v56 = vmul.f32 1.442695, %v2954_v55  ;;  %v2937_v55 = vmul.f32 1.442695, %v2929_v40 }
 0x529   : > { %5893 = vpow2.f32 %v2963_v56  ;;  %v2939_v56 = vmul.f32 1.442695, %v2930_v53 }
 0x52f   : > { %v7336_v57 = vpop.xlane.xlu0 %2904 }
 0x530   : > { %v2923_v58 = vmax.f32 %v7336_v57, -1e+30 }
 0x532   : > { %v2955_v59 = vsub.f32 %v2785_v24, %v2923_v58  ;;  %v5892_v60 = vpop.eup %5891 }
 0x533   : > { %v7341_v61 = vpop.xlane.xlu1 %2907  ;;  %v7343_v62 = vpop.xlane.xlu0 %2910  ;;  %v2985_v2 = vsel %vm1859_vm2, %v5892_v60, 0.0 }
 0x534   : > { %v2965_v63 = vmul.f32 1.442695, %v2955_v59  ;;  %v2924_v0 = vmax.f32 %v7341_v61, -1e+30  ;;  %v2925_v1 = vmax.f32 %v7343_v62, -1e+30  ;;  %2986 = vadd.xlane.f32.xlu0 %v2985_v2 }
 0x535   : > { %v2931_v59 = vsub.f32 -1e+30, %v2923_v58 }
 0x536   : > { %v2956_v3 = vsub.f32 %v2788_v31, %v2924_v0  ;;  %v5894_v4 = vpop.eup %5893  ;;  %5895 = vpow2.f32 %v2965_v63  ;;  %v2957_v5 = vsub.f32 %v2837_v27, %v2925_v1  ;;  %v2933_v63 = vsub.f32 -1e+30, %v2925_v1 }
 0x537   : > { %v7352_v11 = vpop.xlane.xlu0 %2913  ;;  %v3017_v6 = vpack.c.bf16 %v5894_v4, %v5892_v60  ;;  %v2988_v34 = vsel %vm1859_vm2, %v5894_v4, 0.0  ;;  %v2932_v60 = vsub.f32 -1e+30, %v2924_v0 }
 0x538   : > { %v2967_v13 = vmul.f32 1.442695, %v2956_v3  ;;  %v2926_v15 = vmax.f32 %v7352_v11, -1e+30  ;;  %v2969_v8 = vmul.f32 1.442695, %v2957_v5  ;;  %2989 = vadd.xlane.f32.xlu1 %v2988_v34 }
 0x539   : > { %5471 = vmatmul.mubr.msk.bf16.vlgmr.msra.gmra.mxu1 %vm1859_vm2, %v3017_v6  ;;  %v2941_v3 = vmul.f32 1.442695, %v2931_v59  ;;  %v2943_v52 = vmul.f32 1.442695, %v2932_v60  ;;  %v2945_v4 = vmul.f32 1.442695, %v2933_v63 }
 0x53a   : > { %v2958_v50 = vsub.f32 %v2840_v39, %v2926_v15  ;;  %5897 = vpow2.f32 %v2967_v13  ;;  %5481 = vmatpush3.bf16.msra.mxu1 %v5865_v23  ;;  %5482 = vmatprep.mubr.msk.bf16.mxu1 %vm6579_vm1, %v6578_v29  ;;  %v2934_v49 = vsub.f32 -1e+30, %v2926_v15 }
 0x53b   : > { %v7359_v30 = vpop.xlane.xlu1 %2919  ;;  %v7361_v16 = vpop.xlane.xlu0 %2916  ;;  %5492 = vmatprep.subr.bf16.mxu1 %v6578_v29  ;;  %5899 = vpow2.f32 %v2969_v8 }
 0x53c   : > { %v2928_v37 = vmax.f32 %v7359_v30, -1e+30  ;;  %v2971_v17 = vmul.f32 1.442695, %v2958_v50  ;;  %v2927_v19 = vmax.f32 %v7361_v16, -1e+30 }
 0x53d   : > { %v2947_v57 = vmul.f32 1.442695, %v2934_v49 }
 0x53e   : > { %v2960_v7 = vsub.f32 %v2892_v45, %v2928_v37  ;;  %5901 = vpow2.f32 %v2971_v17  ;;  %v2959_v9 = vsub.f32 %v2889_v41, %v2927_v19  ;;  %v2662_v45 = vld [vmem:[#allocation17] sm:$0xf]  ;;  %v2936_v62 = vsub.f32 -1e+30, %v2928_v37 }
 0x53f   : > { %v3254_v47 = vsel %vm3252_vm5, %v2662_v45, 0  ;;  %v2935_v1 = vsub.f32 -1e+30, %v2927_v19 }
 0x540   : > { %v2975_v18 = vmul.f32 1.442695, %v2960_v7  ;;  %v2973_v20 = vmul.f32 1.442695, %v2959_v9  ;;  %v2951_v11 = vmul.f32 1.442695, %v2936_v62 }
 0x541   : > { %v2949_v15 = vmul.f32 1.442695, %v2935_v1 }
 0x542   : > { %5903 = vpow2.f32 %v2975_v18 }
 0x543   : > { %v5896_v21 = vpop.eup %5895  ;;  %5905 = vpow2.f32 %v2973_v20 }
 0x544   : > { %v2991_v22 = vsel %vm1859_vm2, %v5896_v21, 0.0  ;;  %5907 = vpow2.f32 %v2937_v55 }
 0x545   : > { %2992 = vadd.xlane.f32.xlu0 %v2991_v22  ;;  %5909 = vpow2.f32 %v2939_v56 }
 0x546   : > { %5911 = vpow2.f32 %v2941_v3 }
 0x547   : > { %v5898_v24 = vpop.eup %5897  ;;  %5913 = vpow2.f32 %v2943_v52 }
 0x548   : > { %v2994_v25 = vsel %vm1859_vm2, %v5898_v24, 0.0  ;;  %v3018_v26 = vpack.c.bf16 %v5898_v24, %v5896_v21  ;;  %v5900_v27 = vpop.eup %5899  ;;  %5915 = vpow2.f32 %v2945_v4  ;;  %v2665_v4 = vld [vmem:[#allocation17 + $0xc] sm:$0xf] }
 0x549   : > { %2995 = vadd.xlane.f32.xlu1 %v2994_v25  ;;  %v2997_v31 = vsel %vm1859_vm2, %v5900_v27, 0.0  ;;  %5917 = vpow2.f32 %v2947_v57  ;;  %v3395_v1 = vsel %vm3252_vm5, %v2665_v4, 0 }
 0x54a   : > { %5477 = vmatmul.mubr.msk.bf16.vlgmr.msra.gmra.mxu0 %vm1859_vm2, %v3018_v26  ;;  %2998 = vadd.xlane.f32.xlu0 %v2997_v31 }
 0x54b   : > { %v5902_v33 = vpop.eup %5901  ;;  %5487 = vmatpush3.bf16.msra.mxu0 %v5866_v28  ;;  %5488 = vmatprep.mubr.msk.bf16.mxu0 %vm6579_vm1, %v6578_v29  ;;  %v2664_v28 = vld [vmem:[#allocation17 + $0x8] sm:$0xf] }
 0x54c   : > { %v3000_v10 = vsel %vm1859_vm2, %v5902_v33, 0.0  ;;  %v3019_v38 = vpack.c.bf16 %v5902_v33, %v5900_v27  ;;  %5498 = vmatprep.subr.bf16.mxu0 %v6578_v29 }
 0x54d   : > { %3001 = vadd.xlane.f32.xlu1 %v3000_v10 }
 0x54e   : > { %5483 = vmatmul.mubr.msk.bf16.vlgmr.msra.gmra.mxu1 %vm1859_vm2, %v3019_v38 }
 0x54f   : > { %v5904_v39 = vpop.eup %5903  ;;  %5494 = vmatprep.mubr.msk.bf16.mxu1 %vm6579_vm1, %v6578_v29  ;;  %5493 = vmatpush3.bf16.msra.mxu1 %v3254_v47 }
 0x550   : > { %v3006_v12 = vsel %vm1859_vm2, %v5904_v39, 0.0  ;;  %v5906_v41 = vpop.eup %5905  ;;  %5504 = vmatprep.subr.bf16.mxu1 %v6578_v29 }
 0x551   : > { %3007 = vadd.xlane.f32.xlu1 %v3006_v12  ;;  %v3003_v42 = vsel %vm1859_vm2, %v5906_v41, 0.0  ;;  %v3020_v44 = vpack.c.bf16 %v5904_v39, %v5906_v41  ;;  %v5908_v2 = vpop.eup %5907  ;;  %v3348_v41 = vsel %vm3252_vm5, %v2664_v28, 0 }
 0x552   : > { %3004 = vadd.xlane.f32.xlu0 %v3003_v42  ;;  %v5910_v51 = vpop.eup %5909  ;;  %v2977_v5 = vmul.f32 0.0, %v5908_v2 }
 0x553   : > { %5489 = vmatmul.mubr.msk.bf16.vlgmr.msra.gmra.mxu0 %vm1859_vm2, %v3020_v44  ;;  %v2978_v58 = vmul.f32 0.0, %v5910_v51  ;;  %v5912_v8 = vpop.eup %5911 }
 0x554   : > { %5500 = vmatprep.mubr.msk.bf16.mxu0 %vm6579_vm1, %v6578_v29  ;;  %5499 = vmatpush3.bf16.msra.mxu0 %v3301_v48  ;;  %v5914_v50 = vpop.eup %5913  ;;  %v2979_v37 = vmul.f32 0.0, %v5912_v8 }
 0x555   : > { %5510 = vmatprep.subr.bf16.mxu0 %v6578_v29  ;;  %v5916_v30 = vpop.eup %5915  ;;  %v2980_v18 = vmul.f32 0.0, %v5914_v50 }
 0x556   : > { %v5918_v9 = vpop.eup %5917  ;;  %v2981_v31 = vmul.f32 0.0, %v5916_v30 }
 0x557   : > { %v2982_v38 = vmul.f32 0.0, %v5918_v9 }
 0x5bd   : > { %v2987_v54 = vpop.xlane.xlu0 %2986 }
 0x5be   : > { %v3009_v61 = vadd.f32 %v2987_v54, %v2977_v5 }
 0x5c0   : > { %5919 = vrcp.f32 %v3009_v61 }
 0x5c1   : > { %v2990_v13 = vpop.xlane.xlu1 %2989 }
 0x5c2   : > { %v3010_v0 = vadd.f32 %v2990_v13, %v2978_v58 }
 0x5c4   : > { %5921 = vrcp.f32 %v3010_v0 }
 0x5c5   : > { %5923 = vpow2.f32 %v2951_v11 }
 0x5c6   : > { %5925 = vpow2.f32 %v2949_v15 }
 0x5cd   : > { %v5920_v19 = vpop.eup %5919 }
 0x5ce   : > { %v2993_v6 = vpop.xlane.xlu0 %2992 }
 0x5cf   : > { %v3011_v20 = vadd.f32 %v2993_v6, %v2979_v37 }
 0x5d1   : > { %v5922_v24 = vpop.eup %5921  ;;  %5927 = vrcp.f32 %v3011_v20 }
 0x5d2   : > { %v2996_v34 = vpop.xlane.xlu1 %2995  ;;  %v5924_v42 = vpop.eup %5923 }
 0x5d3   : > { %v2999_v21 = vpop.xlane.xlu0 %2998  ;;  %v3012_v25 = vadd.f32 %v2996_v34, %v2980_v18  ;;  %v5926_v45 = vpop.eup %5925  ;;  %v2984_v47 = vmul.f32 0.0, %v5924_v42 }
 0x5d4   : > { %v3013_v39 = vadd.f32 %v2999_v21, %v2981_v31  ;;  %v2983_v40 = vmul.f32 0.0, %v5926_v45 }
 0x5d5   : > { %5929 = vrcp.f32 %v3012_v25 }
 0x5d6   : > { %v3002_v26 = vpop.xlane.xlu1 %3001  ;;  %5931 = vrcp.f32 %v3013_v39 }
 0x5d7   : > { %v3014_v44 = vadd.f32 %v3002_v26, %v2982_v38 }
 0x5d9   : > { %5933 = vrcp.f32 %v3014_v44 }
 0x5da   : > { %v3008_v46 = vpop.xlane.xlu1 %3007 }
 0x5db   : > { %v3005_v48 = vpop.xlane.xlu0 %3004  ;;  %v3016_v53 = vadd.f32 %v3008_v46, %v2984_v47 }
 0x5dc   : > { %v3015_v55 = vadd.f32 %v3005_v48, %v2983_v40 }
 0x5dd   : > { %5935 = vrcp.f32 %v3016_v53  ;;  %v5272_v53 = vld [vmem:[#allocation18] ss:$0 sm:$0xff] }
 0x5de   : > { %5937 = vrcp.f32 %v3015_v55  ;;  %v5928_v3 = vpop.eup %5927 }
 0x5e2   : > { %v5930_v51 = vpop.eup %5929 }
 0x5e3   : > { %v5932_v61 = vpop.eup %5931 }
 0x5e6   : > { %v5934_v11 = vpop.eup %5933 }
 0x5f9   : > { %v3064_v23 = vpop.f32.mrf.mxu1 }
 0x5fa   : > { %v3221_v7 = vadd.f32 %v3064_v23, %v2977_v5 }
 0x5fb   : > { %v5472_v17 = vpop.f32.mrf.mxu1 }
 0x5fc   : > { %v3237_v33 = vmul.f32 %v5920_v19, %v3221_v7 }
 0x5fd   : > { %v3067_v16 = vpop.f32.mrf.mxu1 }
 0x5fe   : > { %v3222_v22 = vadd.f32 %v3067_v16, %v2978_v58 }
 0x5ff   : > { %v5473_v27 = vpop.f32.mrf.mxu1 }
 0x600   : > { %v3238_v10 = vmul.f32 %v5922_v24, %v3222_v22 }
 0x602   : > { %v3245_v12 = vpack.c.bf16 %v3238_v10, %v3237_v33 }
 0x604   : > { %5495 = vmatmul.mubr.msk.bf16.vlgmr.msra.gmra.mxu1 %vm2692_vm4, %v3245_v12 }
 0x605   : > { %5505 = vmatpush3.bf16.msra.mxu1 %v3348_v41  ;;  %5506 = vmatprep.mubr.msk.bf16.mxu1 %vm6579_vm1, %v6578_v29 }
 0x606   : > { %5516 = vmatprep.subr.bf16.mxu1 %v6578_v29 }
 0x60a   : > { %v3114_v56 = vpop.f32.mrf.mxu0 }
 0x60b   : > { %v3223_v60 = vadd.f32 %v3114_v56, %v2979_v37  ;;  %v5936_v37 = vpop.eup %5935 }
 0x60c   : > { %v5478_v59 = vpop.f32.mrf.mxu0  ;;  %v5938_v9 = vpop.eup %5937 }
 0x60d   : > { %v3239_v5 = vmul.f32 %v5928_v3, %v3223_v60 }
 0x60e   : > { %v3117_v63 = vpop.f32.mrf.mxu0  ;;  %v3164_v2 = vpop.f32.mrf.mxu1 }
 0x60f   : > { %v3224_v49 = vadd.f32 %v3117_v63, %v2980_v18  ;;  %v3225_v57 = vadd.f32 %v3164_v2, %v2981_v31 }
 0x610   : > { %v5479_v52 = vpop.f32.mrf.mxu0  ;;  %v5484_v54 = vpop.f32.mrf.mxu1 }
 0x611   : > { %v3240_v13 = vmul.f32 %v5930_v51, %v3224_v49  ;;  %v3241_v8 = vmul.f32 %v5932_v61, %v3225_v57  ;;  %v5999_v54 = vld [vmem:[%s7014_s29] sm:$0xff]  ;;  %v6000_v57 = vld [vmem:[%s7014_s29 + $0x8] sm:$0xff]  ;;  %s7894_s29 = sld [smem:[#allocation62_spill]] }
 0x612   : > { %v3167_v58 = vpop.f32.mrf.mxu1 }
 0x613   : > { %v3246_v62 = vpack.c.bf16 %v3240_v13, %v3239_v5  ;;  %v3226_v0 = vadd.f32 %v3167_v58, %v2982_v38  ;;  %v3214_v15 = vpop.f32.mrf.mxu0 }
 0x614   : > { %v5485_v6 = vpop.f32.mrf.mxu1  ;;  %v3227_v17 = vadd.f32 %v3214_v15, %v2983_v40 }
 0x615   : > { %v3242_v34 = vmul.f32 %v5934_v11, %v3226_v0  ;;  %5501 = vmatmul.mubr.msk.bf16.vlgmr.msra.gmra.mxu0 %vm2692_vm4, %v3246_v62  ;;  %v5490_v23 = vpop.f32.mrf.mxu0 }
 0x616   : > { %5511 = vmatpush3.bf16.msra.mxu0 %v3395_v1  ;;  %5512 = vmatprep.mubr.msk.bf16.mxu0 %vm6579_vm1, %v6578_v29  ;;  %v3243_v16 = vmul.f32 %v5938_v9, %v3227_v17  ;;  %v5867_v17 = vld [vmem:[#allocation23 + $0x8] sm:$0xff]  }
 0x617   : > { %v3247_v50 = vpack.c.bf16 %v3242_v34, %v3241_v8  ;;  %5524 = vmatprep.subr.bf16.mxu0 %v6578_v29  ;;  %v3217_v30 = vpop.f32.mrf.mxu0 }
 0x618   : > { %v3228_v7 = vadd.f32 %v3217_v30, %v2984_v47  ;;  %v5868_v30 = vld [vmem:[#allocation23] sm:$0xff]  }
 0x619   : > { %5507 = vmatmul.mubr.msk.bf16.vlgmr.msra.gmra.mxu1 %vm2692_vm4, %v3247_v50  ;;  %v5491_v18 = vpop.f32.mrf.mxu0 }
 0x61a   : > { %5520 = vmatprep.mubr.msk.bf16.mxu1 %vm6579_vm1, %v6578_v29  ;;  %v3244_v19 = vmul.f32 %v5936_v37, %v3228_v7  ;;  %5517 = vmatpush3.bf16.msra.mxu1 %v5867_v17 }
 0x61b   : > { %5518 = vmatprep.subr.bf16.mxu1 %v6578_v29 }
 0x61c   : > { %v3248_v20 = vpack.c.bf16 %v3244_v19, %v3243_v16 }
 0x61e   : > { %5513 = vmatmul.mubr.msk.bf16.vlgmr.msra.gmra.mxu0 %vm2692_vm4, %v3248_v20  ;;  %5519 = vmatpush3.bf16.msra.mxu1 %v5868_v30 }
 0x61f   : > { %5526 = vmatprep.mubr.msk.bf16.mxu0 %vm6579_vm1, %v6578_v29  ;;  %5530 = vmatprep.subr.bf16.mxu1 %v6578_v29 }
 0x6c4   : > { %v3290_v21 = vpop.f32.mrf.mxu1 }
 0x6c5   : > { %v3438_v39 = vsel %vm1022_vm0, %v3290_v21, 0.0 }
 0x6c6   : > { %v5496_v22 = vpop.f32.mrf.mxu1 }
 0x6c8   : > { %v3293_v24 = vpop.f32.mrf.mxu1 }
 0x6c9   : > { %v3445_v48 = vsel %vm1022_vm0, %v3293_v24, 0.0 }
 0x6ca   : > { %v5497_v25 = vpop.f32.mrf.mxu1 }
 0x6d5   : > { %v3337_v26 = vpop.f32.mrf.mxu0 }
 0x6d6   : > { %v3439_v33 = vsel %vm1022_vm0, %v3337_v26, 0.0 }
 0x6d7   : > { %v5502_v27 = vpop.f32.mrf.mxu0  ;;  %v3440_v41 = vadd.f32 %v3439_v33, %v3438_v39 }
 0x6d9   : > { %v3340_v28 = vpop.f32.mrf.mxu0  ;;  %v3384_v31 = vpop.f32.mrf.mxu1 }
 0x6da   : > { %v3441_v12 = vsel %vm1022_vm0, %v3384_v31, 0.0  ;;  %v3446_v44 = vsel %vm1022_vm0, %v3340_v28, 0.0 }
 0x6db   : > { %v5503_v10 = vpop.f32.mrf.mxu0  ;;  %v5508_v38 = vpop.f32.mrf.mxu1  ;;  %v3442_v45 = vadd.f32 %v3441_v12, %v3440_v41  ;;  %v3447_v56 = vadd.f32 %v3446_v44, %v3445_v48  ;;  %v5273_v48 = vld [vmem:[#allocation20] ss:$0 sm:$0xff] }
 0x6dd   : > { %v3387_v42 = vpop.f32.mrf.mxu1 }
 0x6de   : > { %v3431_v46 = vpop.f32.mrf.mxu0  ;;  %v3448_v40 = vsel %vm1022_vm0, %v3387_v42, 0.0 }
 0x6df   : > { %v5509_v47 = vpop.f32.mrf.mxu1  ;;  %v3443_v55 = vsel %vm1022_vm0, %v3431_v46, 0.0  ;;  %v3449_v63 = vadd.f32 %v3448_v40, %v3447_v56 }
 0x6e0   : > { %v3444_v59 = vadd.f32 %v3443_v55, %v3442_v45  ;;  %v5514_v60 = vpop.f32.mrf.mxu0 }
 0x6e2   : > { %v3458_v2 = vadd.f32 %v5272_v53, %v3444_v59  ;;  %v3434_v3 = vpop.f32.mrf.mxu0 }
 0x6e3   : > { %v3450_v49 = vsel %vm1022_vm0, %v3434_v3, 0.0 }
 0x6e4   : > { %v3451_v51 = vadd.f32 %v3450_v49, %v3449_v63  ;;  %v5515_v52 = vpop.f32.mrf.mxu0  ;;  %v7433_v4 = vadd.f32 %v5999_v54, %v3458_v2 }
 0x6e5   : > { %v5274_v52 = vld [vmem:[#allocation21] ss:$0 sm:$0xff] }
 0x6e6   : > { %v3459_v5 = vadd.f32 %v5272_v53, %v3451_v51  ;;  %v3464_v13 = vsel %vm1022_vm0, %v7433_v4, 0.0 }
 0x6e7   : > { %3465 = vadd.xlane.f32.xlu0 %v3464_v13 }
 0x6e8   : > { %v7438_v58 = vadd.f32 %v6000_v57, %v3459_v5 }
 0x6ea   : > { %v3467_v61 = vsel %vm1022_vm0, %v7438_v58, 0.0 }
 0x6eb   : > { %3468 = vadd.xlane.f32.xlu1 %v3467_v61 }
 0x770   : > { %v3466_v62 = vpop.xlane.xlu0 %3465 }
 0x771   : > { %v3470_v0 = vmul.f32 0.03125, %v3466_v62 }
 0x773   : > { %v3472_v1 = vsub.f32 %v7433_v4, %v3470_v0 }
 0x774   : > { %v3469_v11 = vpop.xlane.xlu1 %3468 }
 0x775   : > { %v3471_v15 = vmul.f32 0.03125, %v3469_v11  ;;  %v3474_v6 = vmul.f32 %v3472_v1, %v3472_v1 }
 0x777   : > { %v3473_v8 = vsub.f32 %v7438_v58, %v3471_v15  ;;  %v3476_v34 = vsel %vm1022_vm0, %v3474_v6, 0.0 }
 0x778   : > { %3477 = vadd.xlane.f32.xlu0 %v3476_v34 }
 0x779   : > { %v3475_v23 = vmul.f32 %v3473_v8, %v3473_v8 }
 0x77b   : > { %v3479_v50 = vsel %vm1022_vm0, %v3475_v23, 0.0 }
 0x77c   : > { %3480 = vadd.xlane.f32.xlu1 %v3479_v50 }
 0x78d   : > { %1955 = vrot.lane.b32.xlu1 %v7082_v14, %s6580_s2 }
 0x78e   : > { %1952 = vrot.lane.b32.xlu0 %v7082_v14, %s6581_s9 }
 0x791   : > { %1958 = vrot.lane.b32.xlu1 %v7082_v14, %s6582_s12 }
 0x801   : > { %v3478_v37 = vpop.xlane.xlu0 %3477 }
 0x802   : > { %v3482_v7 = vmul.f32 0.03125, %v3478_v37 }
 0x804   : > { %v3484_v9 = vadd.f32 1e-05, %v3482_v7 }
 0x805   : > { %v3481_v18 = vpop.xlane.xlu1 %3480  ;;  %v1953_v24 = vpop.permute.xlu0 %1952 }
 0x806   : > { %5939 = vrsqrt.f32 %v3484_v9  ;;  %v3483_v16 = vmul.f32 0.03125, %v3481_v18 }
 0x808   : > { %v3485_v19 = vadd.f32 1e-05, %v3483_v16 }
 0x809   : > { %v1956_v20 = vpop.permute.xlu1 %1955 }
 0x80a   : > { %5941 = vrsqrt.f32 %v3485_v19  ;;  %v1961_v21 = vcombine.low %v7082_v14, %v1956_v20  ;;  %v1962_v22 = vcombine.high %v7082_v14, %v1956_v20 }
 0x80c   : > { %v1969_v28 = vrot.slane %v1961_v21, %v7119_v36  ;;  %v1976_v31 = vrot.slane %v1962_v22, %v7119_v36 }
 0x80d   : > { %v1959_v25 = vpop.permute.xlu1 %1958 }
 0x80e   : > { %v1977_v26 = vcombine.low %v1953_v24, %v1959_v25  ;;  %v1978_v27 = vcombine.high %v1953_v24, %v1959_v25 }
 0x810   : > { %v1985_v33 = vrot.slane %v1977_v26, %v7119_v36  ;;  %v1992_v10 = vrot.slane %v1978_v27, %v7119_v36 }
 0x812   : > { %v1993_v38 = vcombine.low %v1969_v28, %v1985_v33  ;;  %v1994_v39 = vcombine.high %v1969_v28, %v1985_v33  ;;  %v2009_v12 = vcombine.low %v1976_v31, %v1992_v10  ;;  %v2010_v41 = vcombine.high %v1976_v31, %v1992_v10 }
 0x813   : > { %v5940_v42 = vpop.eup %5939 }
 0x814   : > { %v3488_v44 = vmul.f32 %v5940_v42, %v3472_v1  ;;  %v2001_v14 = vrot.slane %v1993_v38, %v7124_v43  ;;  %v2008_v45 = vrot.slane %v1994_v39, %v7124_v43  ;;  %v2017_v46 = vrot.slane %v2009_v12, %v7124_v43 }
 0x815   : > { %v2024_v47 = vrot.slane %v2010_v41, %v7124_v43 }
 0x816   : > { %v2029_v40 = vcombine.low %v2001_v14, %v2008_v45  ;;  %v5239_v53 = vcombine.high %v2001_v14, %v2008_v45  ;;  %v3496_v3 = vmul.f32 %v5273_v48, %v3488_v44 }
 0x817   : > { %v5942_v55 = vpop.eup %5941  ;;  %v2045_v56 = vcombine.low %v2017_v46, %v2024_v47  ;;  %v5240_v59 = vcombine.high %v2017_v46, %v2024_v47 }
 0x818   : > { %v3489_v60 = vmul.f32 %v5942_v55, %v3473_v8  ;;  %v2036_v63 = vrot.slane %v2029_v40, %v7119_v36  ;;  %v2044_v2 = vrot.slane %v5239_v53, %v7119_v36  ;;  %v3504_v1 = vadd.f32 %v5274_v52, %v3496_v3 }
 0x819   : > { %v2052_v49 = vrot.slane %v2045_v56, %v7119_v36  ;;  %v2060_v51 = vrot.slane %v5240_v59, %v7119_v36 }
 0x81a   : > { %v2061_v54 = vcombine.low %v2036_v63, %v2044_v2  ;;  %v2062_v5 = vcombine.high %v2036_v63, %v2044_v2  ;;  %v3497_v13 = vmul.f32 %v5273_v48, %v3489_v60 }
 0x81b   : > { %v2077_v57 = vcombine.low %v2052_v49, %v2060_v51  ;;  %v2078_v61 = vcombine.high %v2052_v49, %v2060_v51 }
 0x81c   : > { %v2069_v62 = vrot.slane %v2061_v54, %v7124_v43  ;;  %v2076_v0 = vrot.slane %v2062_v5, %v7124_v43  ;;  %v3505_v11 = vadd.f32 %v5274_v52, %v3497_v13 }
 0x81d   : > { %v2085_v15 = vrot.slane %v2077_v57, %v7124_v43  ;;  %v2092_v6 = vrot.slane %v2078_v61, %v7124_v43 }
 0x81e   : > { %v3506_v8 = vpack.c.bf16 %v3505_v11, %v3504_v1 }
 0x81f   : > { %v2093_v34 = vcombine.low %v2069_v62, %v2085_v15  ;;  %v2094_v23 = vcombine.high %v2069_v62, %v2085_v15  ;;  %v2095_v50 = vcombine.low %v2076_v0, %v2092_v6  ;;  %v2096_v17 = vcombine.high %v2076_v0, %v2092_v6 }
 0x820   : > { %5521 = vmatmul.mubr.msk.bf16.vlgmr.msra.gmra.mxu1 %vm1022_vm0, %v3506_v8 }
 0x821   : > { %v2097_v30 = vpack.c.bf16 %v2093_v34, %v2093_v34  ;;  %v2098_v37 = vpack.c.bf16 %v2094_v23, %v2094_v23  ;;  %v2099_v7 = vpack.c.bf16 %v2095_v50, %v2095_v50  ;;  %v2100_v9 = vpack.c.bf16 %v2096_v17, %v2096_v17  ;;  %5532 = vmatprep.mubr.msk.bf16.mxu1 %vm6579_vm1, %v6578_v29 }
 0x823   : > { %2101 = vst.msk [vmem:[#allocation4] sm:$0xf] %vm1508_vm3, %v2097_v30  ;;  %2102 = vst.msk [vmem:[#allocation4 + $0x4] sm:$0xf] %vm1508_vm3, %v2098_v37 }
 0x824   : > { %2103 = vst.msk [vmem:[#allocation4 + $0x8] sm:$0xf] %vm1508_vm3, %v2099_v7  ;;  %2104 = vst.msk [vmem:[#allocation4 + $0xc] sm:$0xf] %vm1508_vm3, %v2100_v9 }
 0x82a   : > { %v3870_v18 = vld [vmem:[#allocation4] sm:$0xf]  ;;  %v3871_v16 = vld [vmem:[#allocation4 + $0x4] sm:$0xf] }
 0x82b   : > { %v3882_v19 = vsel %vm2692_vm4, %v3870_v18, 0  ;;  %v3929_v20 = vsel %vm2692_vm4, %v3871_v16, 0 }
 0x82c   : > { %5525 = vmatpush3.bf16.xpose.msra.mxu0 %v3882_v19  ;;  %5531 = vmatpush3.bf16.xpose.msra.mxu1 %v3929_v20 }
 0x82d   : > { %5536 = vmatprep.subr.bf16.mxu0 %v6578_v29  ;;  %5542 = vmatprep.subr.bf16.mxu1 %v6578_v29 }
 0x8e0   : > { %v3560_v21 = vpop.f32.mrf.mxu1 }
 0x8e1   : > { %v3567_v22 = vmul.f32 0.35355338, %v3560_v21 }
 0x8e2   : > { %v5522_v24 = vpop.f32.mrf.mxu1 }
 0x8e3   : > { %3571 = vrot.lane.b32.xlu1 %v3567_v22, %s6581_s9 }
 0x8e4   : > { %v3563_v25 = vpop.f32.mrf.mxu1 }
 0x8e5   : > { %v3568_v26 = vmul.f32 0.35355338, %v3563_v25 }
 0x8e6   : > { %v5523_v27 = vpop.f32.mrf.mxu1 }
 0x8e7   : > { %3577 = vrot.lane.b32.xlu1 %v3567_v22, %s6580_s2  ;;  %3573 = vrot.lane.b32.xlu0 %v3568_v26, %s6581_s9 }
 0x8eb   : > { %3583 = vrot.lane.b32.xlu1 %v3567_v22, %s6582_s12  ;;  %3579 = vrot.lane.b32.xlu0 %v3568_v26, %s6580_s2 }
 0x8ef   : > { %2109 = vrot.lane.b32.xlu1 %v7316_v35, %s6580_s2  ;;  %3585 = vrot.lane.b32.xlu0 %v3568_v26, %s6582_s12  ;;  %s7897_s2 = sld [smem:[#allocation64_spill]] }
 0x8f3   : > { %2112 = vrot.lane.b32.xlu1 %v7316_v35, %s6582_s12  ;;  %2106 = vrot.lane.b32.xlu0 %v7316_v35, %s6581_s9  ;;  %s6445_s12 = scalar_lea.vmem %s7758_s25, 256 }
 0x8f4   : > { %p6446_p11 = scmp.ne.s32.totalorder %s7758_s25, %s6445_s12 }
 0x8f5   : > { %s7756_s9 = scalar_lea.hbm %s7897_s2, %s5334_s26 }
 0x8f6   : > { %p6447_p7 = pnand %p6446_p11, %p6934_p4 }
 0x8f8   : > { %p6448_p10 = pneg %p6447_p7 }
 0x955   : > { %v3572_v28 = vpop.permute.xlu1 %3571 }
 0x959   : > { %v3574_v31 = vpop.permute.xlu0 %3573  ;;  %v3578_v33 = vpop.permute.xlu1 %3577 }
 0x95a   : > { %v3589_v10 = vcombine.low %v3567_v22, %v3578_v33  ;;  %v3590_v38 = vcombine.high %v3567_v22, %v3578_v33 }
 0x95c   : > { %v3597_v44 = vrot.slane %v3589_v10, %v7119_v36  ;;  %v3604_v14 = vrot.slane %v3590_v38, %v7119_v36 }
 0x95d   : > { %v3580_v39 = vpop.permute.xlu0 %3579  ;;  %v3584_v12 = vpop.permute.xlu1 %3583 }
 0x95e   : > { %v3605_v41 = vcombine.low %v3572_v28, %v3584_v12  ;;  %v3606_v42 = vcombine.high %v3572_v28, %v3584_v12  ;;  %v3657_v47 = vcombine.low %v3568_v26, %v3580_v39  ;;  %v3658_v48 = vcombine.high %v3568_v26, %v3580_v39 }
 0x960   : > { %v3613_v45 = vrot.slane %v3605_v41, %v7119_v36  ;;  %v3620_v46 = vrot.slane %v3606_v42, %v7119_v36  ;;  %v3665_v52 = vrot.slane %v3657_v47, %v7119_v36  ;;  %v3672_v54 = vrot.slane %v3658_v48, %v7119_v36 }
 0x961   : > { %v3586_v40 = vpop.permute.xlu0 %3585  ;;  %v2110_v57 = vpop.permute.xlu1 %2109 }
 0x962   : > { %v3621_v53 = vcombine.low %v3597_v44, %v3613_v45  ;;  %v3622_v55 = vcombine.high %v3597_v44, %v3613_v45  ;;  %v3637_v56 = vcombine.low %v3604_v14, %v3620_v46  ;;  %v3638_v59 = vcombine.high %v3604_v14, %v3620_v46 }
 0x963   : > { %v3673_v60 = vcombine.low %v3574_v31, %v3586_v40  ;;  %v3674_v63 = vcombine.high %v3574_v31, %v3586_v40  ;;  %v2115_v19 = vcombine.low %v7316_v35, %v2110_v57  ;;  %v2116_v20 = vcombine.high %v7316_v35, %v2110_v57 }
 0x964   : > { %v3629_v2 = vrot.slane %v3621_v53, %v7124_v43  ;;  %v3636_v3 = vrot.slane %v3622_v55, %v7124_v43  ;;  %v3645_v49 = vrot.slane %v3637_v56, %v7124_v43  ;;  %v3652_v51 = vrot.slane %v3638_v59, %v7124_v43 }
 0x965   : > { %v3681_v5 = vrot.slane %v3673_v60, %v7119_v36  ;;  %v3688_v13 = vrot.slane %v3674_v63, %v7119_v36  ;;  %v2107_v26 = vpop.permute.xlu0 %2106  ;;  %v2113_v27 = vpop.permute.xlu1 %2112  ;;  %v2123_v38 = vrot.slane %v2115_v19, %v7119_v36  ;;  %v2130_v39 = vrot.slane %v2116_v20, %v7119_v36 }
 0x966   : > { %v3725_v61 = vcombine.low %v3629_v2, %v3636_v3  ;;  %v5278_v62 = vcombine.high %v3629_v2, %v3636_v3  ;;  %v3741_v0 = vcombine.low %v3645_v49, %v3652_v51  ;;  %v5279_v1 = vcombine.high %v3645_v49, %v3652_v51 }
 0x967   : > { %v3689_v11 = vcombine.low %v3665_v52, %v3681_v5  ;;  %v3690_v15 = vcombine.high %v3665_v52, %v3681_v5  ;;  %v3705_v6 = vcombine.low %v3672_v54, %v3688_v13  ;;  %v3706_v8 = vcombine.high %v3672_v54, %v3688_v13 }
 0x968   : > { %v3732_v34 = vrot.slane %v3725_v61, %v7119_v36  ;;  %v3740_v23 = vrot.slane %v5278_v62, %v7119_v36  ;;  %v3748_v50 = vrot.slane %v3741_v0, %v7119_v36  ;;  %v3756_v17 = vrot.slane %v5279_v1, %v7119_v36  ;;  %v3872_v61 = vld [vmem:[#allocation4 + $0x8] sm:$0xf]  ;;  %v3873_v62 = vld [vmem:[#allocation4 + $0xc] sm:$0xf] }
 0x969   : > { %v3697_v30 = vrot.slane %v3689_v11, %v7124_v43  ;;  %v3704_v37 = vrot.slane %v3690_v15, %v7124_v43  ;;  %v3713_v7 = vrot.slane %v3705_v6, %v7124_v43  ;;  %v3720_v9 = vrot.slane %v3706_v8, %v7124_v43 }
 0x96a   : > { %v3757_v18 = vcombine.low %v3732_v34, %v3740_v23  ;;  %v3773_v16 = vcombine.low %v3748_v50, %v3756_v17  ;;  %v2131_v12 = vcombine.low %v2107_v26, %v2113_v27  ;;  %v2132_v35 = vcombine.high %v2107_v26, %v2113_v27 }
 0x96b   : > { %v3793_v21 = vcombine.low %v3697_v30, %v3704_v37  ;;  %v5280_v22 = vcombine.high %v3697_v30, %v3704_v37  ;;  %v3809_v24 = vcombine.low %v3713_v7, %v3720_v9  ;;  %v5281_v25 = vcombine.high %v3713_v7, %v3720_v9 }
 0x96c   : > { %v3765_v41 = vrot.slane %v3757_v18, %v7124_v43  ;;  %v3781_v42 = vrot.slane %v3773_v16, %v7124_v43  ;;  %v3758_v45 = vcombine.high %v3732_v34, %v3740_v23  ;;  %v3774_v46 = vcombine.high %v3748_v50, %v3756_v17 }
 0x96d   : > { %v3800_v28 = vrot.slane %v3793_v21, %v7119_v36  ;;  %v3808_v31 = vrot.slane %v5280_v22, %v7119_v36  ;;  %v3816_v33 = vrot.slane %v3809_v24, %v7119_v36  ;;  %v3824_v10 = vrot.slane %v5281_v25, %v7119_v36 }
 0x96e   : > { %v2139_v47 = vrot.slane %v2131_v12, %v7119_v36  ;;  %v2146_v48 = vrot.slane %v2132_v35, %v7119_v36  ;;  %v3789_v3 = vcombine.low %v3765_v41, %v3781_v42  ;;  %v3790_v51 = vcombine.high %v3765_v41, %v3781_v42 }
 0x96f   : > { %v3825_v44 = vcombine.low %v3800_v28, %v3808_v31  ;;  %v3841_v14 = vcombine.low %v3816_v33, %v3824_v10  ;;  %v3826_v40 = vcombine.high %v3800_v28, %v3808_v31  ;;  %v3842_v55 = vcombine.high %v3816_v33, %v3824_v10 }
 0x970   : > { %v2147_v59 = vcombine.low %v2123_v38, %v2139_v47  ;;  %v2148_v60 = vcombine.high %v2123_v38, %v2139_v47  ;;  %v2163_v63 = vcombine.low %v2130_v39, %v2146_v48  ;;  %v2164_v2 = vcombine.high %v2130_v39, %v2146_v48 }
 0x971   : > { %v3833_v53 = vrot.slane %v3825_v44, %v7124_v43  ;;  %v3849_v56 = vrot.slane %v3841_v14, %v7124_v43  ;;  %v3840_v0 = vrot.slane %v3826_v40, %v7124_v43  ;;  %v3856_v1 = vrot.slane %v3842_v55, %v7124_v43 }
 0x972   : > { %v2155_v54 = vrot.slane %v2147_v59, %v7124_v43  ;;  %v2162_v5 = vrot.slane %v2148_v60, %v7124_v43  ;;  %v2171_v13 = vrot.slane %v2163_v63, %v7124_v43  ;;  %v2178_v57 = vrot.slane %v2164_v2, %v7124_v43 }
 0x973   : > { %v3857_v49 = vcombine.low %v3833_v53, %v3849_v56  ;;  %v3858_v52 = vcombine.high %v3833_v53, %v3849_v56  ;;  %v3772_v50 = vrot.slane %v3758_v45, %v7124_v43  ;;  %v3788_v17 = vrot.slane %v3774_v46, %v7124_v43 }
 0x974   : > { %v2183_v6 = vcombine.low %v2155_v54, %v2162_v5  ;;  %v5241_v8 = vcombine.high %v2155_v54, %v2162_v5  ;;  %v2199_v34 = vcombine.low %v2171_v13, %v2178_v57  ;;  %v5242_v23 = vcombine.high %v2171_v13, %v2178_v57 }
 0x975   : > { %v3866_v11 = vpack.c.bf16 %v3857_v49, %v3789_v3  ;;  %v3867_v15 = vpack.c.bf16 %v3858_v52, %v3790_v51  ;;  %v3976_v30 = vsel %vm2692_vm4, %v3872_v61, 0  ;;  %v4023_v37 = vsel %vm2692_vm4, %v3873_v62, 0 }
 0x976   : > { %v2190_v7 = vrot.slane %v2183_v6, %v7119_v36  ;;  %v2198_v9 = vrot.slane %v5241_v8, %v7119_v36  ;;  %v2206_v18 = vrot.slane %v2199_v34, %v7119_v36  ;;  %v2214_v16 = vrot.slane %v5242_v23, %v7119_v36 }
 0x977   : > { %5527 = vmatmul.mubr.msk.bf16.vlgmr.msra.gmra.mxu0 %vm2692_vm4, %v3866_v11  ;;  %5533 = vmatmul.mubr.msk.bf16.vlgmr.msra.gmra.mxu1 %vm2692_vm4, %v3867_v15  ;;  %v3859_v19 = vcombine.low %v3840_v0, %v3856_v1  ;;  %v3860_v20 = vcombine.high %v3840_v0, %v3856_v1  ;;  %v3791_v26 = vcombine.low %v3772_v50, %v3788_v17 }
 0x978   : > { %5537 = vmatpush3.bf16.xpose.msra.mxu0 %v3976_v30  ;;  %5543 = vmatpush3.bf16.xpose.msra.mxu1 %v4023_v37  ;;  %v2215_v21 = vcombine.low %v2190_v7, %v2198_v9  ;;  %v2216_v22 = vcombine.high %v2190_v7, %v2198_v9  ;;  %v2231_v24 = vcombine.low %v2206_v18, %v2214_v16 }
 0x979   : > { %5538 = vmatprep.mubr.msk.bf16.mxu0 %vm6579_vm1, %v6578_v29  ;;  %v2232_v25 = vcombine.high %v2206_v18, %v2214_v16  ;;  %5544 = vmatprep.mubr.msk.bf16.mxu1 %vm6579_vm1, %v6578_v29  ;;  %v3792_v27 = vcombine.high %v3772_v50, %v3788_v17  ;;  %v3868_v10 = vpack.c.bf16 %v3859_v19, %v3791_v26 }
 0x97a   : > { %5548 = vmatprep.subr.bf16.mxu0 %v6578_v29  ;;  %5554 = vmatprep.subr.bf16.mxu1 %v6578_v29  ;;  %v2223_v36 = vrot.slane %v2215_v21, %v7124_v43  ;;  %v2230_v28 = vrot.slane %v2216_v22, %v7124_v43  ;;  %v2239_v31 = vrot.slane %v2231_v24, %v7124_v43 }
 0x97b   : > { %v2246_v33 = vrot.slane %v2232_v25, %v7124_v43  ;;  %v3869_v38 = vpack.c.bf16 %v3860_v20, %v3792_v27 }
 0x97c   : > { %v2247_v39 = vcombine.low %v2223_v36, %v2239_v31  ;;  %v2248_v12 = vcombine.high %v2223_v36, %v2239_v31 }
 0x97d   : > { %v2249_v35 = vcombine.low %v2230_v28, %v2246_v33  ;;  %v2250_v41 = vcombine.high %v2230_v28, %v2246_v33 }
 0x97e   : > { %v2251_v42 = vpack.c.bf16 %v2247_v39, %v2247_v39  ;;  %v2252_v44 = vpack.c.bf16 %v2248_v12, %v2248_v12 }
 0x97f   : > { %5539 = vmatmul.mubr.msk.bf16.vlgmr.msra.gmra.mxu0 %vm2692_vm4, %v3868_v10  ;;  %v2253_v14 = vpack.c.bf16 %v2249_v35, %v2249_v35  ;;  %v2254_v45 = vpack.c.bf16 %v2250_v41, %v2250_v41  ;;  %5545 = vmatmul.mubr.msk.bf16.vlgmr.msra.gmra.mxu1 %vm2692_vm4, %v3869_v38 }
 0x980   : > { %5550 = vmatprep.mubr.msk.bf16.mxu0 %vm6579_vm1, %v6578_v29  ;;  %5556 = vmatprep.mubr.msk.bf16.mxu1 %vm6579_vm1, %v6578_v29  ;;  %2255 = vst.msk [vmem:[#allocation5] sm:$0xf] %vm1508_vm3, %v2251_v42  ;;  %2256 = vst.msk [vmem:[#allocation5 + $0x4] sm:$0xf] %vm1508_vm3, %v2252_v44 }
 0x981   : > { %2257 = vst.msk [vmem:[#allocation5 + $0x8] sm:$0xf] %vm1508_vm3, %v2253_v14  ;;  %2258 = vst.msk [vmem:[#allocation5 + $0xc] sm:$0xf] %vm1508_vm3, %v2254_v45 }
 0x987   : > { %v3874_v43 = vld [vmem:[#allocation5] sm:$0xf]  ;;  %v3875_v46 = vld [vmem:[#allocation5 + $0x4] sm:$0xf] }
 0x988   : > { %v4194_v47 = vsel %vm3252_vm5, %v3874_v43, 0  ;;  %v4241_v48 = vsel %vm3252_vm5, %v3875_v46, 0 }
 0x989   : > { %5549 = vmatpush3.bf16.msra.mxu0 %v4194_v47  ;;  %5555 = vmatpush3.bf16.msra.mxu1 %v4241_v48 }
 0x98a   : > { %5560 = vmatprep.subr.bf16.mxu0 %v6578_v29  ;;  %5566 = vmatprep.subr.bf16.mxu1 %v6578_v29 }
 0xa37   : > { %v3918_v40 = vpop.f32.mrf.mxu0  ;;  %v3965_v53 = vpop.f32.mrf.mxu1 }
 0xa38   : > { %v4072_v55 = vsel %vm2692_vm4, %v3965_v53, -inf  ;;  %v4066_v56 = vsel %vm2692_vm4, %v3918_v40, -inf }
 0xa39   : > { %4073 = vmax.xlane.f32.xlu0 %v4072_v55  ;;  %v5534_v59 = vpop.f32.mrf.mxu1  ;;  %4067 = vmax.xlane.f32.xlu1 %v4066_v56  ;;  %v5528_v60 = vpop.f32.mrf.mxu0 }
 0xa3a   : > { %v3876_v59 = vld [vmem:[#allocation5 + $0x8] sm:$0xf] }
 0xa3b   : > { %v3921_v63 = vpop.f32.mrf.mxu0  ;;  %v3968_v2 = vpop.f32.mrf.mxu1 }
 0xa3c   : > { %v4075_v3 = vsel %vm2692_vm4, %v3968_v2, -inf  ;;  %v4069_v49 = vsel %vm2692_vm4, %v3921_v63, -inf }
 0xa3d   : > { %v5535_v51 = vpop.f32.mrf.mxu1  ;;  %4076 = vmax.xlane.f32.xlu1 %v4075_v3  ;;  %4070 = vmax.xlane.f32.xlu0 %v4069_v49  ;;  %v5529_v52 = vpop.f32.mrf.mxu0  ;;  %v4288_v49 = vsel %vm3252_vm5, %v3876_v59, 0 }
 0xa3f   : > { %v4012_v54 = vpop.f32.mrf.mxu0  ;;  %v4059_v5 = vpop.f32.mrf.mxu1 }
 0xa40   : > { %v4078_v13 = vsel %vm2692_vm4, %v4012_v54, -inf  ;;  %v4084_v8 = vsel %vm2692_vm4, %v4059_v5, -inf }
 0xa41   : > { %4079 = vmax.xlane.f32.xlu0 %v4078_v13  ;;  %v5540_v57 = vpop.f32.mrf.mxu0  ;;  %v5546_v61 = vpop.f32.mrf.mxu1 }
 0xa43   : > { %v4015_v62 = vpop.f32.mrf.mxu0  ;;  %v4062_v0 = vpop.f32.mrf.mxu1 }
 0xa44   : > { %v4081_v1 = vsel %vm2692_vm4, %v4015_v62, -inf  ;;  %v4087_v11 = vsel %vm2692_vm4, %v4062_v0, -inf }
 0xa45   : > { %4082 = vmax.xlane.f32.xlu0 %v4081_v1  ;;  %v5541_v15 = vpop.f32.mrf.mxu0  ;;  %v5547_v6 = vpop.f32.mrf.mxu1  ;;  %4088 = vmax.xlane.f32.xlu1 %v4087_v11  ;;  %v3861_v11 = vld [vmem:[#allocation27] sm:$0xf] }
 0xa46   : > { %v3862_v15 = vld [vmem:[#allocation27 + $0x4] sm:$0xf]  ;;  %v4410_v6 = vsel %vm3252_vm5, %v3861_v11, 0 }
 0xa49   : > { %4085 = vmax.xlane.f32.xlu0 %v4084_v8  ;;  %v4457_v8 = vsel %vm3252_vm5, %v3862_v15, 0 }
 0xac2   : > { %v7577_v34 = vpop.xlane.xlu0 %4073  ;;  %v7579_v23 = vpop.xlane.xlu1 %4067 }
 0xac3   : > { %v4092_v50 = vmax.f32 %v7577_v34, -1e+30  ;;  %v4090_v17 = vmax.f32 %v7579_v23, -1e+30 }
 0xac5   : > { %v4122_v30 = vsub.f32 %v3918_v40, %v4090_v17  ;;  %v4124_v37 = vsub.f32 %v3965_v53, %v4092_v50  ;;  %v3877_v40 = vld [vmem:[#allocation5 + $0xc] sm:$0xf] }
 0xac6   : > { %v7587_v7 = vpop.xlane.xlu1 %4076  ;;  %v7589_v9 = vpop.xlane.xlu0 %4070 }
 0xac7   : > { %v4130_v18 = vmul.f32 1.442695, %v4122_v30  ;;  %v4093_v16 = vmax.f32 %v7587_v7, -1e+30  ;;  %v4091_v19 = vmax.f32 %v7589_v9, -1e+30 }
 0xac8   : > { %v4134_v20 = vmul.f32 1.442695, %v4124_v37  ;;  %v4100_v30 = vsub.f32 -1e+30, %v4092_v50 }
 0xac9   : > { %v4125_v21 = vsub.f32 %v3968_v2, %v4093_v16  ;;  %v4123_v24 = vsub.f32 %v3921_v63, %v4091_v19  ;;  %5943 = vpow2.f32 %v4130_v18  ;;  %v4335_v2 = vsel %vm3252_vm5, %v3877_v40, 0 }
 0xaca   : > { %v7595_v22 = vpop.xlane.xlu0 %4079  ;;  %5945 = vpow2.f32 %v4134_v20  ;;  %v4101_v37 = vsub.f32 -1e+30, %v4093_v16  ;;  %v4098_v18 = vsub.f32 -1e+30, %v4090_v17  ;;  %v4099_v20 = vsub.f32 -1e+30, %v4091_v19 }
 0xacb   : > { %v4094_v25 = vmax.f32 %v7595_v22, -1e+30  ;;  %v4136_v26 = vmul.f32 1.442695, %v4125_v21  ;;  %v4132_v27 = vmul.f32 1.442695, %v4123_v24 }
 0xacc   : > { %v4110_v21 = vmul.f32 1.442695, %v4100_v30  ;;  %v4112_v24 = vmul.f32 1.442695, %v4101_v37  ;;  %v3864_v30 = vld [vmem:[#allocation27 + $0xc] sm:$0xf] }
 0xacd   : > { %v4126_v36 = vsub.f32 %v4012_v54, %v4094_v25  ;;  %5947 = vpow2.f32 %v4136_v26  ;;  %v4106_v26 = vmul.f32 1.442695, %v4098_v18 }
 0xace   : > { %v7602_v28 = vpop.xlane.xlu0 %4082  ;;  %v7604_v33 = vpop.xlane.xlu1 %4088  ;;  %5949 = vpow2.f32 %v4132_v27  ;;  %v4108_v27 = vmul.f32 1.442695, %v4099_v20 }
 0xacf   : > { %v4138_v31 = vmul.f32 1.442695, %v4126_v36  ;;  %v4095_v10 = vmax.f32 %v7602_v28, -1e+30  ;;  %v4097_v38 = vmax.f32 %v7604_v33, -1e+30 }
 0xad0   : > { %v4102_v36 = vsub.f32 -1e+30, %v4094_v25 }
 0xad1   : > { %v4127_v39 = vsub.f32 %v4015_v62, %v4095_v10  ;;  %v4129_v12 = vsub.f32 %v4062_v0, %v4097_v38  ;;  %5951 = vpow2.f32 %v4138_v31  ;;  %v4103_v34 = vsub.f32 -1e+30, %v4095_v10 }
 0xad2   : > { %v7612_v35 = vpop.xlane.xlu0 %4085  ;;  %v4105_v50 = vsub.f32 -1e+30, %v4097_v38  ;;  %v4114_v17 = vmul.f32 1.442695, %v4102_v36 }
 0xad3   : > { %v4096_v41 = vmax.f32 %v7612_v35, -1e+30  ;;  %v4140_v42 = vmul.f32 1.442695, %v4127_v39  ;;  %v4144_v44 = vmul.f32 1.442695, %v4129_v12 }
 0xad4   : > { %v4116_v7 = vmul.f32 1.442695, %v4103_v34  ;;  %v4120_v16 = vmul.f32 1.442695, %v4105_v50  ;;  %v4551_v50 = vsel %vm3252_vm5, %v3864_v30, 0 }
 0xad5   : > { %v4128_v14 = vsub.f32 %v4059_v5, %v4096_v41  ;;  %5953 = vpow2.f32 %v4140_v42  ;;  %v4104_v23 = vsub.f32 -1e+30, %v4096_v41 }
 0xad6   : > { %v5944_v43 = vpop.eup %5943  ;;  %5955 = vpow2.f32 %v4144_v44 }
 0xad7   : > { %v4142_v45 = vmul.f32 1.442695, %v4128_v14  ;;  %v4154_v46 = vsel %vm2692_vm4, %v5944_v43, 0.0  ;;  %v5946_v47 = vpop.eup %5945  ;;  %v4118_v9 = vmul.f32 1.442695, %v4104_v23 }
 0xad8   : > { %4155 = vadd.xlane.f32.xlu0 %v4154_v46  ;;  %v4160_v56 = vsel %vm2692_vm4, %v5946_v47, 0.0 }
 0xad9   : > { %5957 = vpow2.f32 %v4142_v45 }
 0xada   : > { %v5948_v48 = vpop.eup %5947  ;;  %5959 = vpow2.f32 %v4110_v21 }
 0xadb   : > { %v4187_v53 = vpack.c.bf16 %v5948_v48, %v5946_v47  ;;  %v5950_v55 = vpop.eup %5949  ;;  %v4163_v52 = vsel %vm2692_vm4, %v5948_v48, 0.0  ;;  %5961 = vpow2.f32 %v4112_v24 }
 0xadc   : > { %v4157_v60 = vsel %vm2692_vm4, %v5950_v55, 0.0  ;;  %4161 = vadd.xlane.f32.xlu0 %v4160_v56  ;;  %v4186_v63 = vpack.c.bf16 %v5950_v55, %v5944_v43  ;;  %5963 = vpow2.f32 %v4106_v26 }
 0xadd   : > { %5557 = vmatmul.mubr.msk.bf16.vlgmr.msra.gmra.mxu1 %vm2692_vm4, %v4187_v53  ;;  %4158 = vadd.xlane.f32.xlu1 %v4157_v60  ;;  %5965 = vpow2.f32 %v4108_v27  ;;  %v3863_v27 = vld [vmem:[#allocation27 + $0x8] sm:$0xf] }
 0xade   : > { %v5952_v3 = vpop.eup %5951  ;;  %5567 = vmatpush3.bf16.msra.mxu1 %v4335_v2  ;;  %5551 = vmatmul.mubr.msk.bf16.vlgmr.msra.gmra.mxu0 %vm2692_vm4, %v4186_v63  ;;  %5967 = vpow2.f32 %v4114_v17 }
 0xadf   : > { %v4166_v51 = vsel %vm2692_vm4, %v5952_v3, 0.0  ;;  %5568 = vmatprep.mubr.msk.bf16.mxu1 %vm6579_vm1, %v6578_v29  ;;  %5561 = vmatpush3.bf16.msra.mxu0 %v4288_v49  ;;  %5969 = vpow2.f32 %v4116_v7 }
 0xae0   : > { %5562 = vmatprep.mubr.msk.bf16.mxu0 %vm6579_vm1, %v6578_v29  ;;  %4167 = vadd.xlane.f32.xlu0 %v4166_v51  ;;  %5971 = vpow2.f32 %v4118_v9 }
 0xae1   : > { %5572 = vmatprep.subr.bf16.mxu0 %v6578_v29  ;;  %4164 = vadd.xlane.f32.xlu1 %v4163_v52  ;;  %5973 = vpow2.f32 %v4120_v16  ;;  %v4504_v16 = vsel %vm3252_vm5, %v3863_v27, 0 }
 0xae2   : > { %5578 = vmatprep.subr.bf16.mxu1 %v6578_v29  ;;  %v5954_v54 = vpop.eup %5953 }
 0xae3   : > { %v5956_v5 = vpop.eup %5955  ;;  %v4169_v13 = vsel %vm2692_vm4, %v5954_v54, 0.0  ;;  %v4188_v57 = vpack.c.bf16 %v5954_v54, %v5952_v3 }
 0xae4   : > { %v4175_v1 = vsel %vm2692_vm4, %v5956_v5, 0.0 }
 0xae5   : > { %4170 = vadd.xlane.f32.xlu1 %v4169_v13 }
 0xae6   : > { %v5958_v61 = vpop.eup %5957  ;;  %5563 = vmatmul.mubr.msk.bf16.vlgmr.msra.gmra.mxu0 %vm2692_vm4, %v4188_v57 }
 0xae7   : > { %v4172_v62 = vsel %vm2692_vm4, %v5958_v61, 0.0  ;;  %v4189_v0 = vpack.c.bf16 %v5956_v5, %v5958_v61  ;;  %5574 = vmatprep.mubr.msk.bf16.mxu0 %vm6579_vm1, %v6578_v29  ;;  %5573 = vmatpush3.bf16.msra.mxu0 %v4410_v6  ;;  %v5960_v22 = vpop.eup %5959 }
 0xae8   : > { %4173 = vadd.xlane.f32.xlu0 %v4172_v62  ;;  %5584 = vmatprep.subr.bf16.mxu0 %v6578_v29  ;;  %v5962_v25 = vpop.eup %5961  ;;  %v4148_v35 = vmul.f32 0.0, %v5960_v22 }
 0xae9   : > { %5569 = vmatmul.mubr.msk.bf16.vlgmr.msra.gmra.mxu1 %vm2692_vm4, %v4189_v0  ;;  %4176 = vadd.xlane.f32.xlu1 %v4175_v1  ;;  %v5964_v28 = vpop.eup %5963  ;;  %v4149_v41 = vmul.f32 0.0, %v5962_v25 }
 0xaea   : > { %5580 = vmatprep.mubr.msk.bf16.mxu1 %vm6579_vm1, %v6578_v29  ;;  %5579 = vmatpush3.bf16.msra.mxu1 %v4457_v8  ;;  %v5966_v12 = vpop.eup %5965  ;;  %v4146_v33 = vmul.f32 0.0, %v5964_v28 }
 0xaeb   : > { %5590 = vmatprep.subr.bf16.mxu1 %v6578_v29  ;;  %v4147_v42 = vmul.f32 0.0, %v5966_v12  ;;  %v5968_v46 = vpop.eup %5967 }
 0xaec   : > { %v5970_v48 = vpop.eup %5969  ;;  %v4150_v55 = vmul.f32 0.0, %v5968_v46 }
 0xaed   : > { %v5972_v40 = vpop.eup %5971  ;;  %v4151_v56 = vmul.f32 0.0, %v5970_v48 }
 0xaee   : > { %v5974_v53 = vpop.eup %5973  ;;  %v4152_v2 = vmul.f32 0.0, %v5972_v40 }
 0xaef   : > { %v4153_v49 = vmul.f32 0.0, %v5974_v53 }
 0xb61   : > { %v4156_v19 = vpop.xlane.xlu0 %4155 }
 0xb62   : > { %v4178_v14 = vadd.f32 %v4156_v19, %v4146_v33 }
 0xb65   : > { %v4162_v10 = vpop.xlane.xlu0 %4161 }
 0xb66   : > { %v4159_v31 = vpop.xlane.xlu1 %4158  ;;  %v4180_v38 = vadd.f32 %v4162_v10, %v4148_v35 }
 0xb67   : > { %v4179_v45 = vadd.f32 %v4159_v31, %v4147_v42 }
 0xb68   : > { %5975 = vrcp.f32 %v4180_v38 }
 0xb69   : > { %v4168_v47 = vpop.xlane.xlu0 %4167 }
 0xb6a   : > { %v4165_v39 = vpop.xlane.xlu1 %4164  ;;  %v4182_v60 = vadd.f32 %v4168_v47, %v4150_v55 }
 0xb6b   : > { %v4181_v44 = vadd.f32 %v4165_v39, %v4149_v41 }
 0xb6d   : > { %5977 = vrcp.f32 %v4181_v44 }
 0xb6e   : > { %v4171_v43 = vpop.xlane.xlu1 %4170  ;;  %5979 = vrcp.f32 %v4178_v14 }
 0xb6f   : > { %5981 = vrcp.f32 %v4179_v45  ;;  %v4183_v3 = vadd.f32 %v4171_v43, %v4151_v56 }
 0xb70   : > { %5983 = vrcp.f32 %v4182_v60 }
 0xb71   : > { %v4174_v59 = vpop.xlane.xlu0 %4173  ;;  %5985 = vrcp.f32 %v4183_v3 }
 0xb72   : > { %v4177_v63 = vpop.xlane.xlu1 %4176  ;;  %v4184_v51 = vadd.f32 %v4174_v59, %v4152_v2 }
 0xb73   : > { %v4185_v52 = vadd.f32 %v4177_v63, %v4153_v49 }
 0xb74   : > { %5987 = vrcp.f32 %v4184_v51 }
 0xb75   : > { %5989 = vrcp.f32 %v4185_v52  ;;  %v5976_v0 = vpop.eup %5975 }
 0xb7a   : > { %v5978_v15 = vpop.eup %5977 }
 0xb7b   : > { %v5980_v37 = vpop.eup %5979 }
 0xb7c   : > { %v5982_v24 = vpop.eup %5981 }
 0xb7d   : > { %v5984_v25 = vpop.eup %5983 }
 0xb7e   : > { %v5986_v39 = vpop.eup %5985 }
 0xb9d   : > { %v4277_v54 = vpop.f32.mrf.mxu1 }
 0xb9e   : > { %v4230_v5 = vpop.f32.mrf.mxu0  ;;  %v4380_v57 = vadd.f32 %v4277_v54, %v4148_v35 }
 0xb9f   : > { %v5558_v13 = vpop.f32.mrf.mxu1  ;;  %v4378_v1 = vadd.f32 %v4230_v5, %v4146_v33 }
 0xba0   : > { %v5552_v61 = vpop.f32.mrf.mxu0  ;;  %v4396_v18 = vmul.f32 %v5976_v0, %v4380_v57 }
 0xba1   : > { %v4280_v62 = vpop.f32.mrf.mxu1  ;;  %v4394_v36 = vmul.f32 %v5980_v37, %v4378_v1  ;;  %v5294_v1 = vld [vmem:[#allocation29] ss:$0 sm:$0xff] }
 0xba2   : > { %v4381_v11 = vadd.f32 %v4280_v62, %v4149_v41  ;;  %v4233_v6 = vpop.f32.mrf.mxu0  ;;  %v5988_v41 = vpop.eup %5987 }
 0xba3   : > { %v5559_v8 = vpop.f32.mrf.mxu1  ;;  %v4379_v20 = vadd.f32 %v4233_v6, %v4147_v42  ;;  %v5990_v42 = vpop.eup %5989 }
 0xba4   : > { %v4397_v21 = vmul.f32 %v5978_v15, %v4381_v11  ;;  %v5553_v26 = vpop.f32.mrf.mxu0 }
 0xba5   : > { %v4395_v34 = vmul.f32 %v5982_v24, %v4379_v20 }
 0xba6   : > { %v4403_v23 = vpack.c.bf16 %v4397_v21, %v4396_v18  ;;  %v4324_v17 = vpop.f32.mrf.mxu0 }
 0xba7   : > { %v4402_v7 = vpack.c.bf16 %v4395_v34, %v4394_v36  ;;  %v4382_v31 = vadd.f32 %v4324_v17, %v4150_v55 }
 0xba8   : > { %5581 = vmatmul.mubr.msk.bf16.vlgmr.msra.gmra.mxu1 %vm2692_vm4, %v4403_v23  ;;  %v5564_v19 = vpop.f32.mrf.mxu0 }
 0xba9   : > { %v4371_v9 = vpop.f32.mrf.mxu1  ;;  %5591 = vmatpush3.bf16.msra.mxu1 %v4551_v50  ;;  %5592 = vmatprep.mubr.msk.bf16.mxu1 %vm6579_vm1, %v6578_v29  ;;  %v4398_v44 = vmul.f32 %v5984_v25, %v4382_v31 }
 0xbaa   : > { %5575 = vmatmul.mubr.msk.bf16.vlgmr.msra.gmra.mxu0 %vm2692_vm4, %v4402_v7  ;;  %5596 = vmatprep.subr.bf16.mxu1 %v6578_v29  ;;  %v4327_v28 = vpop.f32.mrf.mxu0  ;;  %v4384_v10 = vadd.f32 %v4371_v9, %v4152_v2 }
 0xbab   : > { %v5570_v22 = vpop.f32.mrf.mxu1  ;;  %5585 = vmatpush3.bf16.msra.mxu0 %v4504_v16  ;;  %5586 = vmatprep.mubr.msk.bf16.mxu0 %vm6579_vm1, %v6578_v29  ;;  %v4383_v12 = vadd.f32 %v4327_v28, %v4151_v56 }
 0xbac   : > { %v5565_v33 = vpop.f32.mrf.mxu0  ;;  %v4400_v43 = vmul.f32 %v5988_v41, %v4384_v10  ;;  %v5869_v10 = vld [vmem:[%s7893_s10 + $0x10] ss:$8 sps:$4 sm:$0xff]   ;;  %v5872_v41 = vld [vmem:[%s7893_s10] ss:$8 sps:$4 sm:$0xff]  }
 0xbad   : > { %v4374_v35 = vpop.f32.mrf.mxu1  ;;  %v4399_v14 = vmul.f32 %v5986_v39, %v4383_v12  ;;  %v5871_v39 = vld [vmem:[%s7893_s10 + $0x14] ss:$8 sps:$4 sm:$0xff]   ;;  %v5874_v12 = vld [vmem:[%s7893_s10 + $0x4] ss:$8 sps:$4 sm:$0xff]  }
 0xbae   : > { %v4385_v38 = vadd.f32 %v4374_v35, %v4153_v49  ;;  %4714 = vmatprep.subr.bf16.mxu0 %v5871_v39  ;;  %v6585_v35 = vmov 0  }
 0xbaf   : > { %v5571_v45 = vpop.f32.mrf.mxu1  ;;  %v4404_v47 = vpack.c.bf16 %v4399_v14, %v4398_v44 }
 0xbb0   : > { %v4401_v46 = vmul.f32 %v5990_v42, %v4385_v38 }
 0xbb2   : > { %v4405_v48 = vpack.c.bf16 %v4401_v46, %v4400_v43  ;;  %5587 = vmatmul.mubr.msk.bf16.vlgmr.msra.gmra.mxu0 %vm2692_vm4, %v4404_v47  ;;  %v5295_v47 = vld [vmem:[#allocation30] ss:$0 sm:$0xff] }
 0xbb3   : > { %4734 = vmatprep.mubr.bf16.mxu0 %v6585_v35  ;;  %4715 = vmatpush1.bf16.msra.mxu0 %v5869_v10 }
 0xbb4   : > { %5593 = vmatmul.mubr.msk.bf16.vlgmr.msra.gmra.mxu1 %vm2692_vm4, %v4405_v48  ;;  %4716 = vmatprep.subr.bf16.mxu0 %v5874_v12 }
 0xbb5   : > { %5612 = vmatprep.mubr.msk.bf16.mxu1 %vm6579_vm1, %v6578_v29 }
 0xbb7   : > { %4717 = vmatpush1.bf16.msra.mxu0 %v5872_v41 }
 0xc68   : > { %v4493_v40 = vpop.f32.mrf.mxu1 }
 0xc69   : > { %v4595_v3 = vsel %vm1022_vm0, %v4493_v40, 0.0 }
 0xc6a   : > { %v4446_v53 = vpop.f32.mrf.mxu0  ;;  %v5582_v55 = vpop.f32.mrf.mxu1 }
 0xc6b   : > { %v4594_v2 = vsel %vm1022_vm0, %v4446_v53, 0.0  ;;  %v5296_v55 = vld [vmem:[#allocation32] ss:$0 sm:$0xff] }
 0xc6c   : > { %v5576_v56 = vpop.f32.mrf.mxu0  ;;  %v4496_v59 = vpop.f32.mrf.mxu1  ;;  %v4596_v51 = vadd.f32 %v4595_v3, %v4594_v2  ;;  %v5875_v2 = vld [vmem:[%s7894_s29 + $0x38] sm:$0xff]   ;;  %v5876_v3 = vld [vmem:[%s7894_s29 + $0x30] sm:$0xff]  }
 0xc6d   : > { %v4602_v5 = vsel %vm1022_vm0, %v4496_v59, 0.0  ;;  %5597 = vmatpush3.bf16.msra.mxu1 %v5875_v2 }
 0xc6e   : > { %v4449_v60 = vpop.f32.mrf.mxu0  ;;  %v5583_v63 = vpop.f32.mrf.mxu1  ;;  %5598 = vmatprep.subr.bf16.mxu1 %v6578_v29 }
 0xc6f   : > { %v4601_v54 = vsel %vm1022_vm0, %v4449_v60, 0.0 }
 0xc70   : > { %v5577_v49 = vpop.f32.mrf.mxu0  ;;  %v4603_v15 = vadd.f32 %v4602_v5, %v4601_v54  ;;  %v5880_v54 = vld [vmem:[%s7894_s29 + $0x10] sm:$0xff]   ;;  %v5881_v5 = vld [vmem:[%s7894_s29 + $0x8] sm:$0xff]  }
 0xc71   : > { %5599 = vmatpush3.bf16.msra.mxu1 %v5876_v3  ;;  %v5877_v49 = vld [vmem:[%s7894_s29 + $0x28] sm:$0xff]  }
 0xc72   : > { %v4540_v52 = vpop.f32.mrf.mxu0  ;;  %5600 = vmatprep.subr.bf16.mxu1 %v6578_v29 }
 0xc73   : > { %v4597_v13 = vsel %vm1022_vm0, %v4540_v52, 0.0  ;;  %v5879_v52 = vld [vmem:[%s7894_s29 + $0x18] sm:$0xff]  }
 0xc74   : > { %v4587_v57 = vpop.f32.mrf.mxu1  ;;  %v4598_v61 = vadd.f32 %v4597_v13, %v4596_v51  ;;  %v5588_v62 = vpop.f32.mrf.mxu0  ;;  %v5878_v51 = vld [vmem:[%s7894_s29 + $0x20] sm:$0xff]  }
 0xc75   : > { %v4599_v0 = vsel %vm1022_vm0, %v4587_v57, 0.0  ;;  %5601 = vmatpush3.bf16.msra.mxu1 %v5877_v49  ;;  %v5882_v13 = vld [vmem:[%s7894_s29] sm:$0xff]   ;;  %v4675_v57 = vsub.s32 1, %v7116_v32 }
 0xc76   : > { %v5594_v11 = vpop.f32.mrf.mxu1  ;;  %v4543_v6 = vpop.f32.mrf.mxu0  ;;  %v4600_v8 = vadd.f32 %v4599_v0, %v4598_v61  ;;  %5602 = vmatprep.subr.bf16.mxu1 %v6578_v29  ;;  %v4667_v61 = vld [vmem:[%s7895_s20] sm:$0x3]  ;;  %s6586_s20 = smov [#allocation33]  }
 0xc77   : > { %v4604_v30 = vsel %vm1022_vm0, %v4543_v6, 0.0  ;;  %v4676_v62 = vrot.slane %v4667_v61, %v4675_v57  ;;  %s6449_s0 = sshll.u32 %s6586_s20, 4  ;;  %s6450_s0 = int_to_ptr.vmem [resolvable:$false] %s6449_s0 }
 0xc78   : > { %v4590_v37 = vpop.f32.mrf.mxu1  ;;  %v4605_v18 = vadd.f32 %v4604_v30, %v4603_v15  ;;  %v4614_v20 = vadd.f32 %v5294_v1, %v4600_v8  ;;  %v5589_v21 = vpop.f32.mrf.mxu0  ;;  %s6451_s11 = scalar_lea.vmem %s6450_s0, 512  ;;  %p6452_p12 = scmp.lt.s32.totalorder %s7758_s25, %s6450_s0 }
 0xc79   : > { %v4606_v24 = vsel %vm1022_vm0, %v4590_v37, 0.0  ;;  %5603 = vmatpush3.bf16.msra.mxu1 %v5878_v51  ;;  %p6453_p13 = scmp.lt.s32.totalorder %s6451_s11, %s6445_s12 }
 0xc7a   : > { %v5595_v26 = vpop.f32.mrf.mxu1  ;;  %v4607_v27 = vadd.f32 %v4606_v24, %v4605_v18  ;;  %v7683_v36 = vadd.f32 %v4614_v20, %v7433_v4  ;;  %5604 = vmatprep.subr.bf16.mxu1 %v6578_v29 }
 0xc7b   : > { %p6454_p6 = por %p6453_p13, %p6452_p12 }
 0xc7c   : > { %v4615_v34 = vadd.f32 %v5294_v1, %v4607_v27  ;;  %v4620_v23 = vsel %vm1022_vm0, %v7683_v36, 0.0 }
 0xc7d   : > { %4621 = vadd.xlane.f32.xlu0 %v4620_v23  ;;  %5605 = vmatpush3.bf16.msra.mxu1 %v5879_v52  ;;  %p6455_p2 = pnand %p6454_p6, %p6448_p10 }
 0xc7e   : > { %v7688_v50 = vadd.f32 %v4615_v34, %v7438_v58  ;;  %5606 = vmatprep.subr.bf16.mxu1 %v6578_v29 }
 0xc80   : > { %v4623_v17 = vsel %vm1022_vm0, %v7688_v50, 0.0 }
 0xc81   : > { %4624 = vadd.xlane.f32.xlu1 %v4623_v17  ;;  %5607 = vmatpush3.bf16.msra.mxu1 %v5880_v54 }
 0xc82   : > { %5608 = vmatprep.subr.bf16.mxu1 %v6578_v29 }
 0xc85   : > { %5609 = vmatpush3.bf16.msra.mxu1 %v5881_v5 }
 0xc86   : > { %5610 = vmatprep.subr.bf16.mxu1 %v6578_v29  ;;  %v4671_v29 = vsub.s32 0, %v7116_v32  ;;  %v5310_v32 = vld [vmem:[%s7896_s28] ss:$0 sm:$0xff] }
 0xc88   : > { %v4672_v21 = vrot.slane %v4667_v61, %v4671_v29 }
 0xc89   : > { %5611 = vmatpush3.bf16.msra.mxu1 %v5882_v13 }
 0xd06   : > { %v4622_v7 = vpop.xlane.xlu0 %4621 }
 0xd07   : > { %v4626_v9 = vmul.f32 0.03125, %v4622_v7 }
 0xd09   : > { %v4628_v16 = vsub.f32 %v7683_v36, %v4626_v9 }
 0xd0a   : > { %v4625_v19 = vpop.xlane.xlu1 %4624 }
 0xd0b   : > { %v4627_v31 = vmul.f32 0.03125, %v4625_v19  ;;  %v4630_v4 = vmul.f32 %v4628_v16, %v4628_v16 }
 0xd0d   : > { %v4629_v22 = vsub.f32 %v7688_v50, %v4627_v31  ;;  %v4632_v25 = vsel %vm1022_vm0, %v4630_v4, 0.0 }
 0xd0e   : > { %4633 = vadd.xlane.f32.xlu0 %v4632_v25 }
 0xd0f   : > { %v4631_v28 = vmul.f32 %v4629_v22, %v4629_v22 }
 0xd11   : > { %v4635_v58 = vsel %vm1022_vm0, %v4631_v28, 0.0 }
 0xd12   : > { %4636 = vadd.xlane.f32.xlu1 %v4635_v58 }
 0xd97   : > { %v4634_v33 = vpop.xlane.xlu0 %4633 }
 0xd98   : > { %v4638_v38 = vmul.f32 0.03125, %v4634_v33 }
 0xd9a   : > { %v4640_v42 = vadd.f32 1e-05, %v4638_v38 }
 0xd9b   : > { %v4637_v44 = vpop.xlane.xlu1 %4636 }
 0xd9c   : > { %5991 = vrsqrt.f32 %v4640_v42  ;;  %v4639_v14 = vmul.f32 0.03125, %v4637_v44 }
 0xd9e   : > { %v4641_v45 = vadd.f32 1e-05, %v4639_v14 }
 0xda0   : > { %5993 = vrsqrt.f32 %v4641_v45 }
 0xda9   : > { %v5992_v43 = vpop.eup %5991 }
 0xdaa   : > { %v4644_v46 = vmul.f32 %v5992_v43, %v4628_v16 }
 0xdac   : > { %v4652_v53 = vmul.f32 %v5295_v47, %v4644_v46 }
 0xdad   : > { %v5994_v48 = vpop.eup %5993 }
 0xdae   : > { %v4645_v40 = vmul.f32 %v5994_v48, %v4629_v22  ;;  %v4660_v59 = vadd.f32 %v5296_v55, %v4652_v53 }
 0xdb0   : > { %v4653_v56 = vmul.f32 %v5295_v47, %v4645_v40 }
 0xdb2   : > { %v4661_v60 = vadd.f32 %v5296_v55, %v4653_v56 }
 0xdb4   : > { %v4662_v63 = vpack.c.bf16 %v4661_v60, %v4660_v59 }
 0xdb6   : > { %5301 = vmatmul.mubr.msk.bf16.vlgmr.msra.gmra.mxu0 %vm1022_vm0, %v4662_v63 }
 0xe76   : > { %v4736_v0 = vpop.f32.mrf.mxu0 }
 0xe77   : > { %v4737_v17 = vadd.f32 %v4736_v0, %v4672_v21 }
 0xe78   : > { %v4738_v1 = vpop.f32.mrf.mxu0 }
 0xe79   : > { %v4739_v11 = vadd.f32 %v4738_v1, %v4676_v62 }
 0xe7a   : > { %v4740_v15 = vpop.f32.mrf.mxu0 }
 0xe7b   : > { %v4747_v6 = vmul.f32 0.70710677, %v4739_v11  ;;  %v4745_v24 = vmul.f32 0.5, %v4739_v11  ;;  %v4741_v7 = vadd.f32 %v4740_v15, %v4672_v21 }
 0xe7c   : > { %v4742_v8 = vpop.f32.mrf.mxu0 }
 0xe7d   : > { %5995 = verf.f32 %v4747_v6  ;;  %v4743_v30 = vadd.f32 %v4742_v8, %v4676_v62 }
 0xe7f   : > { %v4748_v37 = vmul.f32 0.70710677, %v4743_v30  ;;  %v4746_v34 = vmul.f32 0.5, %v4743_v30 }
 0xe81   : > { %5997 = verf.f32 %v4748_v37 }
 0xe8a   : > { %v5996_v18 = vpop.eup %5995 }
 0xe8b   : > { %v4751_v20 = vadd.f32 1.0, %v5996_v18 }
 0xe8d   : > { %v4753_v27 = vmul.f32 %v4751_v20, %v4745_v24 }
 0xe8e   : > { %v5998_v26 = vpop.eup %5997 }
 0xe8f   : > { %v4752_v23 = vadd.f32 1.0, %v5998_v26  ;;  %v4755_v16 = vmul.f32 %v4753_v27, %v4737_v17 }
 0xe91   : > { %v4754_v9 = vmul.f32 %v4752_v23, %v4746_v34 }
 0xe93   : > { %v4756_v19 = vmul.f32 %v4754_v9, %v4741_v7 }
 0xe95   : > { %v4757_v31 = vpack.c.bf16 %v4756_v19, %v4755_v16 }
 0xe97   : > { %5613 = vmatmul.mubr.bf16.vlgmr.msra.gmra.mxu1 %v4757_v31 }
 0xf57   : > { %v4856_v4 = vpop.f32.mrf.mxu1 }
 0xf58   : > { %v4863_v22 = vadd.f32 %v4856_v4, %v7683_v36 }
 0xf59   : > { %v5614_v25 = vpop.f32.mrf.mxu1 }
 0xf5a   : > { %v4872_v28 = vadd.f32 %v5310_v32, %v4863_v22 }
 0xf5b   : > { %v4859_v58 = vpop.f32.mrf.mxu1 }
 0xf5c   : > { %4874 = vst.msk [vmem:[%s996_s27] sm:$0xff] %vm1022_vm0, %v4872_v28  ;;  %v4864_v10 = vadd.f32 %v4859_v58, %v7688_v50 }
 0xf5d   : > { %v5615_v39 = vpop.f32.mrf.mxu1 }
 0xf5e   : > { %v4873_v36 = vadd.f32 %v5310_v32, %v4864_v10 }
 0xf60   : > { %4875 = vst.msk [vmem:[%s996_s27 + $0x8] sm:$0xff] %vm1022_vm0, %v4873_v36 }
 0xf61   : > { %6458 = shalt.err (!%p6455_p2)
}
 0xf62   : > { %s6459_s13 = scalar_lea.hbm %s7756_s9, 256  ;;  %s6463_s27 = scalar_lea.hbm %s7897_s2, 512 }
 0xf63   : > { %p6460_p1 = scmp.ne.s32.totalorder %s7756_s9, %s6459_s13  ;;  %p6464_p8 = scmp.lt.s32.totalorder %s7756_s9, %s7897_s2 }
 0xf64   : > { %p6465_p5 = scmp.lt.s32.totalorder %s6463_s27, %s6459_s13 }
 0xf65   : > { %p6461_p0 = pnand %p6460_p1, %p6934_p4 }
 0xf66   : > { %p6466_p11 = por %p6465_p5, %p6464_p8 }
 0xf67   : > { %p6462_p3 = pneg %p6461_p0 }
 0xf69   : > { %p6467_p7 = pnand %p6466_p11, %p6462_p3 }
 0xf6b   : > { %6470 = shalt.err (!%p6467_p7)
}
 0xf6c   : > { %s6587_s12 = smov 128   ;;  %s6588_s20 = smov 8  }
 0xf6d   : > { %5682 = dma.vmem_to_hbm [thread:$0]  (%p6934_p4), %s7758_s25, 256, %s7756_s9, %s4877_s8, %s6587_s12, %s6587_s12, %s6588_s20  }
 0xf6e PF: > { %s4907_s0 = sand.u32 1, %s6537_s4   ;;  %p7898_p10 = scmp.ge.s32.totalorder %s6557_s1, 2 }
 0xf6f   : > { %s4908_s11 = scalar_lea.sflag [#allocation8], %s4907_s0 }
 0xf70   : > { %p5738_p12 = pnand %p7898_p10, %p6941_p9 }
 0xf72   : > { %p5739_p13 = pneg %p5738_p12 }
 0xf74   : > { %6532 = dma.done.wait (%p5739_p13), %s4908_s11, 256  }
 0xf75   : > { %6534 = vsyncadd (%p5739_p13), %s4908_s11, 4294967040  ;;  %s47_s1 = sadd.s32 1, %s6557_s1   ;;  %s7899_s4 = smov %s6541_s30 }
 0xf76   : > { %p44_p6 = scmp.ge.s32.totalorder %s47_s1, 4   ;;  %s7900_s30 = smov %s6545_s24 }
 0xf77   : > { %s7901_s24 = smov %s6939_s22  ;;  %s7902_s25 = smov %s6553_s5 }
 0xf78   : > { %s7903_s5 = smov %s7905_s7  ;;  %46 = sbr.rel (!%p44_p6) target bundleno = 34 (0x22), region = 231 }
 0xf7d   :  { %4913 = vsyncpa [#allocation7], 1 }
 0xf7e   :  { %4915 = vsyncpa [#allocation7 + $0x1], 1 }
 0xf7f   :  { %4916 = vsyncpa [#allocation10], 1 }
 0xf80   :  { %4917 = vsyncpa [#allocation13], 1 }
 0xf81   :  { %4918 = vsyncpa [#allocation16], 1 }
 0xf82   :  { %4919 = vsyncpa [#allocation19], 1 }
 0xf83   :  { %4920 = vsyncpa [#allocation22], 1 }
 0xf84   :  { %4921 = vsyncpa [#allocation25], 1 }
 0xf85   :  { %4922 = vsyncpa [#allocation28], 1 }
 0xf86   :  { %4923 = vsyncpa [#allocation31], 1 }
 0xf87   :  { %4924 = vsyncpa [#allocation8], 1 }
 0xf88   :  { %4926 = vsyncpa [#allocation8 + $0x1], 1 }

</bundles_post_ra>
